<compile_context>
chip_gen: v6e
topology: v6e:2x2x1
jax: 0.10.0
libtpu: 0.0.40
codegen_flags: <defaults>
</compile_context>

<pallas_src>
import functools

import numpy as np
import jax
import jax.numpy as jnp
from jax.experimental import pallas as pl
from jax.experimental.pallas import tpu as pltpu


def _round_up(x, m):
    return (x + m - 1) // m * m


# ---------------- fused Pallas kernel ----------------

def _zero_halo(a_ref, h, w):
    """Zero the 1-px halo (and any W-alignment padding columns) of a (h+2, Wp, C) scratch."""
    hp, wp, c = a_ref.shape
    dt = a_ref.dtype
    a_ref[0:1, :, :] = jnp.zeros((1, wp, c), dt)
    a_ref[h + 1:h + 2, :, :] = jnp.zeros((1, wp, c), dt)
    a_ref[:, 0:1, :] = jnp.zeros((hp, 1, c), dt)
    a_ref[:, w + 1:wp, :] = jnp.zeros((hp, wp - w - 1, c), dt)


def _conv3x3(a_ref, w_ref, b, ho, wo, *, fuse_kx):
    """3x3 valid conv over a zero-haloed VMEM activation + bias + ReLU.

    a_ref: (ho+2, >=wo+2, C) activation in compute dtype (zero halo already written)
    w_ref: (3, 3*C, C) BN-folded weights in compute dtype (rows ordered kx-major per ky)
    b    : (1, C) float32 folded BN bias
    returns (ho*wo, C) float32 (post-ReLU)
    """
    C = w_ref.shape[-1]
    acc = None
    for ky in range(3):
        if fuse_kx:
            # One K=3C MXU matmul per ky (fills the 256-deep MXU on v6e/v7x at C=128).
            taps = [a_ref[ky:ky + ho, kx:kx + wo, :] for kx in range(3)]
            lhs = jnp.concatenate(taps, axis=-1).reshape(ho * wo, 3 * C)
            d = jnp.dot(lhs, w_ref[ky], preferred_element_type=jnp.float32)
            acc = (d + b) if acc is None else (acc + d)
        else:
            for kx in range(3):
                lhs = a_ref[ky:ky + ho, kx:kx + wo, :].reshape(ho * wo, C)
                d = jnp.dot(lhs, w_ref[ky, kx * C:(kx + 1) * C, :],
                            preferred_element_type=jnp.float32)
                acc = (d + b) if acc is None else (acc + d)
    return jnp.maximum(acc, 0.0)


def _reduction_fused_kernel(x_ref, w1_ref, b1_ref, w2_ref, b2_ref, w3_ref, b3_ref,
                            o_ref, a1_ref, a2_ref, *, fuse_kx):
    # x_ref : (H, W, Cin)      unpadded input block (compute dtype)
    # w1_ref: (Cin, C)         1x1 weights with BN1 scale folded in (compute dtype)
    # w2/w3 : (3, 3*C, C)      3x3 weights with BN scale folded in (compute dtype)
    # b*_ref: (1, C)           folded BN biases (f32)
    # o_ref : (H, W, C)        output (f32)
    # a1/a2 : (H+2, Wp, C)     VMEM scratch activations with zero 1-px halo (compute dtype)
    H, W, C = o_ref.shape
    Cin = x_ref.shape[-1]

    # Zero halos (tiny O(border) stores; interiors are fully rewritten below).
    _zero_halo(a1_ref, H, W)
    _zero_halo(a2_ref, H, W)

    # ---- stage 1: 1x1 conv (BN folded) + bias + ReLU on the real HxW interior ----
    x2d = x_ref[...].reshape(H * W, Cin)
    y = jnp.dot(x2d, w1_ref[...], preferred_element_type=jnp.float32)
    y = jnp.maximum(y + b1_ref[...], 0.0)
    a1_ref[1:H + 1, 1:W + 1, :] = y.reshape(H, W, C).astype(a1_ref.dtype)

    # ---- stage 2: 3x3 conv + bias + ReLU, written into a2's interior ----
    y = _conv3x3(a1_ref, w2_ref, b2_ref[...], H, W, fuse_kx=fuse_kx)
    a2_ref[1:H + 1, 1:W + 1, :] = y.reshape(H, W, C).astype(a2_ref.dtype)

    # ---- stage 3: 3x3 conv + bias + ReLU -> output ----
    y = _conv3x3(a2_ref, w3_ref, b3_ref[...], H, W, fuse_kx=fuse_kx)
    o_ref[...] = y.reshape(H, W, C).astype(o_ref.dtype)


# ---------------- wrappers ----------------

def reduction_forward_nhwc(x_nhwc, params, *, compute_dtype=jnp.bfloat16, fuse_kx=None):
    """Fused Reduction forward in NHWC. x: (N, H, W, Cin) -> (N, H, W, C) float32."""
    N, H, W, Cin = x_nhwc.shape
    C = params["w1"].shape[1]
    if fuse_kx is None:
        # kx-im2col only when the lane concat is 128-aligned (and the MXU-depth win applies).
        fuse_kx = (C % 128 == 0)

    s1, bb1 = params["bn1"]
    s2, bb2 = params["bn2"]
    s3, bb3 = params["bn3"]

    # Fold eval-mode BN scale into conv weights in f32, then cast operands to compute dtype.
    # 3x3 weights are pre-reshaped to (3, 3C, C) (kx-major rows per ky) for the kernel.
    w1 = (params["w1"].astype(jnp.float32) * s1[0]).astype(compute_dtype)
    w2 = (params["w2"].astype(jnp.float32) * s2[0]).reshape(3, 3 * C, C).astype(compute_dtype)
    w3 = (params["w3"].astype(jnp.float32) * s3[0]).reshape(3, 3 * C, C).astype(compute_dtype)
    b1 = bb1.astype(jnp.float32)
    b2 = bb2.astype(jnp.float32)
    b3 = bb3.astype(jnp.float32)
    x = x_nhwc.astype(compute_dtype)

    Wp = _round_up(W + 2, 8)   # sublane-aligned scratch width (extra cols zeroed, never read)

    kernel = functools.partial(_reduction_fused_kernel, fuse_kx=fuse_kx)

    cbytes = np.dtype(compute_dtype).itemsize
    flops = 2 * N * H * W * (Cin * C + 18 * C * C)
    bytes_accessed = (cbytes * (N * H * W * Cin + Cin * C + 18 * C * C)
                      + 4 * (N * H * W * C + 3 * C))

    out = pl.pallas_call(
        kernel,
        out_shape=jax.ShapeDtypeStruct((N, H, W, C), jnp.float32),
        grid_spec=pltpu.PrefetchScalarGridSpec(
            num_scalar_prefetch=0,
            grid=(N,),
            in_specs=[
                pl.BlockSpec((None, H, W, Cin), lambda n: (n, 0, 0, 0)),
                pl.BlockSpec((Cin, C), lambda n: (0, 0)),
                pl.BlockSpec((1, C), lambda n: (0, 0)),
                pl.BlockSpec((3, 3 * C, C), lambda n: (0, 0, 0)),
                pl.BlockSpec((1, C), lambda n: (0, 0)),
                pl.BlockSpec((3, 3 * C, C), lambda n: (0, 0, 0)),
                pl.BlockSpec((1, C), lambda n: (0, 0)),
            ],
            out_specs=pl.BlockSpec((None, H, W, C), lambda n: (n, 0, 0, 0)),
            scratch_shapes=[
                pltpu.VMEM((H + 2, Wp, C), compute_dtype),   # stage-1 activation (zero 1-halo)
                pltpu.VMEM((H + 2, Wp, C), compute_dtype),   # stage-2 activation (zero 1-halo)
            ],
        ),
        compiler_params=pltpu.CompilerParams(dimension_semantics=("parallel",)),
        cost_estimate=pl.CostEstimate(flops=flops, transcendentals=0,
                                      bytes_accessed=bytes_accessed),
    )(x, w1, b1, w2, b2, w3, b3)
    return out


def reduction_forward(x_nchw, params, *, compute_dtype=jnp.bfloat16, fuse_kx=None):
    """NCHW compatibility wrapper (matches the PyTorch module's layout).

    Prefer reduction_forward_nhwc in NHWC pipelines to avoid these two HBM transposes.
    """
    x = jnp.transpose(x_nchw, (0, 2, 3, 1))
    out = reduction_forward_nhwc(x, params, compute_dtype=compute_dtype, fuse_kx=fuse_kx)
    return jnp.transpose(out, (0, 3, 1, 2))


# ---------------- params (eval-mode BN, deterministic) ----------------

def _fold_bn(gamma, beta, mean, var, eps=1e-5):
    scale = gamma / jnp.sqrt(var + eps)
    bias = beta - mean * scale
    return scale[None, :], bias[None, :]   # (1, C) rows


def make_reduction_params(key, in_channel, out_channel):
    ks = jax.random.split(key, 9)
    p = {}
    p["w1"] = 0.1 * jax.random.normal(ks[0], (in_channel, out_channel), jnp.float32)
    p["w2"] = 0.1 * jax.random.normal(ks[1], (3, 3, out_channel, out_channel), jnp.float32)
    p["w3"] = 0.1 * jax.random.normal(ks[2], (3, 3, out_channel, out_channel), jnp.float32)
    for i, (kg, kb) in enumerate(((ks[3], ks[4]), (ks[5], ks[6]), (ks[7], ks[8])), start=1):
        gamma = 1.0 + 0.1 * jax.random.normal(kg, (out_channel,), jnp.float32)
        beta = 0.1 * jax.random.normal(kb, (out_channel,), jnp.float32)
        mean = jnp.linspace(-0.2, 0.2, out_channel, dtype=jnp.float32)
        var = jnp.linspace(0.8, 1.2, out_channel, dtype=jnp.float32)
        p[f"bn{i}"] = _fold_bn(gamma, beta, mean, var)
    return p


# ---------------- plain-JAX reference for validation ----------------

def _ref_forward(x_nchw, params):
    x = jnp.transpose(x_nchw, (0, 2, 3, 1)).astype(jnp.float32)

    def bn_relu(y, sb):
        s, b = sb
        return jnp.maximum(y * s[0] + b[0], 0.0)

    y = jnp.einsum("nhwc,cd->nhwd", x, params["w1"],
                   precision=jax.lax.Precision.HIGHEST)
    y = bn_relu(y, params["bn1"])
    for wi, bni in ((params["w2"], params["bn2"]), (params["w3"], params["bn3"])):
        y = jax.lax.conv_general_dilated(
            y, wi, window_strides=(1, 1), padding="SAME",
            dimension_numbers=("NHWC", "HWIO", "NHWC"),
            precision=jax.lax.Precision.HIGHEST)
        y = bn_relu(y, bni)
    return jnp.transpose(y, (0, 3, 1, 2))


if __name__ == "__main__":
    key = jax.random.PRNGKey(0)
    k_x, k_p, k_x2, k_p2 = jax.random.split(key, 4)

    # -- config A: small channels, f32 operands (tight check; per-tap MXU path) --
    N, Cin, Cout, H, W = 2, 8, 16, 16, 16
    x = jax.random.normal(k_x, (N, Cin, H, W), jnp.float32)
    params = make_reduction_params(k_p, Cin, Cout)
    ref = jax.block_until_ready(_ref_forward(x, params))

    out = jax.block_until_ready(reduction_forward(x, params, compute_dtype=jnp.float32))
    assert out.shape == (N, Cout, H, W), out.shape
    err = float(jnp.max(jnp.abs(out - ref)))
    assert jnp.allclose(out, ref, atol=1e-4, rtol=1e-4), err

    # -- config A': same shapes, default bf16 operands / f32 accumulation (looser tolerance) --
    out_bf = jax.block_until_ready(reduction_forward(x, params))
    err_bf = float(jnp.max(jnp.abs(out_bf - ref)))
    assert jnp.allclose(out_bf, ref, atol=5e-2, rtol=5e-2), err_bf

    # -- config B: MXU-width channels (C=128) exercising the fused kx-im2col (K=3C) path, f32 --
    N2, Cin2, Cout2, H2, W2 = 1, 32, 128, 16, 16
    x2 = jax.random.normal(k_x2, (N2, Cin2, H2, W2), jnp.float32)
    params2 = make_reduction_params(k_p2, Cin2, Cout2)
    ref2 = jax.block_until_ready(_ref_forward(x2, params2))
    out2 = jax.block_until_ready(reduction_forward(x2, params2, compute_dtype=jnp.float32))
    err2 = float(jnp.max(jnp.abs(out2 - ref2)))
    assert jnp.allclose(out2, ref2, atol=2e-3, rtol=2e-3), err2

    print("KERNEL_OK")
</pallas_src>

<mosaic_0001>
module attributes {stable_mosaic.version = 11 : i64} {
  func.func @_reduction_fused_kernel(%arg0: i32, %arg1: memref<1x16x16x8xf32, #tpu.memory_space<vmem>>, %arg2: memref<8x16xf32, #tpu.memory_space<vmem>>, %arg3: memref<1x16xf32, #tpu.memory_space<vmem>>, %arg4: memref<3x48x16xf32, #tpu.memory_space<vmem>>, %arg5: memref<1x16xf32, #tpu.memory_space<vmem>>, %arg6: memref<3x48x16xf32, #tpu.memory_space<vmem>>, %arg7: memref<1x16xf32, #tpu.memory_space<vmem>>, %arg8: memref<1x16x16x16xf32, #tpu.memory_space<vmem>>, %arg9: memref<18x24x16xf32, #tpu.memory_space<vmem>>, %arg10: memref<18x24x16xf32, #tpu.memory_space<vmem>>) attributes {dimension_semantics = [#tpu.dimension_semantics<parallel>], iteration_bounds = array<i64: 2>, scalar_prefetch = 0 : i64, scratch_operands = 2 : i64, tpu.core_type = #tpu.core_type<tc>, window_params = [{transform_indices = @transform_0, window_bounds = array<i64: 1, 16, 16, 8>}, {pipeline_mode = #tpu.pipeline_mode<synchronous>, transform_indices = @transform_1, window_bounds = array<i64: 8, 16>}, {pipeline_mode = #tpu.pipeline_mode<synchronous>, transform_indices = @transform_2, window_bounds = array<i64: 1, 16>}, {pipeline_mode = #tpu.pipeline_mode<synchronous>, transform_indices = @transform_3, window_bounds = array<i64: 3, 48, 16>}, {pipeline_mode = #tpu.pipeline_mode<synchronous>, transform_indices = @transform_4, window_bounds = array<i64: 1, 16>}, {pipeline_mode = #tpu.pipeline_mode<synchronous>, transform_indices = @transform_5, window_bounds = array<i64: 3, 48, 16>}, {pipeline_mode = #tpu.pipeline_mode<synchronous>, transform_indices = @transform_6, window_bounds = array<i64: 1, 16>}, {transform_indices = @transform_7, window_bounds = array<i64: 1, 16, 16, 16>}]} {
    %cst = arith.constant 0.000000e+00 : f32
    %0 = vector.broadcast %cst : f32 to vector<1x24x16xf32>
    %c0 = arith.constant 0 : index
    %c0_0 = arith.constant 0 : index
    %c0_1 = arith.constant 0 : index
    %1 = vector.load %arg9[%c0, %c0_0, %c0_1] : memref<18x24x16xf32, #tpu.memory_space<vmem>>, vector<1x24x16xf32>
    tpu.vector_store %arg9[%c0, %c0_0, %c0_1], %0 {strides = array<i32>} : memref<18x24x16xf32, #tpu.memory_space<vmem>>, vector<1x24x16xf32>,
    %cst_2 = arith.constant 0.000000e+00 : f32
    %2 = vector.broadcast %cst_2 : f32 to vector<1x24x16xf32>
    %c17 = arith.constant 17 : index
    %c0_3 = arith.constant 0 : index
    %c0_4 = arith.constant 0 : index
    %3 = vector.load %arg9[%c17, %c0_3, %c0_4] : memref<18x24x16xf32, #tpu.memory_space<vmem>>, vector<1x24x16xf32>
    tpu.vector_store %arg9[%c17, %c0_3, %c0_4], %2 {strides = array<i32>} : memref<18x24x16xf32, #tpu.memory_space<vmem>>, vector<1x24x16xf32>,
    %cst_5 = arith.constant 0.000000e+00 : f32
    %4 = vector.broadcast %cst_5 : f32 to vector<18x1x16xf32>
    %c0_6 = arith.constant 0 : index
    %c0_7 = arith.constant 0 : index
    %c0_8 = arith.constant 0 : index
    %5 = vector.load %arg9[%c0_6, %c0_7, %c0_8] : memref<18x24x16xf32, #tpu.memory_space<vmem>>, vector<18x1x16xf32>
    tpu.vector_store %arg9[%c0_6, %c0_7, %c0_8], %4 {strides = array<i32>} : memref<18x24x16xf32, #tpu.memory_space<vmem>>, vector<18x1x16xf32>,
    %cst_9 = arith.constant 0.000000e+00 : f32
    %6 = vector.broadcast %cst_9 : f32 to vector<18x7x16xf32>
    %c0_10 = arith.constant 0 : index
    %c17_11 = arith.constant 17 : index
    %c0_12 = arith.constant 0 : index
    %7 = vector.load %arg9[%c0_10, %c17_11, %c0_12] : memref<18x24x16xf32, #tpu.memory_space<vmem>>, vector<18x7x16xf32>
    tpu.vector_store %arg9[%c0_10, %c17_11, %c0_12], %6 {strides = array<i32>} : memref<18x24x16xf32, #tpu.memory_space<vmem>>, vector<18x7x16xf32>,
    %cst_13 = arith.constant 0.000000e+00 : f32
    %8 = vector.broadcast %cst_13 : f32 to vector<1x24x16xf32>
    %c0_14 = arith.constant 0 : index
    %c0_15 = arith.constant 0 : index
    %c0_16 = arith.constant 0 : index
    %9 = vector.load %arg10[%c0_14, %c0_15, %c0_16] : memref<18x24x16xf32, #tpu.memory_space<vmem>>, vector<1x24x16xf32>
    tpu.vector_store %arg10[%c0_14, %c0_15, %c0_16], %8 {strides = array<i32>} : memref<18x24x16xf32, #tpu.memory_space<vmem>>, vector<1x24x16xf32>,
    %cst_17 = arith.constant 0.000000e+00 : f32
    %10 = vector.broadcast %cst_17 : f32 to vector<1x24x16xf32>
    %c17_18 = arith.constant 17 : index
    %c0_19 = arith.constant 0 : index
    %c0_20 = arith.constant 0 : index
    %11 = vector.load %arg10[%c17_18, %c0_19, %c0_20] : memref<18x24x16xf32, #tpu.memory_space<vmem>>, vector<1x24x16xf32>
    tpu.vector_store %arg10[%c17_18, %c0_19, %c0_20], %10 {strides = array<i32>} : memref<18x24x16xf32, #tpu.memory_space<vmem>>, vector<1x24x16xf32>,
    %cst_21 = arith.constant 0.000000e+00 : f32
    %12 = vector.broadcast %cst_21 : f32 to vector<18x1x16xf32>
    %c0_22 = arith.constant 0 : index
    %c0_23 = arith.constant 0 : index
    %c0_24 = arith.constant 0 : index
    %13 = vector.load %arg10[%c0_22, %c0_23, %c0_24] : memref<18x24x16xf32, #tpu.memory_space<vmem>>, vector<18x1x16xf32>
    tpu.vector_store %arg10[%c0_22, %c0_23, %c0_24], %12 {strides = array<i32>} : memref<18x24x16xf32, #tpu.memory_space<vmem>>, vector<18x1x16xf32>,
    %cst_25 = arith.constant 0.000000e+00 : f32
    %14 = vector.broadcast %cst_25 : f32 to vector<18x7x16xf32>
    %c0_26 = arith.constant 0 : index
    %c17_27 = arith.constant 17 : index
    %c0_28 = arith.constant 0 : index
    %15 = vector.load %arg10[%c0_26, %c17_27, %c0_28] : memref<18x24x16xf32, #tpu.memory_space<vmem>>, vector<18x7x16xf32>
    tpu.vector_store %arg10[%c0_26, %c17_27, %c0_28], %14 {strides = array<i32>} : memref<18x24x16xf32, #tpu.memory_space<vmem>>, vector<18x7x16xf32>,
    %c0_29 = arith.constant 0 : index
    %c0_30 = arith.constant 0 : index
    %c0_31 = arith.constant 0 : index
    %c0_32 = arith.constant 0 : index
    %16 = vector.load %arg1[%c0_29, %c0_30, %c0_31, %c0_32] : memref<1x16x16x8xf32, #tpu.memory_space<vmem>>, vector<1x16x16x8xf32>
    %17 = vector.shape_cast %16 : vector<1x16x16x8xf32> to vector<16x16x8xf32>
    %18 = vector.shape_cast %17 : vector<16x16x8xf32> to vector<256x8xf32>
    %c0_33 = arith.constant 0 : index
    %c0_34 = arith.constant 0 : index
    %19 = vector.load %arg2[%c0_33, %c0_34] : memref<8x16xf32, #tpu.memory_space<vmem>>, vector<8x16xf32>
    %cst_35 = arith.constant dense<0.000000e+00> : vector<256x16xf32>
    %20 = tpu.matmul %18, %19, %cst_35 {dimension_numbers = #tpu.dot_dimension_numbers<[1], [0], [0], [1], [0, 0, 1, 1], [], []>} : vector<256x8xf32>, vector<8x16xf32>, vector<256x16xf32> -> vector<256x16xf32>
    %c0_36 = arith.constant 0 : index
    %c0_37 = arith.constant 0 : index
    %21 = vector.load %arg3[%c0_36, %c0_37] : memref<1x16xf32, #tpu.memory_space<vmem>>, vector<1x16xf32>
    %22 = vector.broadcast %21 : vector<1x16xf32> to vector<256x16xf32>
    %23 = arith.addf %20, %22 : vector<256x16xf32>
    %cst_38 = arith.constant 0.000000e+00 : f32
    %24 = vector.broadcast %cst_38 : f32 to vector<256x16xf32>
    %25 = arith.maximumf %23, %24 : vector<256x16xf32>
    %26 = vector.shape_cast %25 : vector<256x16xf32> to vector<16x16x16xf32>
    %c1 = arith.constant 1 : index
    %c1_39 = arith.constant 1 : index
    %c0_40 = arith.constant 0 : index
    %27 = vector.load %arg9[%c1, %c1_39, %c0_40] : memref<18x24x16xf32, #tpu.memory_space<vmem>>, vector<16x16x16xf32>
    tpu.vector_store %arg9[%c1, %c1_39, %c0_40], %26 {strides = array<i32>} : memref<18x24x16xf32, #tpu.memory_space<vmem>>, vector<16x16x16xf32>,
    %c0_41 = arith.constant 0 : index
    %c0_42 = arith.constant 0 : index
    %28 = vector.load %arg5[%c0_41, %c0_42] : memref<1x16xf32, #tpu.memory_space<vmem>>, vector<1x16xf32>
    %c0_43 = arith.constant 0 : index
    %c0_44 = arith.constant 0 : index
    %c0_45 = arith.constant 0 : index
    %29 = vector.load %arg9[%c0_43, %c0_44, %c0_45] : memref<18x24x16xf32, #tpu.memory_space<vmem>>, vector<16x16x16xf32>
    %30 = vector.shape_cast %29 : vector<16x16x16xf32> to vector<256x16xf32>
    %c0_46 = arith.constant 0 : index
    %c0_47 = arith.constant 0 : index
    %c0_48 = arith.constant 0 : index
    %31 = vector.load %arg4[%c0_46, %c0_47, %c0_48] : memref<3x48x16xf32, #tpu.memory_space<vmem>>, vector<1x16x16xf32>
    %32 = vector.shape_cast %31 : vector<1x16x16xf32> to vector<16x16xf32>
    %cst_49 = arith.constant dense<0.000000e+00> : vector<256x16xf32>
    %33 = tpu.matmul %30, %32, %cst_49 {dimension_numbers = #tpu.dot_dimension_numbers<[1], [0], [0], [1], [0, 0, 1, 1], [], []>} : vector<256x16xf32>, vector<16x16xf32>, vector<256x16xf32> -> vector<256x16xf32>
    %34 = vector.broadcast %28 : vector<1x16xf32> to vector<256x16xf32>
    %35 = arith.addf %33, %34 : vector<256x16xf32>
    %c0_50 = arith.constant 0 : index
    %c1_51 = arith.constant 1 : index
    %c0_52 = arith.constant 0 : index
    %36 = vector.load %arg9[%c0_50, %c1_51, %c0_52] : memref<18x24x16xf32, #tpu.memory_space<vmem>>, vector<16x16x16xf32>
    %37 = vector.shape_cast %36 : vector<16x16x16xf32> to vector<256x16xf32>
    %c0_53 = arith.constant 0 : index
    %c16 = arith.constant 16 : index
    %c0_54 = arith.constant 0 : index
    %38 = vector.load %arg4[%c0_53, %c16, %c0_54] : memref<3x48x16xf32, #tpu.memory_space<vmem>>, vector<1x16x16xf32>
    %39 = vector.shape_cast %38 : vector<1x16x16xf32> to vector<16x16xf32>
    %cst_55 = arith.constant dense<0.000000e+00> : vector<256x16xf32>
    %40 = tpu.matmul %37, %39, %cst_55 {dimension_numbers = #tpu.dot_dimension_numbers<[1], [0], [0], [1], [0, 0, 1, 1], [], []>} : vector<256x16xf32>, vector<16x16xf32>, vector<256x16xf32> -> vector<256x16xf32>
    %41 = arith.addf %35, %40 : vector<256x16xf32>
    %c0_56 = arith.constant 0 : index
    %c2 = arith.constant 2 : index
    %c0_57 = arith.constant 0 : index
    %42 = vector.load %arg9[%c0_56, %c2, %c0_57] : memref<18x24x16xf32, #tpu.memory_space<vmem>>, vector<16x16x16xf32>
    %43 = vector.shape_cast %42 : vector<16x16x16xf32> to vector<256x16xf32>
    %c0_58 = arith.constant 0 : index
    %c32 = arith.constant 32 : index
    %c0_59 = arith.constant 0 : index
    %44 = vector.load %arg4[%c0_58, %c32, %c0_59] : memref<3x48x16xf32, #tpu.memory_space<vmem>>, vector<1x16x16xf32>
    %45 = vector.shape_cast %44 : vector<1x16x16xf32> to vector<16x16xf32>
    %cst_60 = arith.constant dense<0.000000e+00> : vector<256x16xf32>
    %46 = tpu.matmul %43, %45, %cst_60 {dimension_numbers = #tpu.dot_dimension_numbers<[1], [0], [0], [1], [0, 0, 1, 1], [], []>} : vector<256x16xf32>, vector<16x16xf32>, vector<256x16xf32> -> vector<256x16xf32>
    %47 = arith.addf %41, %46 : vector<256x16xf32>
    %c1_61 = arith.constant 1 : index
    %c0_62 = arith.constant 0 : index
    %c0_63 = arith.constant 0 : index
    %48 = vector.load %arg9[%c1_61, %c0_62, %c0_63] : memref<18x24x16xf32, #tpu.memory_space<vmem>>, vector<16x16x16xf32>
    %49 = vector.shape_cast %48 : vector<16x16x16xf32> to vector<256x16xf32>
    %c1_64 = arith.constant 1 : index
    %c0_65 = arith.constant 0 : index
    %c0_66 = arith.constant 0 : index
    %50 = vector.load %arg4[%c1_64, %c0_65, %c0_66] : memref<3x48x16xf32, #tpu.memory_space<vmem>>, vector<1x16x16xf32>
    %51 = vector.shape_cast %50 : vector<1x16x16xf32> to vector<16x16xf32>
    %cst_67 = arith.constant dense<0.000000e+00> : vector<256x16xf32>
    %52 = tpu.matmul %49, %51, %cst_67 {dimension_numbers = #tpu.dot_dimension_numbers<[1], [0], [0], [1], [0, 0, 1, 1], [], []>} : vector<256x16xf32>, vector<16x16xf32>, vector<256x16xf32> -> vector<256x16xf32>
    %53 = arith.addf %47, %52 : vector<256x16xf32>
    %c1_68 = arith.constant 1 : index
    %c1_69 = arith.constant 1 : index
    %c0_70 = arith.constant 0 : index
    %54 = vector.load %arg9[%c1_68, %c1_69, %c0_70] : memref<18x24x16xf32, #tpu.memory_space<vmem>>, vector<16x16x16xf32>
    %55 = vector.shape_cast %54 : vector<16x16x16xf32> to vector<256x16xf32>
    %c1_71 = arith.constant 1 : index
    %c16_72 = arith.constant 16 : index
    %c0_73 = arith.constant 0 : index
    %56 = vector.load %arg4[%c1_71, %c16_72, %c0_73] : memref<3x48x16xf32, #tpu.memory_space<vmem>>, vector<1x16x16xf32>
    %57 = vector.shape_cast %56 : vector<1x16x16xf32> to vector<16x16xf32>
    %cst_74 = arith.constant dense<0.000000e+00> : vector<256x16xf32>
    %58 = tpu.matmul %55, %57, %cst_74 {dimension_numbers = #tpu.dot_dimension_numbers<[1], [0], [0], [1], [0, 0, 1, 1], [], []>} : vector<256x16xf32>, vector<16x16xf32>, vector<256x16xf32> -> vector<256x16xf32>
    %59 = arith.addf %53, %58 : vector<256x16xf32>
    %c1_75 = arith.constant 1 : index
    %c2_76 = arith.constant 2 : index
    %c0_77 = arith.constant 0 : index
    %60 = vector.load %arg9[%c1_75, %c2_76, %c0_77] : memref<18x24x16xf32, #tpu.memory_space<vmem>>, vector<16x16x16xf32>
    %61 = vector.shape_cast %60 : vector<16x16x16xf32> to vector<256x16xf32>
    %c1_78 = arith.constant 1 : index
    %c32_79 = arith.constant 32 : index
    %c0_80 = arith.constant 0 : index
    %62 = vector.load %arg4[%c1_78, %c32_79, %c0_80] : memref<3x48x16xf32, #tpu.memory_space<vmem>>, vector<1x16x16xf32>
    %63 = vector.shape_cast %62 : vector<1x16x16xf32> to vector<16x16xf32>
    %cst_81 = arith.constant dense<0.000000e+00> : vector<256x16xf32>
    %64 = tpu.matmul %61, %63, %cst_81 {dimension_numbers = #tpu.dot_dimension_numbers<[1], [0], [0], [1], [0, 0, 1, 1], [], []>} : vector<256x16xf32>, vector<16x16xf32>, vector<256x16xf32> -> vector<256x16xf32>
    %65 = arith.addf %59, %64 : vector<256x16xf32>
    %c2_82 = arith.constant 2 : index
    %c0_83 = arith.constant 0 : index
    %c0_84 = arith.constant 0 : index
    %66 = vector.load %arg9[%c2_82, %c0_83, %c0_84] : memref<18x24x16xf32, #tpu.memory_space<vmem>>, vector<16x16x16xf32>
    %67 = vector.shape_cast %66 : vector<16x16x16xf32> to vector<256x16xf32>
    %c2_85 = arith.constant 2 : index
    %c0_86 = arith.constant 0 : index
    %c0_87 = arith.constant 0 : index
    %68 = vector.load %arg4[%c2_85, %c0_86, %c0_87] : memref<3x48x16xf32, #tpu.memory_space<vmem>>, vector<1x16x16xf32>
    %69 = vector.shape_cast %68 : vector<1x16x16xf32> to vector<16x16xf32>
    %cst_88 = arith.constant dense<0.000000e+00> : vector<256x16xf32>
    %70 = tpu.matmul %67, %69, %cst_88 {dimension_numbers = #tpu.dot_dimension_numbers<[1], [0], [0], [1], [0, 0, 1, 1], [], []>} : vector<256x16xf32>, vector<16x16xf32>, vector<256x16xf32> -> vector<256x16xf32>
    %71 = arith.addf %65, %70 : vector<256x16xf32>
    %c2_89 = arith.constant 2 : index
    %c1_90 = arith.constant 1 : index
    %c0_91 = arith.constant 0 : index
    %72 = vector.load %arg9[%c2_89, %c1_90, %c0_91] : memref<18x24x16xf32, #tpu.memory_space<vmem>>, vector<16x16x16xf32>
    %73 = vector.shape_cast %72 : vector<16x16x16xf32> to vector<256x16xf32>
    %c2_92 = arith.constant 2 : index
    %c16_93 = arith.constant 16 : index
    %c0_94 = arith.constant 0 : index
    %74 = vector.load %arg4[%c2_92, %c16_93, %c0_94] : memref<3x48x16xf32, #tpu.memory_space<vmem>>, vector<1x16x16xf32>
    %75 = vector.shape_cast %74 : vector<1x16x16xf32> to vector<16x16xf32>
    %cst_95 = arith.constant dense<0.000000e+00> : vector<256x16xf32>
    %76 = tpu.matmul %73, %75, %cst_95 {dimension_numbers = #tpu.dot_dimension_numbers<[1], [0], [0], [1], [0, 0, 1, 1], [], []>} : vector<256x16xf32>, vector<16x16xf32>, vector<256x16xf32> -> vector<256x16xf32>
    %77 = arith.addf %71, %76 : vector<256x16xf32>
    %c2_96 = arith.constant 2 : index
    %c2_97 = arith.constant 2 : index
    %c0_98 = arith.constant 0 : index
    %78 = vector.load %arg9[%c2_96, %c2_97, %c0_98] : memref<18x24x16xf32, #tpu.memory_space<vmem>>, vector<16x16x16xf32>
    %79 = vector.shape_cast %78 : vector<16x16x16xf32> to vector<256x16xf32>
    %c2_99 = arith.constant 2 : index
    %c32_100 = arith.constant 32 : index
    %c0_101 = arith.constant 0 : index
    %80 = vector.load %arg4[%c2_99, %c32_100, %c0_101] : memref<3x48x16xf32, #tpu.memory_space<vmem>>, vector<1x16x16xf32>
    %81 = vector.shape_cast %80 : vector<1x16x16xf32> to vector<16x16xf32>
    %cst_102 = arith.constant dense<0.000000e+00> : vector<256x16xf32>
    %82 = tpu.matmul %79, %81, %cst_102 {dimension_numbers = #tpu.dot_dimension_numbers<[1], [0], [0], [1], [0, 0, 1, 1], [], []>} : vector<256x16xf32>, vector<16x16xf32>, vector<256x16xf32> -> vector<256x16xf32>
    %83 = arith.addf %77, %82 : vector<256x16xf32>
    %cst_103 = arith.constant 0.000000e+00 : f32
    %84 = vector.broadcast %cst_103 : f32 to vector<256x16xf32>
    %85 = arith.maximumf %83, %84 : vector<256x16xf32>
    %86 = vector.shape_cast %85 : vector<256x16xf32> to vector<16x16x16xf32>
    %c1_104 = arith.constant 1 : index
    %c1_105 = arith.constant 1 : index
    %c0_106 = arith.constant 0 : index
    %87 = vector.load %arg10[%c1_104, %c1_105, %c0_106] : memref<18x24x16xf32, #tpu.memory_space<vmem>>, vector<16x16x16xf32>
    tpu.vector_store %arg10[%c1_104, %c1_105, %c0_106], %86 {strides = array<i32>} : memref<18x24x16xf32, #tpu.memory_space<vmem>>, vector<16x16x16xf32>,
    %c0_107 = arith.constant 0 : index
    %c0_108 = arith.constant 0 : index
    %88 = vector.load %arg7[%c0_107, %c0_108] : memref<1x16xf32, #tpu.memory_space<vmem>>, vector<1x16xf32>
    %c0_109 = arith.constant 0 : index
    %c0_110 = arith.constant 0 : index
    %c0_111 = arith.constant 0 : index
    %89 = vector.load %arg10[%c0_109, %c0_110, %c0_111] : memref<18x24x16xf32, #tpu.memory_space<vmem>>, vector<16x16x16xf32>
    %90 = vector.shape_cast %89 : vector<16x16x16xf32> to vector<256x16xf32>
    %c0_112 = arith.constant 0 : index
    %c0_113 = arith.constant 0 : index
    %c0_114 = arith.constant 0 : index
    %91 = vector.load %arg6[%c0_112, %c0_113, %c0_114] : memref<3x48x16xf32, #tpu.memory_space<vmem>>, vector<1x16x16xf32>
    %92 = vector.shape_cast %91 : vector<1x16x16xf32> to vector<16x16xf32>
    %cst_115 = arith.constant dense<0.000000e+00> : vector<256x16xf32>
    %93 = tpu.matmul %90, %92, %cst_115 {dimension_numbers = #tpu.dot_dimension_numbers<[1], [0], [0], [1], [0, 0, 1, 1], [], []>} : vector<256x16xf32>, vector<16x16xf32>, vector<256x16xf32> -> vector<256x16xf32>
    %94 = vector.broadcast %88 : vector<1x16xf32> to vector<256x16xf32>
    %95 = arith.addf %93, %94 : vector<256x16xf32>
    %c0_116 = arith.constant 0 : index
    %c1_117 = arith.constant 1 : index
    %c0_118 = arith.constant 0 : index
    %96 = vector.load %arg10[%c0_116, %c1_117, %c0_118] : memref<18x24x16xf32, #tpu.memory_space<vmem>>, vector<16x16x16xf32>
    %97 = vector.shape_cast %96 : vector<16x16x16xf32> to vector<256x16xf32>
    %c0_119 = arith.constant 0 : index
    %c16_120 = arith.constant 16 : index
    %c0_121 = arith.constant 0 : index
    %98 = vector.load %arg6[%c0_119, %c16_120, %c0_121] : memref<3x48x16xf32, #tpu.memory_space<vmem>>, vector<1x16x16xf32>
    %99 = vector.shape_cast %98 : vector<1x16x16xf32> to vector<16x16xf32>
    %cst_122 = arith.constant dense<0.000000e+00> : vector<256x16xf32>
    %100 = tpu.matmul %97, %99, %cst_122 {dimension_numbers = #tpu.dot_dimension_numbers<[1], [0], [0], [1], [0, 0, 1, 1], [], []>} : vector<256x16xf32>, vector<16x16xf32>, vector<256x16xf32> -> vector<256x16xf32>
    %101 = arith.addf %95, %100 : vector<256x16xf32>
    %c0_123 = arith.constant 0 : index
    %c2_124 = arith.constant 2 : index
    %c0_125 = arith.constant 0 : index
    %102 = vector.load %arg10[%c0_123, %c2_124, %c0_125] : memref<18x24x16xf32, #tpu.memory_space<vmem>>, vector<16x16x16xf32>
    %103 = vector.shape_cast %102 : vector<16x16x16xf32> to vector<256x16xf32>
    %c0_126 = arith.constant 0 : index
    %c32_127 = arith.constant 32 : index
    %c0_128 = arith.constant 0 : index
    %104 = vector.load %arg6[%c0_126, %c32_127, %c0_128] : memref<3x48x16xf32, #tpu.memory_space<vmem>>, vector<1x16x16xf32>
    %105 = vector.shape_cast %104 : vector<1x16x16xf32> to vector<16x16xf32>
    %cst_129 = arith.constant dense<0.000000e+00> : vector<256x16xf32>
    %106 = tpu.matmul %103, %105, %cst_129 {dimension_numbers = #tpu.dot_dimension_numbers<[1], [0], [0], [1], [0, 0, 1, 1], [], []>} : vector<256x16xf32>, vector<16x16xf32>, vector<256x16xf32> -> vector<256x16xf32>
    %107 = arith.addf %101, %106 : vector<256x16xf32>
    %c1_130 = arith.constant 1 : index
    %c0_131 = arith.constant 0 : index
    %c0_132 = arith.constant 0 : index
    %108 = vector.load %arg10[%c1_130, %c0_131, %c0_132] : memref<18x24x16xf32, #tpu.memory_space<vmem>>, vector<16x16x16xf32>
    %109 = vector.shape_cast %108 : vector<16x16x16xf32> to vector<256x16xf32>
    %c1_133 = arith.constant 1 : index
    %c0_134 = arith.constant 0 : index
    %c0_135 = arith.constant 0 : index
    %110 = vector.load %arg6[%c1_133, %c0_134, %c0_135] : memref<3x48x16xf32, #tpu.memory_space<vmem>>, vector<1x16x16xf32>
    %111 = vector.shape_cast %110 : vector<1x16x16xf32> to vector<16x16xf32>
    %cst_136 = arith.constant dense<0.000000e+00> : vector<256x16xf32>
    %112 = tpu.matmul %109, %111, %cst_136 {dimension_numbers = #tpu.dot_dimension_numbers<[1], [0], [0], [1], [0, 0, 1, 1], [], []>} : vector<256x16xf32>, vector<16x16xf32>, vector<256x16xf32> -> vector<256x16xf32>
    %113 = arith.addf %107, %112 : vector<256x16xf32>
    %c1_137 = arith.constant 1 : index
    %c1_138 = arith.constant 1 : index
    %c0_139 = arith.constant 0 : index
    %114 = vector.load %arg10[%c1_137, %c1_138, %c0_139] : memref<18x24x16xf32, #tpu.memory_space<vmem>>, vector<16x16x16xf32>
    %115 = vector.shape_cast %114 : vector<16x16x16xf32> to vector<256x16xf32>
    %c1_140 = arith.constant 1 : index
    %c16_141 = arith.constant 16 : index
    %c0_142 = arith.constant 0 : index
    %116 = vector.load %arg6[%c1_140, %c16_141, %c0_142] : memref<3x48x16xf32, #tpu.memory_space<vmem>>, vector<1x16x16xf32>
    %117 = vector.shape_cast %116 : vector<1x16x16xf32> to vector<16x16xf32>
    %cst_143 = arith.constant dense<0.000000e+00> : vector<256x16xf32>
    %118 = tpu.matmul %115, %117, %cst_143 {dimension_numbers = #tpu.dot_dimension_numbers<[1], [0], [0], [1], [0, 0, 1, 1], [], []>} : vector<256x16xf32>, vector<16x16xf32>, vector<256x16xf32> -> vector<256x16xf32>
    %119 = arith.addf %113, %118 : vector<256x16xf32>
    %c1_144 = arith.constant 1 : index
    %c2_145 = arith.constant 2 : index
    %c0_146 = arith.constant 0 : index
    %120 = vector.load %arg10[%c1_144, %c2_145, %c0_146] : memref<18x24x16xf32, #tpu.memory_space<vmem>>, vector<16x16x16xf32>
    %121 = vector.shape_cast %120 : vector<16x16x16xf32> to vector<256x16xf32>
    %c1_147 = arith.constant 1 : index
    %c32_148 = arith.constant 32 : index
    %c0_149 = arith.constant 0 : index
    %122 = vector.load %arg6[%c1_147, %c32_148, %c0_149] : memref<3x48x16xf32, #tpu.memory_space<vmem>>, vector<1x16x16xf32>
    %123 = vector.shape_cast %122 : vector<1x16x16xf32> to vector<16x16xf32>
    %cst_150 = arith.constant dense<0.000000e+00> : vector<256x16xf32>
    %124 = tpu.matmul %121, %123, %cst_150 {dimension_numbers = #tpu.dot_dimension_numbers<[1], [0], [0], [1], [0, 0, 1, 1], [], []>} : vector<256x16xf32>, vector<16x16xf32>, vector<256x16xf32> -> vector<256x16xf32>
    %125 = arith.addf %119, %124 : vector<256x16xf32>
    %c2_151 = arith.constant 2 : index
    %c0_152 = arith.constant 0 : index
    %c0_153 = arith.constant 0 : index
    %126 = vector.load %arg10[%c2_151, %c0_152, %c0_153] : memref<18x24x16xf32, #tpu.memory_space<vmem>>, vector<16x16x16xf32>
    %127 = vector.shape_cast %126 : vector<16x16x16xf32> to vector<256x16xf32>
    %c2_154 = arith.constant 2 : index
    %c0_155 = arith.constant 0 : index
    %c0_156 = arith.constant 0 : index
    %128 = vector.load %arg6[%c2_154, %c0_155, %c0_156] : memref<3x48x16xf32, #tpu.memory_space<vmem>>, vector<1x16x16xf32>
    %129 = vector.shape_cast %128 : vector<1x16x16xf32> to vector<16x16xf32>
    %cst_157 = arith.constant dense<0.000000e+00> : vector<256x16xf32>
    %130 = tpu.matmul %127, %129, %cst_157 {dimension_numbers = #tpu.dot_dimension_numbers<[1], [0], [0], [1], [0, 0, 1, 1], [], []>} : vector<256x16xf32>, vector<16x16xf32>, vector<256x16xf32> -> vector<256x16xf32>
    %131 = arith.addf %125, %130 : vector<256x16xf32>
    %c2_158 = arith.constant 2 : index
    %c1_159 = arith.constant 1 : index
    %c0_160 = arith.constant 0 : index
    %132 = vector.load %arg10[%c2_158, %c1_159, %c0_160] : memref<18x24x16xf32, #tpu.memory_space<vmem>>, vector<16x16x16xf32>
    %133 = vector.shape_cast %132 : vector<16x16x16xf32> to vector<256x16xf32>
    %c2_161 = arith.constant 2 : index
    %c16_162 = arith.constant 16 : index
    %c0_163 = arith.constant 0 : index
    %134 = vector.load %arg6[%c2_161, %c16_162, %c0_163] : memref<3x48x16xf32, #tpu.memory_space<vmem>>, vector<1x16x16xf32>
    %135 = vector.shape_cast %134 : vector<1x16x16xf32> to vector<16x16xf32>
    %cst_164 = arith.constant dense<0.000000e+00> : vector<256x16xf32>
    %136 = tpu.matmul %133, %135, %cst_164 {dimension_numbers = #tpu.dot_dimension_numbers<[1], [0], [0], [1], [0, 0, 1, 1], [], []>} : vector<256x16xf32>, vector<16x16xf32>, vector<256x16xf32> -> vector<256x16xf32>
    %137 = arith.addf %131, %136 : vector<256x16xf32>
    %c2_165 = arith.constant 2 : index
    %c2_166 = arith.constant 2 : index
    %c0_167 = arith.constant 0 : index
    %138 = vector.load %arg10[%c2_165, %c2_166, %c0_167] : memref<18x24x16xf32, #tpu.memory_space<vmem>>, vector<16x16x16xf32>
    %139 = vector.shape_cast %138 : vector<16x16x16xf32> to vector<256x16xf32>
    %c2_168 = arith.constant 2 : index
    %c32_169 = arith.constant 32 : index
    %c0_170 = arith.constant 0 : index
    %140 = vector.load %arg6[%c2_168, %c32_169, %c0_170] : memref<3x48x16xf32, #tpu.memory_space<vmem>>, vector<1x16x16xf32>
    %141 = vector.shape_cast %140 : vector<1x16x16xf32> to vector<16x16xf32>
    %cst_171 = arith.constant dense<0.000000e+00> : vector<256x16xf32>
    %142 = tpu.matmul %139, %141, %cst_171 {dimension_numbers = #tpu.dot_dimension_numbers<[1], [0], [0], [1], [0, 0, 1, 1], [], []>} : vector<256x16xf32>, vector<16x16xf32>, vector<256x16xf32> -> vector<256x16xf32>
    %143 = arith.addf %137, %142 : vector<256x16xf32>
    %cst_172 = arith.constant 0.000000e+00 : f32
    %144 = vector.broadcast %cst_172 : f32 to vector<256x16xf32>
    %145 = arith.maximumf %143, %144 : vector<256x16xf32>
    %146 = vector.shape_cast %145 : vector<256x16xf32> to vector<16x16x16xf32>
    %c0_173 = arith.constant 0 : index
    %c0_174 = arith.constant 0 : index
    %c0_175 = arith.constant 0 : index
    %c0_176 = arith.constant 0 : index
    %147 = vector.load %arg8[%c0_173, %c0_174, %c0_175, %c0_176] : memref<1x16x16x16xf32, #tpu.memory_space<vmem>>, vector<1x16x16x16xf32>
    %148 = vector.shape_cast %147 : vector<1x16x16x16xf32> to vector<16x16x16xf32>
    %149 = vector.shape_cast %146 : vector<16x16x16xf32> to vector<1x16x16x16xf32>
    tpu.vector_store %arg8[%c0_173, %c0_174, %c0_175, %c0_176], %149 {strides = array<i32>} : memref<1x16x16x16xf32, #tpu.memory_space<vmem>>, vector<1x16x16x16xf32>,
    return
  }
  func.func @transform_0(%arg0: i32) -> (i32, i32, i32, i32) {
    %c0_i32 = arith.constant 0 : i32
    %c0_i32_0 = arith.constant 0 : i32
    %c0_i32_1 = arith.constant 0 : i32
    %c0_i32_2 = arith.constant 0 : i32
    return %arg0, %c0_i32, %c0_i32_0, %c0_i32_1 : i32, i32, i32, i32
  }
  func.func @transform_1(%arg0: i32) -> (i32, i32) {
    %c0_i32 = arith.constant 0 : i32
    %c0_i32_0 = arith.constant 0 : i32
    %c0_i32_1 = arith.constant 0 : i32
    return %c0_i32, %c0_i32_0 : i32, i32
  }
  func.func @transform_2(%arg0: i32) -> (i32, i32) {
    %c0_i32 = arith.constant 0 : i32
    %c0_i32_0 = arith.constant 0 : i32
    %c0_i32_1 = arith.constant 0 : i32
    return %c0_i32, %c0_i32_0 : i32, i32
  }
  func.func @transform_3(%arg0: i32) -> (i32, i32, i32) {
    %c0_i32 = arith.constant 0 : i32
    %c0_i32_0 = arith.constant 0 : i32
    %c0_i32_1 = arith.constant 0 : i32
    %c0_i32_2 = arith.constant 0 : i32
    return %c0_i32, %c0_i32_0, %c0_i32_1 : i32, i32, i32
  }
  func.func @transform_4(%arg0: i32) -> (i32, i32) {
    %c0_i32 = arith.constant 0 : i32
    %c0_i32_0 = arith.constant 0 : i32
    %c0_i32_1 = arith.constant 0 : i32
    return %c0_i32, %c0_i32_0 : i32, i32
  }
  func.func @transform_5(%arg0: i32) -> (i32, i32, i32) {
    %c0_i32 = arith.constant 0 : i32
    %c0_i32_0 = arith.constant 0 : i32
    %c0_i32_1 = arith.constant 0 : i32
    %c0_i32_2 = arith.constant 0 : i32
    return %c0_i32, %c0_i32_0, %c0_i32_1 : i32, i32, i32
  }
  func.func @transform_6(%arg0: i32) -> (i32, i32) {
    %c0_i32 = arith.constant 0 : i32
    %c0_i32_0 = arith.constant 0 : i32
    %c0_i32_1 = arith.constant 0 : i32
    return %c0_i32, %c0_i32_0 : i32, i32
  }
  func.func @transform_7(%arg0: i32) -> (i32, i32, i32, i32) {
    %c0_i32 = arith.constant 0 : i32
    %c0_i32_0 = arith.constant 0 : i32
    %c0_i32_1 = arith.constant 0 : i32
    %c0_i32_2 = arith.constant 0 : i32
    return %arg0, %c0_i32, %c0_i32_0, %c0_i32_1 : i32, i32, i32, i32
  }
}

</mosaic_0001>

<bundles_post_ra>
// kernel: tpu_custom_call.1
= control target key start
LH: loop header
LB: loop body
LE: loop exit
PB: predicated region body
PF: predicated region fallthrough
CT: control target
= control target key end

     0   :  { %12 = vsyncpa [#allocation5], 0  ;;  %s13651_s0 = inlined_call_operand.vmem [shape: f32[2,16,16,8], index: 0, kind: input, shape index: {}]   ;;  %s13652_s1 = inlined_call_operand.vmem [shape: f32[8,16], index: 1, kind: input, shape index: {}]   ;;  %s13653_s2 = inlined_call_operand.vmem [shape: f32[1,16], index: 2, kind: input, shape index: {}]   ;;  %s13654_s3 = inlined_call_operand.vmem [shape: f32[3,48,16], index: 3, kind: input, shape index: {}]   ;;  %s13655_s4 = inlined_call_operand.vmem [shape: f32[1,16], index: 4, kind: input, shape index: {}]   ;;  %s13656_s5 = inlined_call_operand.vmem [shape: f32[3,48,16], index: 5, kind: input, shape index: {}]   ;;  %s13657_s6 = inlined_call_operand.vmem [shape: f32[1,16], index: 6, kind: input, shape index: {}]   ;;  %s13658_s7 = inlined_call_operand.hbm [shape: f32[2,16,16,16], index: 7, kind: output, shape index: {}]  }
   0x1   :  { %14 = vsyncpa [#allocation5 + $0x1], 0  ;;  %s10351_s24 = smov 0   ;;  %s10353_s25 = smov 0  }
   0x2   :  { %s10355_s26 = smov 0   ;;  %s10357_s27 = smov 0  }
   0x3 LB: > { %s10372_s28 = sadd.s32 4294967295, %s10305_s27   ;;  %s7920_s29 = sadd.s32 4294967294, %s10305_s27   ;;  %s10305_s27 = sphi %s10357_s27, %s14084_s27   ;;  %s10301_s26 = sphi %s10355_s26, %s14083_s26   ;;  %s10297_s25 = sphi %s10353_s25, %s14082_s25   ;;  %s10293_s24 = sphi %s10351_s24, %s14081_s24  }
   0x4   : > { %s10376_s30 = sadd.s32 1, %s10305_s27   ;;  %s179_s8 = sadd.s32 1, %s10301_s26 }
   0x5   : > { %s176_s9 = ssub.s32 %s10305_s27, %s10376_s30  ;;  %p189_p0 = scmp.ne.s32.totalorder %s10301_s26, %s10297_s25 }
   0x6   : > { %p177_p1 = scmp.eq.s32.totalorder %s176_s9, 0  ;;  %p190_p2 = scmp.eq.s32.totalorder %s10372_s28, 1 }
   0x7   : > { %p195_p3 = scmp.ne.s32.totalorder %s10297_s25, %s10293_s24  ;;  %p196_p4 = scmp.eq.s32.totalorder %s7920_s29, 1 }
   0x8   : > { %s10387_s10 = scalar_select %p177_p1, %s10301_s26, %s179_s8  }
   0x9   : > { %p10389_p5 = por %p190_p2, %p189_p0  ;;  %p10393_p6 = por %p196_p4, %p195_p3 }
   0xa   : > { %p7923_p7 = scmp.ge.s32.totalorder %s10305_s27, 1  ;;  %p240_p8 = scmp.lt.s32.totalorder %s10305_s27, 3 }
   0xc   : > { %p241_p9 = pnand %p7923_p7, %p240_p8 }
   0xe   : > { %244 = sbr.rel (%p241_p9) target bundleno = 1225 (0x4c9), region = 48 }
  0x13   : > { %v398_v0 = vld [vmem:[%s13652_s1] sm:$0xff]  ;;  %p272_p10 = scmp.lt.s32.totalorder %s10372_s28, 1  ;;  %v827_v1 = vld [vmem:[%s13654_s3 + $0x8] sm:$0xff]  ;;  %vm406_vm0 = vcmask 64512   ;;  %vm277_vm1 = vcmask 130048   ;;  %v10307_v35 = vmov 0.0  }
  0x14   : > { %9214 = vmatprep.subr.mxu0 %v398_v0  ;;  %10200 = vmatprep.subr.mxu1 %v398_v0  ;;  %v826_v10 = vld [vmem:[%s13654_s3] sm:$0xff]  ;;  %278 = vst.msk [vmem:[#allocation2] sm:$0xff] %vm277_vm1, %v10307_v35  ;;  %vm285_vm2 = vcmask 122880   ;;  %279 = vst.msk [vmem:[#allocation2 + $0x8] sm:$0xff] %vm277_vm1, %v10307_v35  ;;  %vm304_vm3 = vcmask 129024   ;;  %v1188_v36 = vld [vmem:[%s13654_s3 + $0x18] sm:$0xff] }
  0x15   : > { %9215 = vmatpush3.msra.mxu0 %v398_v0  ;;  %s273_s17 = scalar_select %p272_p10, %s10372_s28, 1  ;;  %10201 = vmatpush3.msra.mxu1 %v398_v0  ;;  %280 = vst.msk [vmem:[#allocation2 + $0x10] sm:$0xff] %vm277_vm1, %v10307_v35  ;;  %282 = vst.msk [vmem:[#allocation2 + $0x198] sm:$0xff] %vm277_vm1, %v10307_v35  ;;  %v1187_v39 = vld [vmem:[%s13654_s3 + $0x10] sm:$0xff]  ;;  %v1575_v42 = vld [vmem:[%s13654_s3 + $0x28] sm:$0xff] }
  0x16   : > { %9264 = vmatprep.subr.mxu1 %v827_v1  ;;  %283 = vst.msk [vmem:[#allocation2 + $0x1a0] sm:$0xff] %vm277_vm1, %v10307_v35  ;;  %284 = vst.msk [vmem:[#allocation2 + $0x1a8] sm:$0xff] %vm277_vm1, %v10307_v35  ;;  %9316 = vmatprep.subr.mxu0 %v1188_v36  ;;  %v1574_v43 = vld [vmem:[%s13654_s3 + $0x20] sm:$0xff]  ;;  %v8058_v44 = vld [vmem:[%s13654_s3 + $0x38] sm:$0xff]  ;;  %s269_s16 = sand.u32 1, %s10297_s25   ;;  %s8568_s19 = sshll.u32 %s10372_s28, 12 }
  0x17   : > { %s8567_s18 = sshll.u32 %s273_s17, 8  ;;  %323 = vst.msk [vmem:[#allocation3] sm:$0xff] %vm277_vm1, %v10307_v35  ;;  %324 = vst.msk [vmem:[#allocation3 + $0x8] sm:$0xff] %vm277_vm1, %v10307_v35  ;;  %v8057_v45 = vld [vmem:[%s13654_s3 + $0x30] sm:$0xff]  ;;  %v10672_v46 = vld [vmem:[%s13654_s3 + $0x48] sm:$0xff]  ;;  %s7924_s17 = sshll.u32 %s269_s16, 8 }
  0x18   : > { %s10410_s21 = scalar_lea.vmem %s13651_s0, %s8567_s18  ;;  %325 = vst.msk [vmem:[#allocation3 + $0x10] sm:$0xff] %vm277_vm1, %v10307_v35  ;;  %327 = vst.msk [vmem:[#allocation3 + $0x198] sm:$0xff] %vm277_vm1, %v10307_v35  ;;  %v10678_v47 = vld [vmem:[%s13653_s2] ss:$0 sm:$0xff]  ;;  %s13429_s18 = scalar_lea.vmem [#allocation4], %s7924_s17 }
  0x19   : > { %v366_v2 = vld [vmem:[%s10410_s21] sm:$0xff]  ;;  %v367_v3 = vld [vmem:[%s10410_s21 + $0x8] sm:$0xff]  ;;  %v368_v4 = vld [vmem:[%s10410_s21 + $0x10] sm:$0xff]  ;;  %328 = vst.msk [vmem:[#allocation3 + $0x1a0] sm:$0xff] %vm277_vm1, %v10307_v35  ;;  %s7858_s20 = sshll.u32 %s13429_s18, 4  ;;  %s13601_s23 = scalar_lea.hbm %s13658_s7, %s8568_s19  ;;  %s13603_s20 = int_to_ptr.vmem [resolvable:$true] %s7858_s20 }
  0x1a   : > { %9216 = vmatprep.mubr.msk.f32.mxu0 %vm406_vm0, %v366_v2  ;;  %v369_v5 = vld [vmem:[%s10410_s21 + $0x18] sm:$0xff]  ;;  %v370_v6 = vld [vmem:[%s10410_s21 + $0x20] sm:$0xff]  ;;  %v383_v8 = vld [vmem:[%s10410_s21 + $0x88] sm:$0xff]  ;;  %329 = vst.msk [vmem:[#allocation3 + $0x1a8] sm:$0xff] %vm277_vm1, %v10307_v35  ;;  %s13611_s28 = scalar_lea.sflag [#allocation5], %s269_s16  ;;  %s10245_s29 = scalar_lea.vmem %s13603_s20, 4096 }
  0x1b   : > { %9217 = vmatmul.mubr.msk.f32.vlgmr.msra.gmra.mxu0 %vm406_vm0, %v367_v3  ;;  %v382_v7 = vld [vmem:[%s10410_s21 + $0x80] sm:$0xff]  ;;  %v384_v9 = vld [vmem:[%s10410_s21 + $0x90] sm:$0xff]  ;;  %v371_v11 = vld [vmem:[%s10410_s21 + $0x28] sm:$0xff]  ;;  %286 = vst.msk [vmem:[#allocation2] sm:$0x1] %vm285_vm2, %v10307_v35  ;;  %p10246_p11 = scmp.ne.s32.totalorder %s13603_s20, %s10245_s29  ;;  %s10308_s8 = smov [#allocation4]  }
  0x1c   : > { %9219 = vmatprep.mubr.msk.f32.mxu0 %vm406_vm0, %v368_v4  ;;  %9240 = vmatprep.mubr.msk.f32.mxu1 %vm406_vm0, %v382_v7  ;;  %v372_v12 = vld [vmem:[%s10410_s21 + $0x30] sm:$0xff]  ;;  %v385_v13 = vld [vmem:[%s10410_s21 + $0x98] sm:$0xff]  ;;  %v386_v14 = vld [vmem:[%s10410_s21 + $0xa0] sm:$0xff]  ;;  %287 = vst.msk [vmem:[#allocation2 + $0x18] sm:$0x1] %vm285_vm2, %v10307_v35  ;;  %s10249_s9 = sshll.u32 %s10308_s8, 4  ;;  %s10250_s9 = int_to_ptr.vmem [resolvable:$false] %s10249_s9 }
  0x1d   : > { %9241 = vmatmul.mubr.msk.f32.vlgmr.msra.gmra.mxu1 %vm406_vm0, %v383_v8  ;;  %v373_v15 = vld [vmem:[%s10410_s21 + $0x38] sm:$0xff]  ;;  %v374_v16 = vld [vmem:[%s10410_s21 + $0x40] sm:$0xff]  ;;  %v387_v17 = vld [vmem:[%s10410_s21 + $0xa8] sm:$0xff]  ;;  %288 = vst.msk [vmem:[#allocation2 + $0x30] sm:$0x1] %vm285_vm2, %v10307_v35  ;;  %9317 = vmatpush3.msra.mxu0 %v1188_v36  ;;  %p10247_p12 = pnand %p10246_p11, %p10389_p5  ;;  %s10251_s13 = scalar_lea.vmem %s10250_s9, 8192 }
  0x1e   : > { %9243 = vmatprep.mubr.msk.f32.mxu1 %vm406_vm0, %v384_v9  ;;  %9265 = vmatpush3.msra.mxu1 %v827_v1  ;;  %v388_v18 = vld [vmem:[%s10410_s21 + $0xb0] sm:$0xff]  ;;  %v375_v19 = vld [vmem:[%s10410_s21 + $0x48] sm:$0xff]  ;;  %v389_v21 = vld [vmem:[%s10410_s21 + $0xb8] sm:$0xff]  ;;  %289 = vst.msk [vmem:[#allocation2 + $0x48] sm:$0x1] %vm285_vm2, %v10307_v35  ;;  %p10252_p0 = scmp.lt.s32.totalorder %s13603_s20, %s10250_s9  ;;  %p10253_p1 = scmp.lt.s32.totalorder %s10251_s13, %s10245_s29 }
  0x1f   : > { %9220 = vmatmul.mubr.msk.f32.gmra.mxu0 %vm406_vm0, %v369_v5  ;;  %9266 = vmatprep.subr.mxu1 %v826_v10  ;;  %v376_v20 = vld [vmem:[%s10410_s21 + $0x50] sm:$0xff]  ;;  %v390_v22 = vld [vmem:[%s10410_s21 + $0xc0] sm:$0xff]  ;;  %v377_v23 = vld [vmem:[%s10410_s21 + $0x58] sm:$0xff]  ;;  %290 = vst.msk [vmem:[#allocation2 + $0x60] sm:$0x1] %vm285_vm2, %v10307_v35  ;;  %p10248_p13 = pneg %p10247_p12 }
  0x20   : > { %9222 = vmatprep.mubr.msk.f32.mxu0 %vm406_vm0, %v370_v6  ;;  %9267 = vmatpush3.msra.mxu1 %v826_v10  ;;  %v378_v24 = vld [vmem:[%s10410_s21 + $0x60] sm:$0xff]  ;;  %v391_v25 = vld [vmem:[%s10410_s21 + $0xc8] sm:$0xff]  ;;  %v392_v26 = vld [vmem:[%s10410_s21 + $0xd0] sm:$0xff]  ;;  %291 = vst.msk [vmem:[#allocation2 + $0x78] sm:$0x1] %vm285_vm2, %v10307_v35  ;;  %p10254_p2 = por %p10253_p1, %p10252_p0 }
  0x21   : > { %9244 = vmatmul.mubr.msk.f32.gmra.mxu1 %vm406_vm0, %v385_v13  ;;  %v379_v27 = vld [vmem:[%s10410_s21 + $0x68] sm:$0xff]  ;;  %v380_v28 = vld [vmem:[%s10410_s21 + $0x70] sm:$0xff]  ;;  %v393_v29 = vld [vmem:[%s10410_s21 + $0xd8] sm:$0xff]  ;;  %292 = vst.msk [vmem:[#allocation2 + $0x90] sm:$0x1] %vm285_vm2, %v10307_v35  ;;  %9318 = vmatprep.subr.mxu0 %v1187_v39 }
  0x22   : > { %9246 = vmatprep.mubr.msk.f32.mxu1 %vm406_vm0, %v386_v14  ;;  %v394_v30 = vld [vmem:[%s10410_s21 + $0xe0] sm:$0xff]  ;;  %v381_v31 = vld [vmem:[%s10410_s21 + $0x78] sm:$0xff]  ;;  %v395_v32 = vld [vmem:[%s10410_s21 + $0xe8] sm:$0xff]  ;;  %293 = vst.msk [vmem:[#allocation2 + $0xa8] sm:$0x1] %vm285_vm2, %v10307_v35  ;;  %9319 = vmatpush3.msra.mxu0 %v1187_v39  ;;  %p10255_p3 = pnand %p10254_p2, %p10248_p13 }
  0x23   : > { %9223 = vmatmul.mubr.msk.f32.gmra.mxu0 %vm406_vm0, %v371_v11  ;;  %v396_v33 = vld [vmem:[%s10410_s21 + $0xf0] sm:$0xff]  ;;  %v397_v34 = vld [vmem:[%s10410_s21 + $0xf8] sm:$0xff]  ;;  %294 = vst.msk [vmem:[#allocation2 + $0xc0] sm:$0x1] %vm285_vm2, %v10307_v35  ;;  %295 = vst.msk [vmem:[#allocation2 + $0xd8] sm:$0x1] %vm285_vm2, %v10307_v35  ;;  %9368 = vmatprep.subr.mxu1 %v1575_v42 }
  0x24   : > { %9225 = vmatprep.mubr.msk.f32.mxu0 %vm406_vm0, %v372_v12  ;;  %296 = vst.msk [vmem:[#allocation2 + $0xf0] sm:$0x1] %vm285_vm2, %v10307_v35  ;;  %297 = vst.msk [vmem:[#allocation2 + $0x108] sm:$0x1] %vm285_vm2, %v10307_v35  ;;  %v794_v37 = vld [vmem:[#allocation2] sm:$0xff]  ;;  %v795_v38 = vld [vmem:[#allocation2 + $0x8] sm:$0xff]  ;;  %9420 = vmatprep.subr.mxu0 %v8058_v44 }
  0x25   : > { %9247 = vmatmul.mubr.msk.f32.gmra.mxu1 %vm406_vm0, %v387_v17  ;;  %298 = vst.msk [vmem:[#allocation2 + $0x120] sm:$0x1] %vm285_vm2, %v10307_v35  ;;  %299 = vst.msk [vmem:[#allocation2 + $0x138] sm:$0x1] %vm285_vm2, %v10307_v35  ;;  %v1155_v40 = vld [vmem:[#allocation2 + $0x1] sm:$0xff]  ;;  %v1156_v41 = vld [vmem:[#allocation2 + $0x9] sm:$0xff] }
  0x26   : > { %9249 = vmatprep.mubr.msk.f32.mxu1 %vm406_vm0, %v388_v18  ;;  %300 = vst.msk [vmem:[#allocation2 + $0x150] sm:$0x1] %vm285_vm2, %v10307_v35  ;;  %301 = vst.msk [vmem:[#allocation2 + $0x168] sm:$0x1] %vm285_vm2, %v10307_v35  ;;  %v10691_v1 = vld [vmem:[%s13654_s3 + $0x58] sm:$0xff] }
  0x27   : > { %9226 = vmatmul.mubr.msk.f32.gmra.mxu0 %vm406_vm0, %v373_v15  ;;  %302 = vst.msk [vmem:[#allocation2 + $0x180] sm:$0x1] %vm285_vm2, %v10307_v35  ;;  %331 = vst.msk [vmem:[#allocation3 + $0x18] sm:$0x1] %vm285_vm2, %v10307_v35 }
  0x28   : > { %9228 = vmatprep.mubr.msk.f32.mxu0 %vm406_vm0, %v374_v16  ;;  %332 = vst.msk [vmem:[#allocation3 + $0x30] sm:$0x1] %vm285_vm2, %v10307_v35  ;;  %333 = vst.msk [vmem:[#allocation3 + $0x48] sm:$0x1] %vm285_vm2, %v10307_v35 }
  0x29   : > { %9250 = vmatmul.mubr.msk.f32.gmra.mxu1 %vm406_vm0, %v389_v21  ;;  %334 = vst.msk [vmem:[#allocation3 + $0x60] sm:$0x1] %vm285_vm2, %v10307_v35  ;;  %335 = vst.msk [vmem:[#allocation3 + $0x78] sm:$0x1] %vm285_vm2, %v10307_v35 }
  0x2a   : > { %9252 = vmatprep.mubr.msk.f32.mxu1 %vm406_vm0, %v390_v22  ;;  %336 = vst.msk [vmem:[#allocation3 + $0x90] sm:$0x1] %vm285_vm2, %v10307_v35  ;;  %337 = vst.msk [vmem:[#allocation3 + $0xa8] sm:$0x1] %vm285_vm2, %v10307_v35 }
  0x2b   : > { %9229 = vmatmul.mubr.msk.f32.gmra.mxu0 %vm406_vm0, %v375_v19  ;;  %338 = vst.msk [vmem:[#allocation3 + $0xc0] sm:$0x1] %vm285_vm2, %v10307_v35  ;;  %339 = vst.msk [vmem:[#allocation3 + $0xd8] sm:$0x1] %vm285_vm2, %v10307_v35 }
  0x2c   : > { %9231 = vmatprep.mubr.msk.f32.mxu0 %vm406_vm0, %v376_v20  ;;  %340 = vst.msk [vmem:[#allocation3 + $0xf0] sm:$0x1] %vm285_vm2, %v10307_v35  ;;  %341 = vst.msk [vmem:[#allocation3 + $0x108] sm:$0x1] %vm285_vm2, %v10307_v35 }
  0x2d   : > { %9253 = vmatmul.mubr.msk.f32.gmra.mxu1 %vm406_vm0, %v391_v25  ;;  %342 = vst.msk [vmem:[#allocation3 + $0x120] sm:$0x1] %vm285_vm2, %v10307_v35  ;;  %343 = vst.msk [vmem:[#allocation3 + $0x138] sm:$0x1] %vm285_vm2, %v10307_v35 }
  0x2e   : > { %9255 = vmatprep.mubr.msk.f32.mxu1 %vm406_vm0, %v392_v26  ;;  %344 = vst.msk [vmem:[#allocation3 + $0x150] sm:$0x1] %vm285_vm2, %v10307_v35  ;;  %345 = vst.msk [vmem:[#allocation3 + $0x168] sm:$0x1] %vm285_vm2, %v10307_v35 }
  0x2f   : > { %9232 = vmatmul.mubr.msk.f32.gmra.mxu0 %vm406_vm0, %v377_v23  ;;  %346 = vst.msk [vmem:[#allocation3 + $0x180] sm:$0x1] %vm285_vm2, %v10307_v35  ;;  %303 = vst.msk [vmem:[#allocation2 + $0x198] sm:$0x1] %vm285_vm2, %v10307_v35 }
  0x30   : > { %9234 = vmatprep.mubr.msk.f32.mxu0 %vm406_vm0, %v378_v24  ;;  %330 = vst.msk [vmem:[#allocation3] sm:$0x1] %vm285_vm2, %v10307_v35  ;;  %347 = vst.msk [vmem:[#allocation3 + $0x198] sm:$0x1] %vm285_vm2, %v10307_v35 }
  0x31   : > { %9256 = vmatmul.mubr.msk.f32.gmra.mxu1 %vm406_vm0, %v393_v29  ;;  %305 = vst.msk [vmem:[#allocation2 + $0x11] sm:$0x7f] %vm304_vm3, %v10307_v35  ;;  %306 = vst.msk [vmem:[#allocation2 + $0x29] sm:$0x7f] %vm304_vm3, %v10307_v35 }
  0x32   : > { %9258 = vmatprep.mubr.msk.f32.mxu1 %vm406_vm0, %v394_v30  ;;  %307 = vst.msk [vmem:[#allocation2 + $0x41] sm:$0x7f] %vm304_vm3, %v10307_v35  ;;  %308 = vst.msk [vmem:[#allocation2 + $0x59] sm:$0x7f] %vm304_vm3, %v10307_v35 }
  0x33   : > { %9235 = vmatmul.mubr.msk.f32.gmra.mxu0 %vm406_vm0, %v379_v27  ;;  %309 = vst.msk [vmem:[#allocation2 + $0x71] sm:$0x7f] %vm304_vm3, %v10307_v35  ;;  %310 = vst.msk [vmem:[#allocation2 + $0x89] sm:$0x7f] %vm304_vm3, %v10307_v35 }
  0x34   : > { %9237 = vmatprep.mubr.msk.f32.mxu0 %vm406_vm0, %v380_v28  ;;  %311 = vst.msk [vmem:[#allocation2 + $0xa1] sm:$0x7f] %vm304_vm3, %v10307_v35  ;;  %312 = vst.msk [vmem:[#allocation2 + $0xb9] sm:$0x7f] %vm304_vm3, %v10307_v35 }
  0x35   : > { %9259 = vmatmul.mubr.msk.f32.gmra.mxu1 %vm406_vm0, %v395_v32  ;;  %313 = vst.msk [vmem:[#allocation2 + $0xd1] sm:$0x7f] %vm304_vm3, %v10307_v35  ;;  %314 = vst.msk [vmem:[#allocation2 + $0xe9] sm:$0x7f] %vm304_vm3, %v10307_v35 }
  0x36   : > { %9261 = vmatprep.mubr.msk.f32.mxu1 %vm406_vm0, %v396_v33  ;;  %315 = vst.msk [vmem:[#allocation2 + $0x101] sm:$0x7f] %vm304_vm3, %v10307_v35  ;;  %316 = vst.msk [vmem:[#allocation2 + $0x119] sm:$0x7f] %vm304_vm3, %v10307_v35 }
  0x37   : > { %9238 = vmatmul.mubr.msk.f32.gmra.mxu0 %vm406_vm0, %v381_v31  ;;  %317 = vst.msk [vmem:[#allocation2 + $0x131] sm:$0x7f] %vm304_vm3, %v10307_v35  ;;  %318 = vst.msk [vmem:[#allocation2 + $0x149] sm:$0x7f] %vm304_vm3, %v10307_v35 }
  0x38   : > { %319 = vst.msk [vmem:[#allocation2 + $0x161] sm:$0x7f] %vm304_vm3, %v10307_v35  ;;  %320 = vst.msk [vmem:[#allocation2 + $0x179] sm:$0x7f] %vm304_vm3, %v10307_v35  ;;  %9320 = vmatprep.mubr.msk.f32.mxu0 %vm277_vm1, %v1155_v40 }
  0x39   : > { %9262 = vmatmul.mubr.msk.f32.gmra.mxu1 %vm406_vm0, %v397_v34  ;;  %321 = vst.msk [vmem:[#allocation2 + $0x191] sm:$0x7f] %vm304_vm3, %v10307_v35  ;;  %322 = vst.msk [vmem:[#allocation2 + $0x1a9] sm:$0x7f] %vm304_vm3, %v10307_v35 }
  0x3a   : > { %348 = vst.msk [vmem:[#allocation3 + $0x11] sm:$0x7f] %vm304_vm3, %v10307_v35  ;;  %349 = vst.msk [vmem:[#allocation3 + $0x29] sm:$0x7f] %vm304_vm3, %v10307_v35  ;;  %9268 = vmatprep.mubr.msk.f32.mxu1 %vm277_vm1, %v794_v37 }
  0x3b   : > { %350 = vst.msk [vmem:[#allocation3 + $0x41] sm:$0x7f] %vm304_vm3, %v10307_v35  ;;  %351 = vst.msk [vmem:[#allocation3 + $0x59] sm:$0x7f] %vm304_vm3, %v10307_v35  ;;  %9321 = vmatmul.mubr.msk.f32.vlgmr.msra.gmra.mxu0 %vm277_vm1, %v1156_v41 }
  0x3c   : > { %352 = vst.msk [vmem:[#allocation3 + $0x71] sm:$0x7f] %vm304_vm3, %v10307_v35  ;;  %353 = vst.msk [vmem:[#allocation3 + $0x89] sm:$0x7f] %vm304_vm3, %v10307_v35  ;;  %9421 = vmatpush3.msra.mxu0 %v8058_v44 }
  0x3d   : > { %354 = vst.msk [vmem:[#allocation3 + $0xa1] sm:$0x7f] %vm304_vm3, %v10307_v35  ;;  %355 = vst.msk [vmem:[#allocation3 + $0xb9] sm:$0x7f] %vm304_vm3, %v10307_v35  ;;  %9269 = vmatmul.mubr.msk.f32.vlgmr.msra.gmra.mxu1 %vm277_vm1, %v795_v38  ;;  %9422 = vmatprep.subr.mxu0 %v8057_v45 }
  0x3e   : > { %356 = vst.msk [vmem:[#allocation3 + $0xd1] sm:$0x7f] %vm304_vm3, %v10307_v35  ;;  %357 = vst.msk [vmem:[#allocation3 + $0xe9] sm:$0x7f] %vm304_vm3, %v10307_v35  ;;  %9369 = vmatpush3.msra.mxu1 %v1575_v42  ;;  %9423 = vmatpush3.msra.mxu0 %v8057_v45 }
  0x3f   : > { %358 = vst.msk [vmem:[#allocation3 + $0x101] sm:$0x7f] %vm304_vm3, %v10307_v35  ;;  %359 = vst.msk [vmem:[#allocation3 + $0x119] sm:$0x7f] %vm304_vm3, %v10307_v35  ;;  %9370 = vmatprep.subr.mxu1 %v1574_v43  ;;  %9524 = vmatprep.subr.mxu0 %v10691_v1 }
  0x40   : > { %360 = vst.msk [vmem:[#allocation3 + $0x131] sm:$0x7f] %vm304_vm3, %v10307_v35  ;;  %361 = vst.msk [vmem:[#allocation3 + $0x149] sm:$0x7f] %vm304_vm3, %v10307_v35  ;;  %9371 = vmatpush3.msra.mxu1 %v1574_v43 }
  0x41   : > { %362 = vst.msk [vmem:[#allocation3 + $0x161] sm:$0x7f] %vm304_vm3, %v10307_v35  ;;  %363 = vst.msk [vmem:[#allocation3 + $0x179] sm:$0x7f] %vm304_vm3, %v10307_v35  ;;  %9472 = vmatprep.subr.mxu1 %v10672_v46 }
  0x42   : > { %364 = vst.msk [vmem:[#allocation3 + $0x191] sm:$0x7f] %vm304_vm3, %v10307_v35  ;;  %365 = vst.msk [vmem:[#allocation3 + $0x1a9] sm:$0x7f] %vm304_vm3, %v10307_v35 }
  0xdb   : > { %v9218_v48 = vpop.f32.mrf.mxu0 }
  0xdc   : > { %v575_v49 = vadd.f32 %v9218_v48, %v10678_v47 }
  0xdd   : > { %v569_v50 = vpop.f32.mrf.mxu0  ;;  %v9242_v56 = vpop.f32.mrf.mxu1 }
  0xde   : > { %v729_v51 = vmax.f32 %v575_v49, 0.0  ;;  %v570_v52 = vadd.f32 %v10678_v47, %v569_v50  ;;  %v655_v58 = vadd.f32 %v9242_v56, %v10678_v47 }
  0xdf   : > { %v9221_v53 = vpop.f32.mrf.mxu0  ;;  %v649_v61 = vpop.f32.mrf.mxu1 }
  0xe0   : > { %762 = vst.msk [vmem:[#allocation2 + $0x21] sm:$0xff] %vm277_vm1, %v729_v51  ;;  %v728_v54 = vmax.f32 %v570_v52, 0.0  ;;  %v585_v55 = vadd.f32 %v9221_v53, %v10678_v47  ;;  %v745_v63 = vmax.f32 %v655_v58, 0.0  ;;  %v650_v0 = vadd.f32 %v10678_v47, %v649_v61 }
  0xe1   : > { %v579_v57 = vpop.f32.mrf.mxu0  ;;  %v9245_v4 = vpop.f32.mrf.mxu1 }
  0xe2   : > { %761 = vst.msk [vmem:[#allocation2 + $0x19] sm:$0xff] %vm277_vm1, %v728_v54  ;;  %v731_v59 = vmax.f32 %v585_v55, 0.0  ;;  %v580_v60 = vadd.f32 %v10678_v47, %v579_v57  ;;  %778 = vst.msk [vmem:[#allocation2 + $0xe1] sm:$0xff] %vm277_vm1, %v745_v63  ;;  %v744_v6 = vmax.f32 %v650_v0, 0.0  ;;  %v665_v7 = vadd.f32 %v9245_v4, %v10678_v47 }
  0xe3   : > { %v9224_v62 = vpop.f32.mrf.mxu0  ;;  %v659_v10 = vpop.f32.mrf.mxu1 }
  0xe4   : > { %764 = vst.msk [vmem:[#allocation2 + $0x39] sm:$0xff] %vm277_vm1, %v731_v59  ;;  %v730_v2 = vmax.f32 %v580_v60, 0.0  ;;  %v595_v3 = vadd.f32 %v9224_v62, %v10678_v47  ;;  %777 = vst.msk [vmem:[#allocation2 + $0xd9] sm:$0xff] %vm277_vm1, %v744_v6  ;;  %v747_v12 = vmax.f32 %v665_v7, 0.0  ;;  %v660_v13 = vadd.f32 %v10678_v47, %v659_v10 }
  0xe5   : > { %v589_v5 = vpop.f32.mrf.mxu0  ;;  %v9248_v16 = vpop.f32.mrf.mxu1 }
  0xe6   : > { %763 = vst.msk [vmem:[#allocation2 + $0x31] sm:$0xff] %vm277_vm1, %v730_v2  ;;  %v733_v8 = vmax.f32 %v595_v3, 0.0  ;;  %v590_v9 = vadd.f32 %v10678_v47, %v589_v5  ;;  %780 = vst.msk [vmem:[#allocation2 + $0xf9] sm:$0xff] %vm277_vm1, %v747_v12  ;;  %v746_v21 = vmax.f32 %v660_v13, 0.0  ;;  %v675_v22 = vadd.f32 %v9248_v16, %v10678_v47 }
  0xe7   : > { %v9227_v11 = vpop.f32.mrf.mxu0  ;;  %v10718_v25 = vld [vmem:[#allocation2 + $0x21] sm:$0xff]  ;;  %v669_v26 = vpop.f32.mrf.mxu1 }
  0xe8   : > { %766 = vst.msk [vmem:[#allocation2 + $0x51] sm:$0xff] %vm277_vm1, %v733_v8  ;;  %v732_v14 = vmax.f32 %v590_v9, 0.0  ;;  %v605_v15 = vadd.f32 %v9227_v11, %v10678_v47  ;;  %779 = vst.msk [vmem:[#allocation2 + $0xf1] sm:$0xff] %vm277_vm1, %v746_v21  ;;  %v749_v28 = vmax.f32 %v675_v22, 0.0  ;;  %v670_v29 = vadd.f32 %v10678_v47, %v669_v26 }
  0xe9   : > { %v599_v17 = vpop.f32.mrf.mxu0  ;;  %v10704_v18 = vld [vmem:[#allocation2 + $0x18] sm:$0xff]  ;;  %v10708_v20 = vld [vmem:[#allocation2 + $0x20] sm:$0xff]  ;;  %v9251_v32 = vpop.f32.mrf.mxu1 }
  0xea   : > { %v10706_v19 = vld [vmem:[#allocation2 + $0x19] sm:$0xff]  ;;  %765 = vst.msk [vmem:[#allocation2 + $0x49] sm:$0xff] %vm277_vm1, %v732_v14  ;;  %v735_v23 = vmax.f32 %v605_v15, 0.0  ;;  %v600_v24 = vadd.f32 %v10678_v47, %v599_v17  ;;  %9271 = vmatprep.mubr.msk.f32.mxu1 %vm277_vm1, %v10704_v18  ;;  %782 = vst.msk [vmem:[#allocation2 + $0x111] sm:$0xff] %vm277_vm1, %v749_v28  ;;  %v748_v37 = vmax.f32 %v670_v29, 0.0  ;;  %v685_v38 = vadd.f32 %v9251_v32, %v10678_v47 }
  0xeb   : > { %9323 = vmatprep.mubr.msk.f32.mxu0 %vm277_vm1, %v10706_v19  ;;  %v9230_v27 = vpop.f32.mrf.mxu0  ;;  %9272 = vmatmul.mubr.msk.f32.gmra.mxu1 %vm277_vm1, %v10708_v20  ;;  %v10742_v41 = vld [vmem:[#allocation2 + $0x39] sm:$0xff]  ;;  %v679_v42 = vpop.f32.mrf.mxu1 }
  0xec   : > { %9324 = vmatmul.mubr.msk.f32.gmra.mxu0 %vm277_vm1, %v10718_v25  ;;  %768 = vst.msk [vmem:[#allocation2 + $0x69] sm:$0xff] %vm277_vm1, %v735_v23  ;;  %v734_v30 = vmax.f32 %v600_v24, 0.0  ;;  %v615_v31 = vadd.f32 %v9230_v27, %v10678_v47  ;;  %781 = vst.msk [vmem:[#allocation2 + $0x109] sm:$0xff] %vm277_vm1, %v748_v37  ;;  %v751_v44 = vmax.f32 %v685_v38, 0.0  ;;  %v680_v45 = vadd.f32 %v10678_v47, %v679_v42 }
  0xed   : > { %v609_v33 = vpop.f32.mrf.mxu0  ;;  %v10728_v34 = vld [vmem:[#allocation2 + $0x30] sm:$0xff]  ;;  %v10732_v36 = vld [vmem:[#allocation2 + $0x38] sm:$0xff]  ;;  %v9254_v50 = vpop.f32.mrf.mxu1 }
  0xee   : > { %v10730_v35 = vld [vmem:[#allocation2 + $0x31] sm:$0xff]  ;;  %767 = vst.msk [vmem:[#allocation2 + $0x61] sm:$0xff] %vm277_vm1, %v734_v30  ;;  %v737_v39 = vmax.f32 %v615_v31, 0.0  ;;  %v610_v40 = vadd.f32 %v10678_v47, %v609_v33  ;;  %9274 = vmatprep.mubr.msk.f32.mxu1 %vm277_vm1, %v10728_v34  ;;  %784 = vst.msk [vmem:[#allocation2 + $0x129] sm:$0xff] %vm277_vm1, %v751_v44  ;;  %v750_v55 = vmax.f32 %v680_v45, 0.0  ;;  %v695_v56 = vadd.f32 %v9254_v50, %v10678_v47 }
  0xef   : > { %9326 = vmatprep.mubr.msk.f32.mxu0 %vm277_vm1, %v10730_v35  ;;  %v9233_v43 = vpop.f32.mrf.mxu0  ;;  %9275 = vmatmul.mubr.msk.f32.gmra.mxu1 %vm277_vm1, %v10732_v36  ;;  %v10766_v59 = vld [vmem:[#allocation2 + $0x51] sm:$0xff]  ;;  %v689_v60 = vpop.f32.mrf.mxu1 }
  0xf0   : > { %9327 = vmatmul.mubr.msk.f32.gmra.mxu0 %vm277_vm1, %v10742_v41  ;;  %770 = vst.msk [vmem:[#allocation2 + $0x81] sm:$0xff] %vm277_vm1, %v737_v39  ;;  %v736_v48 = vmax.f32 %v610_v40, 0.0  ;;  %v625_v49 = vadd.f32 %v9233_v43, %v10678_v47  ;;  %783 = vst.msk [vmem:[#allocation2 + $0x121] sm:$0xff] %vm277_vm1, %v750_v55  ;;  %v753_v62 = vmax.f32 %v695_v56, 0.0  ;;  %v690_v63 = vadd.f32 %v10678_v47, %v689_v60 }
  0xf1   : > { %v619_v51 = vpop.f32.mrf.mxu0  ;;  %v10752_v52 = vld [vmem:[#allocation2 + $0x48] sm:$0xff]  ;;  %v10756_v54 = vld [vmem:[#allocation2 + $0x50] sm:$0xff]  ;;  %v9257_v3 = vpop.f32.mrf.mxu1 }
  0xf2   : > { %v10754_v53 = vld [vmem:[#allocation2 + $0x49] sm:$0xff]  ;;  %769 = vst.msk [vmem:[#allocation2 + $0x79] sm:$0xff] %vm277_vm1, %v736_v48  ;;  %v739_v57 = vmax.f32 %v625_v49, 0.0  ;;  %v620_v58 = vadd.f32 %v10678_v47, %v619_v51  ;;  %9277 = vmatprep.mubr.msk.f32.mxu1 %vm277_vm1, %v10752_v52  ;;  %786 = vst.msk [vmem:[#allocation2 + $0x141] sm:$0xff] %vm277_vm1, %v753_v62  ;;  %v752_v8 = vmax.f32 %v690_v63, 0.0  ;;  %v705_v9 = vadd.f32 %v9257_v3, %v10678_v47  ;;  %v10864_v62 = vld [vmem:[#allocation2 + $0xd9] sm:$0xff] }
  0xf3   : > { %9329 = vmatprep.mubr.msk.f32.mxu0 %vm277_vm1, %v10754_v53  ;;  %v9236_v61 = vpop.f32.mrf.mxu0  ;;  %9278 = vmatmul.mubr.msk.f32.gmra.mxu1 %vm277_vm1, %v10756_v54  ;;  %v10790_v12 = vld [vmem:[#allocation2 + $0x69] sm:$0xff]  ;;  %v699_v13 = vpop.f32.mrf.mxu1 }
  0xf4   : > { %9330 = vmatmul.mubr.msk.f32.gmra.mxu0 %vm277_vm1, %v10766_v59  ;;  %772 = vst.msk [vmem:[#allocation2 + $0x99] sm:$0xff] %vm277_vm1, %v739_v57  ;;  %v738_v0 = vmax.f32 %v620_v58, 0.0  ;;  %v635_v2 = vadd.f32 %v9236_v61, %v10678_v47  ;;  %785 = vst.msk [vmem:[#allocation2 + $0x139] sm:$0xff] %vm277_vm1, %v752_v8  ;;  %v755_v15 = vmax.f32 %v705_v9, 0.0  ;;  %v700_v16 = vadd.f32 %v10678_v47, %v699_v13  ;;  %v10888_v8 = vld [vmem:[#allocation2 + $0xf1] sm:$0xff]  ;;  %v10890_v9 = vld [vmem:[#allocation2 + $0xe0] sm:$0xff] }
  0xf5   : > { %v629_v4 = vpop.f32.mrf.mxu0  ;;  %v10776_v5 = vld [vmem:[#allocation2 + $0x60] sm:$0xff]  ;;  %v10780_v7 = vld [vmem:[#allocation2 + $0x68] sm:$0xff]  ;;  %v9260_v22 = vpop.f32.mrf.mxu1 }
  0xf6   : > { %v10778_v6 = vld [vmem:[#allocation2 + $0x61] sm:$0xff]  ;;  %771 = vst.msk [vmem:[#allocation2 + $0x91] sm:$0xff] %vm277_vm1, %v738_v0  ;;  %v741_v10 = vmax.f32 %v635_v2, 0.0  ;;  %v630_v11 = vadd.f32 %v10678_v47, %v629_v4  ;;  %9280 = vmatprep.mubr.msk.f32.mxu1 %vm277_vm1, %v10776_v5  ;;  %788 = vst.msk [vmem:[#allocation2 + $0x159] sm:$0xff] %vm277_vm1, %v755_v15  ;;  %v754_v28 = vmax.f32 %v700_v16, 0.0  ;;  %v715_v29 = vadd.f32 %v9260_v22, %v10678_v47  ;;  %v10886_v4 = vld [vmem:[#allocation2 + $0xf0] sm:$0xff] }
  0xf7   : > { %9332 = vmatprep.mubr.msk.f32.mxu0 %vm277_vm1, %v10778_v6  ;;  %v9239_v14 = vpop.f32.mrf.mxu0  ;;  %9281 = vmatmul.mubr.msk.f32.gmra.mxu1 %vm277_vm1, %v10780_v7  ;;  %v10814_v32 = vld [vmem:[#allocation2 + $0x81] sm:$0xff]  ;;  %v709_v33 = vpop.f32.mrf.mxu1  ;;  %v10904_v13 = vld [vmem:[#allocation2 + $0x109] sm:$0xff]  ;;  %v10908_v15 = vld [vmem:[#allocation2 + $0xf9] sm:$0xff] }
  0xf8   : > { %9333 = vmatmul.mubr.msk.f32.gmra.mxu0 %vm277_vm1, %v10790_v12  ;;  %774 = vst.msk [vmem:[#allocation2 + $0xb1] sm:$0xff] %vm277_vm1, %v741_v10  ;;  %v740_v17 = vmax.f32 %v630_v11, 0.0  ;;  %v645_v21 = vadd.f32 %v9239_v14, %v10678_v47  ;;  %787 = vst.msk [vmem:[#allocation2 + $0x151] sm:$0xff] %vm277_vm1, %v754_v28  ;;  %v757_v37 = vmax.f32 %v715_v29, 0.0  ;;  %v710_v38 = vadd.f32 %v10678_v47, %v709_v33  ;;  %v10892_v10 = vld [vmem:[#allocation2 + $0xe1] sm:$0xff]  ;;  %v10906_v14 = vld [vmem:[#allocation2 + $0xf8] sm:$0xff] }
  0xf9   : > { %v639_v23 = vpop.f32.mrf.mxu0  ;;  %v10800_v24 = vld [vmem:[#allocation2 + $0x78] sm:$0xff]  ;;  %v10804_v27 = vld [vmem:[#allocation2 + $0x80] sm:$0xff]  ;;  %v9263_v40 = vpop.f32.mrf.mxu1  ;;  %v10902_v11 = vld [vmem:[#allocation2 + $0x108] sm:$0xff] }
  0xfa   : > { %v10802_v26 = vld [vmem:[#allocation2 + $0x79] sm:$0xff]  ;;  %773 = vst.msk [vmem:[#allocation2 + $0xa9] sm:$0xff] %vm277_vm1, %v740_v17  ;;  %v743_v30 = vmax.f32 %v645_v21, 0.0  ;;  %v640_v31 = vadd.f32 %v10678_v47, %v639_v23  ;;  %9283 = vmatprep.mubr.msk.f32.mxu1 %vm277_vm1, %v10800_v24  ;;  %790 = vst.msk [vmem:[#allocation2 + $0x171] sm:$0xff] %vm277_vm1, %v757_v37  ;;  %v756_v45 = vmax.f32 %v710_v38, 0.0  ;;  %v725_v48 = vadd.f32 %v9263_v40, %v10678_v47  ;;  %v10920_v17 = vld [vmem:[#allocation2 + $0x121] sm:$0xff] }
  0xfb   : > { %9335 = vmatprep.mubr.msk.f32.mxu0 %vm277_vm1, %v10802_v26  ;;  %9284 = vmatmul.mubr.msk.f32.gmra.mxu1 %vm277_vm1, %v10804_v27  ;;  %v10836_v49 = vld [vmem:[#allocation2 + $0x99] sm:$0xff]  ;;  %v719_v50 = vpop.f32.mrf.mxu1  ;;  %v10922_v21 = vld [vmem:[#allocation2 + $0x110] sm:$0xff]  ;;  %v10938_v29 = vld [vmem:[#allocation2 + $0x128] sm:$0xff] }
  0xfc   : > { %9336 = vmatmul.mubr.msk.f32.gmra.mxu0 %vm277_vm1, %v10814_v32  ;;  %776 = vst.msk [vmem:[#allocation2 + $0xc9] sm:$0xff] %vm277_vm1, %v743_v30  ;;  %v742_v39 = vmax.f32 %v640_v31, 0.0  ;;  %789 = vst.msk [vmem:[#allocation2 + $0x169] sm:$0xff] %vm277_vm1, %v756_v45  ;;  %v759_v51 = vmax.f32 %v725_v48, 0.0  ;;  %v720_v55 = vadd.f32 %v10678_v47, %v719_v50  ;;  %v10862_v47 = vld [vmem:[#allocation2 + $0xd8] sm:$0xff]  ;;  %v10918_v16 = vld [vmem:[#allocation2 + $0x120] sm:$0xff] }
  0xfd   : > { %v10823_v42 = vld [vmem:[#allocation2 + $0x90] sm:$0xff]  ;;  %v10827_v44 = vld [vmem:[#allocation2 + $0x98] sm:$0xff]  ;;  %v10954_v37 = vld [vmem:[#allocation2 + $0x140] sm:$0xff] }
  0xfe   : > { %v10825_v43 = vld [vmem:[#allocation2 + $0x91] sm:$0xff]  ;;  %775 = vst.msk [vmem:[#allocation2 + $0xc1] sm:$0xff] %vm277_vm1, %v742_v39  ;;  %9286 = vmatprep.mubr.msk.f32.mxu1 %vm277_vm1, %v10823_v42  ;;  %792 = vst.msk [vmem:[#allocation2 + $0x189] sm:$0xff] %vm277_vm1, %v759_v51  ;;  %v758_v60 = vmax.f32 %v720_v55, 0.0  ;;  %v10936_v28 = vld [vmem:[#allocation2 + $0x139] sm:$0xff] }
  0xff   : > { %9338 = vmatprep.mubr.msk.f32.mxu0 %vm277_vm1, %v10825_v43  ;;  %9287 = vmatmul.mubr.msk.f32.gmra.mxu1 %vm277_vm1, %v10827_v44  ;;  %v10855_v61 = vld [vmem:[#allocation2 + $0xb1] sm:$0xff]  ;;  %v10940_v30 = vld [vmem:[#allocation2 + $0x129] sm:$0xff]  ;;  %v10956_v38 = vld [vmem:[#allocation2 + $0x141] sm:$0xff] }
 0x100   : > { %9339 = vmatmul.mubr.msk.f32.gmra.mxu0 %vm277_vm1, %v10836_v49  ;;  %791 = vst.msk [vmem:[#allocation2 + $0x181] sm:$0xff] %vm277_vm1, %v758_v60  ;;  %v10924_v22 = vld [vmem:[#allocation2 + $0x111] sm:$0xff]  ;;  %13702 = vst [vmem:[#allocation8_spill] sm:$0xff] %v10956_v38  ;;  %v10972_v48 = vld [vmem:[#allocation2 + $0x159] sm:$0xff] }
 0x101   : > { %v10844_v56 = vld [vmem:[#allocation2 + $0xa8] sm:$0xff]  ;;  %v10848_v58 = vld [vmem:[#allocation2 + $0xb0] sm:$0xff]  ;;  %v10934_v23 = vld [vmem:[#allocation2 + $0x138] sm:$0xff]  ;;  %13704 = vst [vmem:[#allocation10_spill] sm:$0xff] %v10972_v48 }
 0x102   : > { %v10846_v57 = vld [vmem:[#allocation2 + $0xa9] sm:$0xff]  ;;  %9289 = vmatprep.mubr.msk.f32.mxu1 %vm277_vm1, %v10844_v56  ;;  %v10952_v33 = vld [vmem:[#allocation2 + $0x151] sm:$0xff] }
 0x103   : > { %9341 = vmatprep.mubr.msk.f32.mxu0 %vm277_vm1, %v10846_v57  ;;  %9290 = vmatmul.mubr.msk.f32.gmra.mxu1 %vm277_vm1, %v10848_v58  ;;  %v10876_v3 = vld [vmem:[#allocation2 + $0xc9] sm:$0xff]  ;;  %13701 = vst [vmem:[#allocation7_spill] sm:$0xff] %v10952_v33  ;;  %v10970_v45 = vld [vmem:[#allocation2 + $0x158] sm:$0xff] }
 0x104   : > { %9342 = vmatmul.mubr.msk.f32.gmra.mxu0 %vm277_vm1, %v10855_v61  ;;  %v10950_v31 = vld [vmem:[#allocation2 + $0x150] sm:$0xff]  ;;  %v10966_v39 = vld [vmem:[#allocation2 + $0x168] sm:$0xff] }
 0x105   : > { %v10866_v63 = vld [vmem:[#allocation2 + $0xc0] sm:$0xff]  ;;  %v10870_v2 = vld [vmem:[#allocation2 + $0xc8] sm:$0xff]  ;;  %v10982_v51 = vld [vmem:[#allocation2 + $0x170] sm:$0xff] }
 0x106   : > { %v10868_v0 = vld [vmem:[#allocation2 + $0xc1] sm:$0xff]  ;;  %9292 = vmatprep.mubr.msk.f32.mxu1 %vm277_vm1, %v10866_v63  ;;  %v10968_v40 = vld [vmem:[#allocation2 + $0x169] sm:$0xff]  ;;  %v10984_v55 = vld [vmem:[#allocation2 + $0x171] sm:$0xff] }
 0x107   : > { %9344 = vmatprep.mubr.msk.f32.mxu0 %vm277_vm1, %v10868_v0  ;;  %9293 = vmatmul.mubr.msk.f32.gmra.mxu1 %vm277_vm1, %v10870_v2  ;;  %13703 = vst [vmem:[#allocation9_spill] sm:$0xff] %v10968_v40  ;;  %v1542_v50 = vld [vmem:[#allocation2 + $0x2] sm:$0xff]  ;;  %13705 = vst [vmem:[#allocation11_spill] sm:$0xff] %v10984_v55  ;;  %v1543_v60 = vld [vmem:[#allocation2 + $0xa] sm:$0xff] }
 0x108   : > { %9345 = vmatmul.mubr.msk.f32.gmra.mxu0 %vm277_vm1, %v10876_v3  ;;  %9295 = vmatprep.mubr.msk.f32.mxu1 %vm277_vm1, %v10862_v47 }
 0x109   : > { %9347 = vmatprep.mubr.msk.f32.mxu0 %vm277_vm1, %v10864_v62 }
 0x10b   : > { %9296 = vmatmul.mubr.msk.f32.gmra.mxu1 %vm277_vm1, %v10890_v9 }
 0x10c   : > { %9348 = vmatmul.mubr.msk.f32.gmra.mxu0 %vm277_vm1, %v10892_v10  ;;  %9298 = vmatprep.mubr.msk.f32.mxu1 %vm277_vm1, %v10886_v4 }
 0x10d   : > { %9350 = vmatprep.mubr.msk.f32.mxu0 %vm277_vm1, %v10888_v8 }
 0x10f   : > { %9299 = vmatmul.mubr.msk.f32.gmra.mxu1 %vm277_vm1, %v10906_v14 }
 0x110   : > { %9351 = vmatmul.mubr.msk.f32.gmra.mxu0 %vm277_vm1, %v10908_v15  ;;  %9301 = vmatprep.mubr.msk.f32.mxu1 %vm277_vm1, %v10902_v11 }
 0x111   : > { %9353 = vmatprep.mubr.msk.f32.mxu0 %vm277_vm1, %v10904_v13 }
 0x113   : > { %9302 = vmatmul.mubr.msk.f32.gmra.mxu1 %vm277_vm1, %v10922_v21 }
 0x114   : > { %9354 = vmatmul.mubr.msk.f32.gmra.mxu0 %vm277_vm1, %v10924_v22  ;;  %9304 = vmatprep.mubr.msk.f32.mxu1 %vm277_vm1, %v10918_v16 }
 0x115   : > { %9356 = vmatprep.mubr.msk.f32.mxu0 %vm277_vm1, %v10920_v17 }
 0x117   : > { %9305 = vmatmul.mubr.msk.f32.gmra.mxu1 %vm277_vm1, %v10938_v29 }
 0x118   : > { %9357 = vmatmul.mubr.msk.f32.gmra.mxu0 %vm277_vm1, %v10940_v30  ;;  %9307 = vmatprep.mubr.msk.f32.mxu1 %vm277_vm1, %v10934_v23 }
 0x119   : > { %9359 = vmatprep.mubr.msk.f32.mxu0 %vm277_vm1, %v10936_v28 }
 0x11b   : > { %9308 = vmatmul.mubr.msk.f32.gmra.mxu1 %vm277_vm1, %v10954_v37 }
 0x11c   : > { %9360 = vmatmul.mubr.msk.f32.gmra.mxu0 %vm277_vm1, %v10956_v38  ;;  %9310 = vmatprep.mubr.msk.f32.mxu1 %vm277_vm1, %v10950_v31 }
 0x11d   : > { %9362 = vmatprep.mubr.msk.f32.mxu0 %vm277_vm1, %v10952_v33  ;;  %v8091_v33 = vld [vmem:[%s13654_s3 + $0x40] sm:$0xff] }
 0x11f   : > { %9311 = vmatmul.mubr.msk.f32.gmra.mxu1 %vm277_vm1, %v10970_v45 }
 0x120   : > { %9363 = vmatmul.mubr.msk.f32.gmra.mxu0 %vm277_vm1, %v10972_v48  ;;  %9313 = vmatprep.mubr.msk.f32.mxu1 %vm277_vm1, %v10966_v39  ;;  %v9270_v48 = vpop.f32.mrf.mxu1 }
 0x121   : > { %9365 = vmatprep.mubr.msk.f32.mxu0 %vm277_vm1, %v10968_v40  ;;  %v10996_v40 = vld [vmem:[%s13655_s4] ss:$0 sm:$0xff] }
 0x122   : > { %v1002_v38 = vadd.f32 %v9270_v48, %v10996_v40  ;;  %v11014_v48 = vld [vmem:[#allocation2 + $0x22] sm:$0xff] }
 0x123   : > { %9314 = vmatmul.mubr.msk.f32.gmra.mxu1 %vm277_vm1, %v10982_v51 }
 0x124   : > { %9366 = vmatmul.mubr.msk.f32.gmra.mxu0 %vm277_vm1, %v10984_v55  ;;  %9372 = vmatprep.mubr.msk.f32.mxu1 %vm277_vm1, %v1542_v50  ;;  %v9322_v50 = vpop.f32.mrf.mxu0 }
 0x125   : > { %9424 = vmatprep.mubr.msk.f32.mxu0 %vm277_vm1, %v10704_v18  ;;  %v11005_v18 = vld [vmem:[#allocation2 + $0x1a] sm:$0xff]  ;;  %v11010_v55 = vadd.f32 %v9322_v50, %v1002_v38  ;;  %v11060_v38 = vld [vmem:[#allocation2 + $0x62] sm:$0xff] }
 0x127   : > { %9373 = vmatmul.mubr.msk.f32.vlgmr.msra.gmra.mxu1 %vm277_vm1, %v1543_v60  ;;  %v11188_v60 = vld [vmem:[#allocation2 + $0x15a] sm:$0xff] }
 0x128   : > { %9425 = vmatmul.mubr.msk.f32.vlgmr.msra.gmra.mxu0 %vm277_vm1, %v10708_v20  ;;  %9473 = vmatpush3.msra.mxu1 %v10672_v46  ;;  %v8125_v20 = vld [vmem:[%s13654_s3 + $0x50] sm:$0xff]  ;;  %v11023_v46 = vld [vmem:[%s13654_s3 + $0x68] sm:$0xff] }
 0x129   : > { %9375 = vmatprep.mubr.msk.f32.mxu1 %vm277_vm1, %v11005_v18  ;;  %9427 = vmatprep.mubr.msk.f32.mxu0 %vm277_vm1, %v10728_v34  ;;  %v11029_v34 = vld [vmem:[#allocation2 + $0x32] sm:$0xff] }
 0x12a   : > { %9474 = vmatprep.subr.mxu1 %v8091_v33  ;;  %9525 = vmatpush3.msra.mxu0 %v10691_v1  ;;  %v11036_v1 = vld [vmem:[#allocation2 + $0x3a] sm:$0xff] }
 0x12b   : > { %9475 = vmatpush3.msra.mxu1 %v8091_v33  ;;  %9526 = vmatprep.subr.mxu0 %v8125_v20  ;;  %v11041_v33 = vld [vmem:[%s13654_s3 + $0x78] sm:$0xff] }
 0x12c   : > { %9376 = vmatmul.mubr.msk.f32.gmra.mxu1 %vm277_vm1, %v11014_v48  ;;  %9428 = vmatmul.mubr.msk.f32.gmra.mxu0 %vm277_vm1, %v10732_v36  ;;  %v11047_v36 = vld [vmem:[#allocation2 + $0x4a] sm:$0xff] }
 0x12d   : > { %9378 = vmatprep.mubr.msk.f32.mxu1 %vm277_vm1, %v11029_v34  ;;  %9430 = vmatprep.mubr.msk.f32.mxu0 %vm277_vm1, %v10752_v52  ;;  %v11054_v52 = vld [vmem:[#allocation2 + $0x52] sm:$0xff] }
 0x12e   : > { %9576 = vmatprep.subr.mxu1 %v11023_v46  ;;  %9527 = vmatpush3.msra.mxu0 %v8125_v20 }
 0x12f   : > { %9628 = vmatprep.subr.mxu0 %v11041_v33 }
 0x130   : > { %9379 = vmatmul.mubr.msk.f32.gmra.mxu1 %vm277_vm1, %v11036_v1  ;;  %9431 = vmatmul.mubr.msk.f32.gmra.mxu0 %vm277_vm1, %v10756_v54  ;;  %v11066_v54 = vld [vmem:[#allocation2 + $0x6a] sm:$0xff] }
 0x131   : > { %9381 = vmatprep.mubr.msk.f32.mxu1 %vm277_vm1, %v11047_v36  ;;  %9433 = vmatprep.mubr.msk.f32.mxu0 %vm277_vm1, %v10776_v5  ;;  %v11072_v5 = vld [vmem:[#allocation2 + $0x7a] sm:$0xff] }
 0x134   : > { %9382 = vmatmul.mubr.msk.f32.gmra.mxu1 %vm277_vm1, %v11054_v52  ;;  %9434 = vmatmul.mubr.msk.f32.gmra.mxu0 %vm277_vm1, %v10780_v7  ;;  %v11078_v7 = vld [vmem:[#allocation2 + $0x82] sm:$0xff] }
 0x135   : > { %9384 = vmatprep.mubr.msk.f32.mxu1 %vm277_vm1, %v11060_v38  ;;  %9436 = vmatprep.mubr.msk.f32.mxu0 %vm277_vm1, %v10800_v24  ;;  %v11084_v24 = vld [vmem:[#allocation2 + $0x92] sm:$0xff] }
 0x138   : > { %9385 = vmatmul.mubr.msk.f32.gmra.mxu1 %vm277_vm1, %v11066_v54  ;;  %9437 = vmatmul.mubr.msk.f32.gmra.mxu0 %vm277_vm1, %v10804_v27  ;;  %v11090_v27 = vld [vmem:[#allocation2 + $0x9a] sm:$0xff] }
 0x139   : > { %9387 = vmatprep.mubr.msk.f32.mxu1 %vm277_vm1, %v11072_v5  ;;  %9439 = vmatprep.mubr.msk.f32.mxu0 %vm277_vm1, %v10823_v42  ;;  %v11096_v42 = vld [vmem:[#allocation2 + $0xaa] sm:$0xff] }
 0x13c   : > { %9388 = vmatmul.mubr.msk.f32.gmra.mxu1 %vm277_vm1, %v11078_v7  ;;  %9440 = vmatmul.mubr.msk.f32.gmra.mxu0 %vm277_vm1, %v10827_v44  ;;  %v11102_v44 = vld [vmem:[#allocation2 + $0xb2] sm:$0xff] }
 0x13d   : > { %9390 = vmatprep.mubr.msk.f32.mxu1 %vm277_vm1, %v11084_v24  ;;  %9442 = vmatprep.mubr.msk.f32.mxu0 %vm277_vm1, %v10844_v56  ;;  %v11108_v56 = vld [vmem:[#allocation2 + $0xc2] sm:$0xff] }
 0x140   : > { %9391 = vmatmul.mubr.msk.f32.gmra.mxu1 %vm277_vm1, %v11090_v27  ;;  %9443 = vmatmul.mubr.msk.f32.gmra.mxu0 %vm277_vm1, %v10848_v58  ;;  %v11114_v58 = vld [vmem:[#allocation2 + $0xca] sm:$0xff] }
 0x141   : > { %9393 = vmatprep.mubr.msk.f32.mxu1 %vm277_vm1, %v11096_v42  ;;  %9445 = vmatprep.mubr.msk.f32.mxu0 %vm277_vm1, %v10866_v63  ;;  %v11120_v63 = vld [vmem:[#allocation2 + $0xda] sm:$0xff] }
 0x144   : > { %9394 = vmatmul.mubr.msk.f32.gmra.mxu1 %vm277_vm1, %v11102_v44  ;;  %9446 = vmatmul.mubr.msk.f32.gmra.mxu0 %vm277_vm1, %v10870_v2  ;;  %v11126_v2 = vld [vmem:[#allocation2 + $0xe2] sm:$0xff] }
 0x145   : > { %9396 = vmatprep.mubr.msk.f32.mxu1 %vm277_vm1, %v11108_v56  ;;  %9448 = vmatprep.mubr.msk.f32.mxu0 %vm277_vm1, %v10862_v47  ;;  %v11132_v47 = vld [vmem:[#allocation2 + $0xf2] sm:$0xff] }
 0x148   : > { %9397 = vmatmul.mubr.msk.f32.gmra.mxu1 %vm277_vm1, %v11114_v58  ;;  %9449 = vmatmul.mubr.msk.f32.gmra.mxu0 %vm277_vm1, %v10890_v9  ;;  %v11138_v9 = vld [vmem:[#allocation2 + $0xfa] sm:$0xff] }
 0x149   : > { %9399 = vmatprep.mubr.msk.f32.mxu1 %vm277_vm1, %v11120_v63  ;;  %9451 = vmatprep.mubr.msk.f32.mxu0 %vm277_vm1, %v10886_v4  ;;  %v11144_v4 = vld [vmem:[#allocation2 + $0x10a] sm:$0xff] }
 0x14c   : > { %9400 = vmatmul.mubr.msk.f32.gmra.mxu1 %vm277_vm1, %v11126_v2  ;;  %9452 = vmatmul.mubr.msk.f32.gmra.mxu0 %vm277_vm1, %v10906_v14  ;;  %v11150_v14 = vld [vmem:[#allocation2 + $0x112] sm:$0xff] }
 0x14d   : > { %9402 = vmatprep.mubr.msk.f32.mxu1 %vm277_vm1, %v11132_v47  ;;  %9454 = vmatprep.mubr.msk.f32.mxu0 %vm277_vm1, %v10902_v11  ;;  %v11156_v11 = vld [vmem:[#allocation2 + $0x122] sm:$0xff] }
 0x150   : > { %9403 = vmatmul.mubr.msk.f32.gmra.mxu1 %vm277_vm1, %v11138_v9  ;;  %9455 = vmatmul.mubr.msk.f32.gmra.mxu0 %vm277_vm1, %v10922_v21  ;;  %v11162_v21 = vld [vmem:[#allocation2 + $0x12a] sm:$0xff] }
 0x151   : > { %9405 = vmatprep.mubr.msk.f32.mxu1 %vm277_vm1, %v11144_v4  ;;  %9457 = vmatprep.mubr.msk.f32.mxu0 %vm277_vm1, %v10918_v16  ;;  %v11168_v16 = vld [vmem:[#allocation2 + $0x13a] sm:$0xff] }
 0x154   : > { %9406 = vmatmul.mubr.msk.f32.gmra.mxu1 %vm277_vm1, %v11150_v14  ;;  %9458 = vmatmul.mubr.msk.f32.gmra.mxu0 %vm277_vm1, %v10938_v29  ;;  %v11174_v29 = vld [vmem:[#allocation2 + $0x142] sm:$0xff] }
 0x155   : > { %9408 = vmatprep.mubr.msk.f32.mxu1 %vm277_vm1, %v11156_v11  ;;  %9460 = vmatprep.mubr.msk.f32.mxu0 %vm277_vm1, %v10934_v23  ;;  %v11180_v23 = vld [vmem:[#allocation2 + $0x152] sm:$0xff] }
 0x158   : > { %9409 = vmatmul.mubr.msk.f32.gmra.mxu1 %vm277_vm1, %v11162_v21  ;;  %9461 = vmatmul.mubr.msk.f32.gmra.mxu0 %vm277_vm1, %v10954_v37  ;;  %v11186_v37 = vld [vmem:[#allocation2 + $0x180] sm:$0xff] }
 0x159   : > { %9411 = vmatprep.mubr.msk.f32.mxu1 %vm277_vm1, %v11168_v16  ;;  %9463 = vmatprep.mubr.msk.f32.mxu0 %vm277_vm1, %v10950_v31  ;;  %v11194_v31 = vld [vmem:[#allocation2 + $0x16a] sm:$0xff] }
 0x15c   : > { %9412 = vmatmul.mubr.msk.f32.gmra.mxu1 %vm277_vm1, %v11174_v29  ;;  %9464 = vmatmul.mubr.msk.f32.gmra.mxu0 %vm277_vm1, %v10970_v45  ;;  %v11200_v45 = vld [vmem:[#allocation2 + $0x188] sm:$0xff] }
 0x15d   : > { %9414 = vmatprep.mubr.msk.f32.mxu1 %vm277_vm1, %v11180_v23  ;;  %9466 = vmatprep.mubr.msk.f32.mxu0 %vm277_vm1, %v10966_v39  ;;  %v11202_v39 = vld [vmem:[#allocation2 + $0x172] sm:$0xff] }
 0x160   : > { %9415 = vmatmul.mubr.msk.f32.gmra.mxu1 %vm277_vm1, %v11188_v60  ;;  %9467 = vmatmul.mubr.msk.f32.gmra.mxu0 %vm277_vm1, %v10982_v51  ;;  %v8159_v51 = vld [vmem:[%s13654_s3 + $0x60] sm:$0xff] }
 0x161   : > { %9417 = vmatprep.mubr.msk.f32.mxu1 %vm277_vm1, %v11194_v31  ;;  %9469 = vmatprep.mubr.msk.f32.mxu0 %vm277_vm1, %v11186_v37 }
 0x164   : > { %9418 = vmatmul.mubr.msk.f32.gmra.mxu1 %vm277_vm1, %v11202_v39  ;;  %9470 = vmatmul.mubr.msk.f32.gmra.mxu0 %vm277_vm1, %v11200_v45 }
 0x165   : > { %9476 = vmatprep.mubr.msk.f32.mxu1 %vm277_vm1, %v10706_v19  ;;  %9528 = vmatprep.mubr.msk.f32.mxu0 %vm277_vm1, %v11005_v18  ;;  %v8193_v19 = vld [vmem:[%s13654_s3 + $0x70] sm:$0xff]  ;;  %v3484_v18 = vld [vmem:[#allocation2 + $0x61] sm:$0xff] }
 0x168   : > { %9477 = vmatmul.mubr.msk.f32.vlgmr.msra.gmra.mxu1 %vm277_vm1, %v10718_v25  ;;  %9529 = vmatmul.mubr.msk.f32.vlgmr.msra.gmra.mxu0 %vm277_vm1, %v11014_v48  ;;  %v11231_v25 = vld [vmem:[%s13654_s3 + $0x88] sm:$0xff] }
 0x169   : > { %9577 = vmatpush3.msra.mxu1 %v11023_v46  ;;  %9479 = vmatprep.mubr.msk.f32.mxu1 %vm277_vm1, %v10730_v35  ;;  %v13706_v35 = vld [vmem:[#allocation8_spill] sm:$0xff] }
 0x16a   : > { %9531 = vmatprep.mubr.msk.f32.mxu0 %vm277_vm1, %v11029_v34  ;;  %9578 = vmatprep.subr.mxu1 %v8159_v51 }
 0x16b   : > { %9579 = vmatpush3.msra.mxu1 %v8159_v51  ;;  %9629 = vmatpush3.msra.mxu0 %v11041_v33  ;;  %v3485_v33 = vld [vmem:[#allocation2 + $0x69] sm:$0xff] }
 0x16c   : > { %9480 = vmatmul.mubr.msk.f32.gmra.mxu1 %vm277_vm1, %v10742_v41  ;;  %9532 = vmatmul.mubr.msk.f32.gmra.mxu0 %vm277_vm1, %v11036_v1  ;;  %v13707_v41 = vld [vmem:[#allocation7_spill] sm:$0xff]  ;;  %v3097_v1 = vld [vmem:[#allocation2 + $0x68] sm:$0xff] }
 0x16d   : > { %9482 = vmatprep.mubr.msk.f32.mxu1 %vm277_vm1, %v10754_v53  ;;  %9534 = vmatprep.mubr.msk.f32.mxu0 %vm277_vm1, %v11047_v36  ;;  %v13708_v53 = vld [vmem:[#allocation10_spill] sm:$0xff]  ;;  %v3102_v51 = vld [vmem:[#allocation2 + $0xa8] sm:$0xff] }
 0x16e   : > { %9630 = vmatprep.subr.mxu0 %v8193_v19  ;;  %9680 = vmatprep.subr.mxu1 %v11231_v25 }
 0x16f   : > { %9631 = vmatpush3.msra.mxu0 %v8193_v19  ;;  %v3490_v19 = vld [vmem:[#allocation2 + $0xa9] sm:$0xff] }
 0x170   : > { %9483 = vmatmul.mubr.msk.f32.gmra.mxu1 %vm277_vm1, %v10766_v59  ;;  %9535 = vmatmul.mubr.msk.f32.gmra.mxu0 %vm277_vm1, %v11054_v52  ;;  %v13709_v59 = vld [vmem:[#allocation9_spill] sm:$0xff] }
 0x171   : > { %9485 = vmatprep.mubr.msk.f32.mxu1 %vm277_vm1, %v10778_v6  ;;  %9537 = vmatprep.mubr.msk.f32.mxu0 %vm277_vm1, %v11060_v38  ;;  %v13710_v6 = vld [vmem:[#allocation11_spill] sm:$0xff]  ;;  %v3098_v38 = vld [vmem:[#allocation2 + $0x78] sm:$0xff] }
 0x174   : > { %9486 = vmatmul.mubr.msk.f32.gmra.mxu1 %vm277_vm1, %v10790_v12  ;;  %9538 = vmatmul.mubr.msk.f32.gmra.mxu0 %vm277_vm1, %v11066_v54  ;;  %v11342_v12 = vld [vmem:[#allocation2 + $0x181] sm:$0xff]  ;;  %v3486_v54 = vld [vmem:[#allocation2 + $0x79] sm:$0xff] }
 0x175   : > { %9488 = vmatprep.mubr.msk.f32.mxu1 %vm277_vm1, %v10802_v26  ;;  %9540 = vmatprep.mubr.msk.f32.mxu0 %vm277_vm1, %v11072_v5  ;;  %v11344_v26 = vld [vmem:[#allocation2 + $0x182] sm:$0xff] }
 0x178   : > { %9489 = vmatmul.mubr.msk.f32.gmra.mxu1 %vm277_vm1, %v10814_v32  ;;  %9541 = vmatmul.mubr.msk.f32.gmra.mxu0 %vm277_vm1, %v11078_v7  ;;  %v11350_v32 = vld [vmem:[#allocation2 + $0x189] sm:$0xff] }
 0x179   : > { %9491 = vmatprep.mubr.msk.f32.mxu1 %vm277_vm1, %v10825_v43  ;;  %9543 = vmatprep.mubr.msk.f32.mxu0 %vm277_vm1, %v11084_v24  ;;  %v11352_v43 = vld [vmem:[#allocation2 + $0x18a] sm:$0xff] }
 0x17c   : > { %9492 = vmatmul.mubr.msk.f32.gmra.mxu1 %vm277_vm1, %v10836_v49  ;;  %9544 = vmatmul.mubr.msk.f32.gmra.mxu0 %vm277_vm1, %v11090_v27  ;;  %v3092_v49 = vld [vmem:[#allocation2 + $0x30] sm:$0xff] }
 0x17d   : > { %9494 = vmatprep.mubr.msk.f32.mxu1 %vm277_vm1, %v10846_v57  ;;  %9546 = vmatprep.mubr.msk.f32.mxu0 %vm277_vm1, %v11096_v42  ;;  %v3480_v57 = vld [vmem:[#allocation2 + $0x31] sm:$0xff] }
 0x180   : > { %9495 = vmatmul.mubr.msk.f32.gmra.mxu1 %vm277_vm1, %v10855_v61  ;;  %9547 = vmatmul.mubr.msk.f32.gmra.mxu0 %vm277_vm1, %v11102_v44  ;;  %v3093_v61 = vld [vmem:[#allocation2 + $0x38] sm:$0xff] }
 0x181   : > { %9497 = vmatprep.mubr.msk.f32.mxu1 %vm277_vm1, %v10868_v0  ;;  %9549 = vmatprep.mubr.msk.f32.mxu0 %vm277_vm1, %v11108_v56  ;;  %v8227_v0 = vld [vmem:[%s13654_s3 + $0x80] sm:$0xff] }
 0x182   : > { %v3099_v56 = vld [vmem:[#allocation2 + $0x80] sm:$0xff] }
 0x184   : > { %9498 = vmatmul.mubr.msk.f32.gmra.mxu1 %vm277_vm1, %v10876_v3  ;;  %9550 = vmatmul.mubr.msk.f32.gmra.mxu0 %vm277_vm1, %v11114_v58  ;;  %v3094_v3 = vld [vmem:[#allocation2 + $0x48] sm:$0xff] }
 0x185   : > { %9500 = vmatprep.mubr.msk.f32.mxu1 %vm277_vm1, %v10864_v62  ;;  %9552 = vmatprep.mubr.msk.f32.mxu0 %vm277_vm1, %v11120_v63  ;;  %v3481_v62 = vld [vmem:[#allocation2 + $0x39] sm:$0xff]  ;;  %v3487_v58 = vld [vmem:[#allocation2 + $0x81] sm:$0xff] }
 0x188   : > { %9501 = vmatmul.mubr.msk.f32.gmra.mxu1 %vm277_vm1, %v10892_v10  ;;  %9553 = vmatmul.mubr.msk.f32.gmra.mxu0 %vm277_vm1, %v11126_v2  ;;  %v3482_v10 = vld [vmem:[#allocation2 + $0x49] sm:$0xff] }
 0x189   : > { %9503 = vmatprep.mubr.msk.f32.mxu1 %vm277_vm1, %v10888_v8  ;;  %9555 = vmatprep.mubr.msk.f32.mxu0 %vm277_vm1, %v11132_v47  ;;  %v11365_v8 = vpop.f32.mrf.mxu0  ;;  %v3100_v47 = vld [vmem:[#allocation2 + $0x90] sm:$0xff] }
 0x18c   : > { %9504 = vmatmul.mubr.msk.f32.gmra.mxu1 %vm277_vm1, %v10908_v15  ;;  %9556 = vmatmul.mubr.msk.f32.gmra.mxu0 %vm277_vm1, %v11138_v9  ;;  %v3095_v15 = vld [vmem:[#allocation2 + $0x50] sm:$0xff] }
 0x18d   : > { %9506 = vmatprep.mubr.msk.f32.mxu1 %vm277_vm1, %v10904_v13  ;;  %9558 = vmatprep.mubr.msk.f32.mxu0 %vm277_vm1, %v11144_v4  ;;  %v11369_v13 = vpop.f32.mrf.mxu1  ;;  %v3488_v9 = vld [vmem:[#allocation2 + $0x91] sm:$0xff] }
 0x190   : > { %9507 = vmatmul.mubr.msk.f32.gmra.mxu1 %vm277_vm1, %v10924_v22  ;;  %9559 = vmatmul.mubr.msk.f32.gmra.mxu0 %vm277_vm1, %v11150_v14 }
 0x191   : > { %9509 = vmatprep.mubr.msk.f32.mxu1 %vm277_vm1, %v10920_v17  ;;  %9561 = vmatprep.mubr.msk.f32.mxu0 %vm277_vm1, %v11156_v11  ;;  %v3483_v17 = vld [vmem:[#allocation2 + $0x51] sm:$0xff] }
 0x194   : > { %9510 = vmatmul.mubr.msk.f32.gmra.mxu1 %vm277_vm1, %v10940_v30  ;;  %9562 = vmatmul.mubr.msk.f32.gmra.mxu0 %vm277_vm1, %v11162_v21  ;;  %v3096_v30 = vld [vmem:[#allocation2 + $0x60] sm:$0xff] }
 0x195   : > { %9512 = vmatprep.mubr.msk.f32.mxu1 %vm277_vm1, %v10936_v28  ;;  %9564 = vmatprep.mubr.msk.f32.mxu0 %vm277_vm1, %v11168_v16 }
 0x198   : > { %9513 = vmatmul.mubr.msk.f32.gmra.mxu1 %vm277_vm1, %v13706_v35  ;;  %9565 = vmatmul.mubr.msk.f32.gmra.mxu0 %vm277_vm1, %v11174_v29 }
 0x199   : > { %9515 = vmatprep.mubr.msk.f32.mxu1 %vm277_vm1, %v13707_v41  ;;  %9567 = vmatprep.mubr.msk.f32.mxu0 %vm277_vm1, %v11180_v23  ;;  %v3101_v23 = vld [vmem:[#allocation2 + $0x98] sm:$0xff] }
 0x19c   : > { %9516 = vmatmul.mubr.msk.f32.gmra.mxu1 %vm277_vm1, %v13708_v53  ;;  %9568 = vmatmul.mubr.msk.f32.gmra.mxu0 %vm277_vm1, %v11188_v60  ;;  %v3489_v60 = vld [vmem:[#allocation2 + $0x99] sm:$0xff] }
 0x19d   : > { %9518 = vmatprep.mubr.msk.f32.mxu1 %vm277_vm1, %v13709_v59  ;;  %9570 = vmatprep.mubr.msk.f32.mxu0 %vm277_vm1, %v11194_v31 }
 0x1a0   : > { %9519 = vmatmul.mubr.msk.f32.gmra.mxu1 %vm277_vm1, %v13710_v6  ;;  %9571 = vmatmul.mubr.msk.f32.gmra.mxu0 %vm277_vm1, %v11202_v39 }
 0x1a1   : > { %9521 = vmatprep.mubr.msk.f32.mxu1 %vm277_vm1, %v11342_v12  ;;  %9573 = vmatprep.mubr.msk.f32.mxu0 %vm277_vm1, %v11344_v26 }
 0x1a4   : > { %9522 = vmatmul.mubr.msk.f32.gmra.mxu1 %vm277_vm1, %v11350_v32  ;;  %9574 = vmatmul.mubr.msk.f32.gmra.mxu0 %vm277_vm1, %v11352_v43 }
 0x1a5   : > { %9580 = vmatprep.mubr.msk.f32.mxu1 %vm277_vm1, %v3092_v49  ;;  %9632 = vmatprep.mubr.msk.f32.mxu0 %vm277_vm1, %v3480_v57  ;;  %v3103_v49 = vld [vmem:[#allocation2 + $0xb0] sm:$0xff] }
 0x1a6   : > { %v3491_v57 = vld [vmem:[#allocation2 + $0xb1] sm:$0xff] }
 0x1a8   : > { %9581 = vmatmul.mubr.msk.f32.vlgmr.msra.gmra.mxu1 %vm277_vm1, %v3093_v61  ;;  %9633 = vmatmul.mubr.msk.f32.vlgmr.msra.gmra.mxu0 %vm277_vm1, %v3481_v62 }
 0x1a9   : > { %9681 = vmatpush3.msra.mxu1 %v11231_v25  ;;  %9583 = vmatprep.mubr.msk.f32.mxu1 %vm277_vm1, %v3094_v3  ;;  %v3492_v3 = vld [vmem:[#allocation2 + $0xc1] sm:$0xff] }
 0x1aa   : > { %9635 = vmatprep.mubr.msk.f32.mxu0 %vm277_vm1, %v3482_v10  ;;  %9682 = vmatprep.subr.mxu1 %v8227_v0 }
 0x1ab   : > { %9683 = vmatpush3.msra.mxu1 %v8227_v0  ;;  %v9273_v22 = vpop.f32.mrf.mxu1  ;;  %v3104_v0 = vld [vmem:[#allocation2 + $0xc0] sm:$0xff] }
 0x1ac   : > { %v9325_v28 = vpop.f32.mrf.mxu0  ;;  %9584 = vmatmul.mubr.msk.f32.gmra.mxu1 %vm277_vm1, %v3095_v15  ;;  %9636 = vmatmul.mubr.msk.f32.gmra.mxu0 %vm277_vm1, %v3483_v17  ;;  %v1012_v50 = vadd.f32 %v9273_v22, %v10996_v40 }
 0x1ad   : > { %9586 = vmatprep.mubr.msk.f32.mxu1 %vm277_vm1, %v3096_v30  ;;  %9638 = vmatprep.mubr.msk.f32.mxu0 %vm277_vm1, %v3484_v18  ;;  %v1006_v48 = vpop.f32.mrf.mxu1  ;;  %v3105_v18 = vld [vmem:[#allocation2 + $0xc8] sm:$0xff] }
 0x1ae   : > { %v1361_v20 = vpop.f32.mrf.mxu0  ;;  %v11377_v46 = vadd.f32 %v9325_v28, %v1012_v50  ;;  %v1007_v34 = vadd.f32 %v10996_v40, %v1006_v48  ;;  %v3493_v50 = vld [vmem:[#allocation2 + $0xc9] sm:$0xff] }
 0x1af   : > { %v9276_v36 = vpop.f32.mrf.mxu1 }
 0x1b0   : > { %v9328_v52 = vpop.f32.mrf.mxu0  ;;  %9587 = vmatmul.mubr.msk.f32.gmra.mxu1 %vm277_vm1, %v3097_v1  ;;  %9639 = vmatmul.mubr.msk.f32.gmra.mxu0 %vm277_vm1, %v3485_v33  ;;  %v11382_v5 = vadd.f32 %v1361_v20, %v1007_v34  ;;  %v1022_v7 = vadd.f32 %v9276_v36, %v10996_v40  ;;  %v3106_v34 = vld [vmem:[#allocation2 + $0xd8] sm:$0xff] }
 0x1b1   : > { %9589 = vmatprep.mubr.msk.f32.mxu1 %vm277_vm1, %v3098_v38  ;;  %9641 = vmatprep.mubr.msk.f32.mxu0 %vm277_vm1, %v3486_v54  ;;  %v1016_v24 = vpop.f32.mrf.mxu1  ;;  %v3494_v1 = vld [vmem:[#allocation2 + $0xd9] sm:$0xff] }
 0x1b2   : > { %v1371_v27 = vpop.f32.mrf.mxu0  ;;  %v11387_v42 = vadd.f32 %v9328_v52, %v1022_v7  ;;  %v1017_v44 = vadd.f32 %v10996_v40, %v1016_v24  ;;  %v3107_v24 = vld [vmem:[#allocation2 + $0xe0] sm:$0xff] }
 0x1b3   : > { %v9279_v63 = vpop.f32.mrf.mxu1 }
 0x1b4   : > { %v9331_v2 = vpop.f32.mrf.mxu0  ;;  %9590 = vmatmul.mubr.msk.f32.gmra.mxu1 %vm277_vm1, %v3099_v56  ;;  %9642 = vmatmul.mubr.msk.f32.gmra.mxu0 %vm277_vm1, %v3487_v58  ;;  %v11392_v4 = vadd.f32 %v1371_v27, %v1017_v44  ;;  %v1032_v14 = vadd.f32 %v9279_v63, %v10996_v40  ;;  %v3495_v27 = vld [vmem:[#allocation2 + $0xe1] sm:$0xff]  ;;  %v3108_v58 = vld [vmem:[#allocation2 + $0xf0] sm:$0xff] }
 0x1b5   : > { %9592 = vmatprep.mubr.msk.f32.mxu1 %vm277_vm1, %v3100_v47  ;;  %9644 = vmatprep.mubr.msk.f32.mxu0 %vm277_vm1, %v3488_v9  ;;  %v1026_v11 = vpop.f32.mrf.mxu1  ;;  %v3496_v63 = vld [vmem:[#allocation2 + $0xf1] sm:$0xff] }
 0x1b6   : > { %v1381_v21 = vpop.f32.mrf.mxu0  ;;  %v11397_v16 = vadd.f32 %v9331_v2, %v1032_v14  ;;  %v1027_v29 = vadd.f32 %v10996_v40, %v1026_v11 }
 0x1b7   : > { %v9282_v31 = vpop.f32.mrf.mxu1 }
 0x1b8   : > { %v9334_v39 = vpop.f32.mrf.mxu0  ;;  %9593 = vmatmul.mubr.msk.f32.gmra.mxu1 %vm277_vm1, %v3101_v23  ;;  %9645 = vmatmul.mubr.msk.f32.gmra.mxu0 %vm277_vm1, %v3489_v60  ;;  %v11402_v25 = vadd.f32 %v1381_v21, %v1027_v29  ;;  %v1042_v35 = vadd.f32 %v9282_v31, %v10996_v40  ;;  %v3109_v29 = vld [vmem:[#allocation2 + $0xf8] sm:$0xff] }
 0x1b9   : > { %9595 = vmatprep.mubr.msk.f32.mxu1 %vm277_vm1, %v3102_v51  ;;  %9647 = vmatprep.mubr.msk.f32.mxu0 %vm277_vm1, %v3490_v19  ;;  %v1036_v41 = vpop.f32.mrf.mxu1  ;;  %v3497_v23 = vld [vmem:[#allocation2 + $0xf9] sm:$0xff]  ;;  %v3498_v51 = vld [vmem:[#allocation2 + $0x109] sm:$0xff] }
 0x1ba   : > { %v1391_v53 = vpop.f32.mrf.mxu0  ;;  %v11407_v59 = vadd.f32 %v9334_v39, %v1042_v35  ;;  %v1037_v6 = vadd.f32 %v10996_v40, %v1036_v41  ;;  %v3110_v39 = vld [vmem:[#allocation2 + $0x108] sm:$0xff] }
 0x1bb   : > { %v9285_v61 = vpop.f32.mrf.mxu1 }
 0x1bc   : > { %v9337_v62 = vpop.f32.mrf.mxu0  ;;  %9596 = vmatmul.mubr.msk.f32.gmra.mxu1 %vm277_vm1, %v3103_v49  ;;  %9648 = vmatmul.mubr.msk.f32.gmra.mxu0 %vm277_vm1, %v3491_v57  ;;  %v11412_v10 = vadd.f32 %v1391_v53, %v1037_v6  ;;  %v1052_v15 = vadd.f32 %v9285_v61, %v10996_v40  ;;  %v3111_v49 = vld [vmem:[#allocation2 + $0x110] sm:$0xff] }
 0x1bd   : > { %9598 = vmatprep.mubr.msk.f32.mxu1 %vm277_vm1, %v3104_v0  ;;  %9650 = vmatprep.mubr.msk.f32.mxu0 %vm277_vm1, %v3492_v3  ;;  %v1046_v17 = vpop.f32.mrf.mxu1  ;;  %v3499_v57 = vld [vmem:[#allocation2 + $0x111] sm:$0xff]  ;;  %v3112_v0 = vld [vmem:[#allocation2 + $0x120] sm:$0xff] }
 0x1be   : > { %v1401_v22 = vpop.f32.mrf.mxu0  ;;  %v11417_v28 = vadd.f32 %v9337_v62, %v1052_v15  ;;  %v1047_v30 = vadd.f32 %v10996_v40, %v1046_v17  ;;  %v3500_v3 = vld [vmem:[#allocation2 + $0x121] sm:$0xff] }
 0x1bf   : > { %v9288_v48 = vpop.f32.mrf.mxu1 }
 0x1c0   : > { %v9340_v20 = vpop.f32.mrf.mxu0  ;;  %9599 = vmatmul.mubr.msk.f32.gmra.mxu1 %vm277_vm1, %v3105_v18  ;;  %9651 = vmatmul.mubr.msk.f32.gmra.mxu0 %vm277_vm1, %v3493_v50  ;;  %v11422_v33 = vadd.f32 %v1401_v22, %v1047_v30  ;;  %v1062_v36 = vadd.f32 %v9288_v48, %v10996_v40  ;;  %v3113_v18 = vld [vmem:[#allocation2 + $0x128] sm:$0xff] }
 0x1c1   : > { %9601 = vmatprep.mubr.msk.f32.mxu1 %vm277_vm1, %v3106_v34  ;;  %9653 = vmatprep.mubr.msk.f32.mxu0 %vm277_vm1, %v3494_v1  ;;  %v1056_v52 = vpop.f32.mrf.mxu1  ;;  %v3501_v50 = vld [vmem:[#allocation2 + $0x129] sm:$0xff]  ;;  %v3114_v34 = vld [vmem:[#allocation2 + $0x138] sm:$0xff] }
 0x1c2   : > { %v1411_v38 = vpop.f32.mrf.mxu0  ;;  %v11427_v54 = vadd.f32 %v9340_v20, %v1062_v36  ;;  %v1057_v7 = vadd.f32 %v10996_v40, %v1056_v52  ;;  %v3502_v1 = vld [vmem:[#allocation2 + $0x139] sm:$0xff] }
 0x1c3   : > { %v9291_v44 = vpop.f32.mrf.mxu1 }
 0x1c4   : > { %v9343_v56 = vpop.f32.mrf.mxu0  ;;  %9602 = vmatmul.mubr.msk.f32.gmra.mxu1 %vm277_vm1, %v3107_v24  ;;  %9654 = vmatmul.mubr.msk.f32.gmra.mxu0 %vm277_vm1, %v3495_v27  ;;  %v11432_v2 = vadd.f32 %v1411_v38, %v1057_v7  ;;  %v1072_v47 = vadd.f32 %v9291_v44, %v10996_v40  ;;  %v3115_v24 = vld [vmem:[#allocation2 + $0x140] sm:$0xff] }
 0x1c5   : > { %9604 = vmatprep.mubr.msk.f32.mxu1 %vm277_vm1, %v3108_v58  ;;  %9656 = vmatprep.mubr.msk.f32.mxu0 %vm277_vm1, %v3496_v63  ;;  %v1066_v9 = vpop.f32.mrf.mxu1  ;;  %v3503_v27 = vld [vmem:[#allocation2 + $0x141] sm:$0xff]  ;;  %v3116_v58 = vld [vmem:[#allocation2 + $0x150] sm:$0xff] }
 0x1c6   : > { %v1421_v14 = vpop.f32.mrf.mxu0  ;;  %v11437_v11 = vadd.f32 %v9343_v56, %v1072_v47  ;;  %v1067_v21 = vadd.f32 %v10996_v40, %v1066_v9  ;;  %v3504_v63 = vld [vmem:[#allocation2 + $0x151] sm:$0xff] }
 0x1c7   : > { %v9294_v60 = vpop.f32.mrf.mxu1 }
 0x1c8   : > { %v9346_v31 = vpop.f32.mrf.mxu0  ;;  %9605 = vmatmul.mubr.msk.f32.gmra.mxu1 %vm277_vm1, %v3109_v29  ;;  %9657 = vmatmul.mubr.msk.f32.gmra.mxu0 %vm277_vm1, %v3497_v23  ;;  %v11442_v19 = vadd.f32 %v1421_v14, %v1067_v21  ;;  %v1082_v35 = vadd.f32 %v9294_v60, %v10996_v40  ;;  %v3117_v29 = vld [vmem:[#allocation2 + $0x158] sm:$0xff] }
 0x1c9   : > { %9607 = vmatprep.mubr.msk.f32.mxu1 %vm277_vm1, %v3110_v39  ;;  %9659 = vmatprep.mubr.msk.f32.mxu0 %vm277_vm1, %v3498_v51  ;;  %v11447_v41 = vpop.f32.mrf.mxu1  ;;  %v3505_v23 = vld [vmem:[#allocation2 + $0x159] sm:$0xff]  ;;  %v3118_v39 = vld [vmem:[#allocation2 + $0x168] sm:$0xff] }
 0x1ca   : > { %v11449_v53 = vpop.f32.mrf.mxu0  ;;  %v11451_v6 = vadd.f32 %v9346_v31, %v1082_v35  ;;  %v3506_v51 = vld [vmem:[#allocation2 + $0x169] sm:$0xff] }
 0x1cb   : > { %v9297_v61 = vpop.f32.mrf.mxu1 }
 0x1cc   : > { %v9349_v62 = vpop.f32.mrf.mxu0  ;;  %9608 = vmatmul.mubr.msk.f32.gmra.mxu1 %vm277_vm1, %v3111_v49  ;;  %9660 = vmatmul.mubr.msk.f32.gmra.mxu0 %vm277_vm1, %v3499_v57  ;;  %v1092_v15 = vadd.f32 %v9297_v61, %v10996_v40 }
 0x1cd   : > { %9610 = vmatprep.mubr.msk.f32.mxu1 %vm277_vm1, %v3112_v0  ;;  %9662 = vmatprep.mubr.msk.f32.mxu0 %vm277_vm1, %v3500_v3  ;;  %v11458_v17 = vpop.f32.mrf.mxu1  ;;  %v3507_v0 = vld [vmem:[#allocation2 + $0x171] sm:$0xff] }
 0x1ce   : > { %13711 = vst [vmem:[#allocation8_spill] sm:$0xff] %v11458_v17  ;;  %v11460_v22 = vpop.f32.mrf.mxu0  ;;  %v11462_v30 = vadd.f32 %v9349_v62, %v1092_v15  ;;  %v3119_v62 = vld [vmem:[#allocation2 + $0x170] sm:$0xff] }
 0x1cf   : > { %13712 = vst [vmem:[#allocation7_spill] sm:$0xff] %v11460_v22  ;;  %v9300_v48 = vpop.f32.mrf.mxu1 }
 0x1d0   : > { %v9352_v20 = vpop.f32.mrf.mxu0  ;;  %9611 = vmatmul.mubr.msk.f32.gmra.mxu1 %vm277_vm1, %v3113_v18  ;;  %9663 = vmatmul.mubr.msk.f32.gmra.mxu0 %vm277_vm1, %v3501_v50  ;;  %v1102_v36 = vadd.f32 %v9300_v48, %v10996_v40 }
 0x1d1   : > { %9613 = vmatprep.mubr.msk.f32.mxu1 %vm277_vm1, %v3114_v34  ;;  %9665 = vmatprep.mubr.msk.f32.mxu0 %vm277_vm1, %v3502_v1  ;;  %v11469_v52 = vpop.f32.mrf.mxu1  ;;  %v3510_v34 = vld [vmem:[#allocation2 + $0x199] sm:$0xff] }
 0x1d2   : > { %13713 = vst [vmem:[#allocation10_spill] sm:$0xff] %v11469_v52  ;;  %v11471_v38 = vpop.f32.mrf.mxu0  ;;  %v11473_v7 = vadd.f32 %v9352_v20, %v1102_v36  ;;  %v3122_v20 = vld [vmem:[#allocation2 + $0x198] sm:$0xff] }
 0x1d3   : > { %13714 = vst [vmem:[#allocation9_spill] sm:$0xff] %v11471_v38  ;;  %v9303_v44 = vpop.f32.mrf.mxu1 }
 0x1d4   : > { %v9355_v56 = vpop.f32.mrf.mxu0  ;;  %9614 = vmatmul.mubr.msk.f32.gmra.mxu1 %vm277_vm1, %v3115_v24  ;;  %9666 = vmatmul.mubr.msk.f32.gmra.mxu0 %vm277_vm1, %v3503_v27  ;;  %v1112_v47 = vadd.f32 %v9303_v44, %v10996_v40  ;;  %v3511_v27 = vld [vmem:[#allocation2 + $0x1a1] sm:$0xff] }
 0x1d5   : > { %9616 = vmatprep.mubr.msk.f32.mxu1 %vm277_vm1, %v3116_v58  ;;  %9668 = vmatprep.mubr.msk.f32.mxu0 %vm277_vm1, %v3504_v63  ;;  %v11480_v9 = vpop.f32.mrf.mxu1 }
 0x1d6   : > { %13715 = vst [vmem:[#allocation11_spill] sm:$0xff] %v11480_v9  ;;  %v11482_v14 = vpop.f32.mrf.mxu0  ;;  %v11484_v21 = vadd.f32 %v9355_v56, %v1112_v47 }
 0x1d7   : > { %13716 = vst [vmem:[#allocation12_spill] sm:$0xff] %v11482_v14  ;;  %v9306_v60 = vpop.f32.mrf.mxu1  ;;  %v5101_v14 = vld [vmem:[%s13656_s5 + $0x28] sm:$0xff] }
 0x1d8   : > { %v9358_v31 = vpop.f32.mrf.mxu0  ;;  %9617 = vmatmul.mubr.msk.f32.gmra.mxu1 %vm277_vm1, %v3117_v29  ;;  %9669 = vmatmul.mubr.msk.f32.gmra.mxu0 %vm277_vm1, %v3505_v23  ;;  %v1122_v35 = vadd.f32 %v9306_v60, %v10996_v40 }
 0x1d9   : > { %9619 = vmatprep.mubr.msk.f32.mxu1 %vm277_vm1, %v3118_v39  ;;  %9671 = vmatprep.mubr.msk.f32.mxu0 %vm277_vm1, %v3506_v51  ;;  %v11491_v49 = vpop.f32.mrf.mxu1 }
 0x1da   : > { %13717 = vst [vmem:[#allocation13_spill] sm:$0xff] %v11491_v49  ;;  %v11493_v57 = vpop.f32.mrf.mxu0  ;;  %v11495_v61 = vadd.f32 %v9358_v31, %v1122_v35  ;;  %v3868_v31 = vld [vmem:[#allocation2 + $0x3a] sm:$0xff]  ;;  %v3869_v35 = vld [vmem:[#allocation2 + $0x4a] sm:$0xff] }
 0x1db   : > { %13718 = vst [vmem:[#allocation14_spill] sm:$0xff] %v11493_v57  ;;  %v9309_v3 = vpop.f32.mrf.mxu1  ;;  %v4320_v57 = vld [vmem:[#allocation3] sm:$0xff] }
 0x1dc   : > { %v9361_v15 = vpop.f32.mrf.mxu0  ;;  %9620 = vmatmul.mubr.msk.f32.gmra.mxu1 %vm277_vm1, %v3119_v62  ;;  %9672 = vmatmul.mubr.msk.f32.gmra.mxu0 %vm277_vm1, %v3507_v0  ;;  %v1132_v18 = vadd.f32 %v9309_v3, %v10996_v40 }
 0x1dd   : > { %9622 = vmatprep.mubr.msk.f32.mxu1 %vm277_vm1, %v11186_v37  ;;  %9674 = vmatprep.mubr.msk.f32.mxu0 %vm277_vm1, %v11342_v12  ;;  %v11504_v50 = vpop.f32.mrf.mxu1  ;;  %v3123_v12 = vld [vmem:[#allocation2 + $0x1a0] sm:$0xff] }
 0x1de   : > { %13719 = vst [vmem:[#allocation15_spill] sm:$0xff] %v11504_v50  ;;  %v11506_v48 = vpop.f32.mrf.mxu0  ;;  %v11508_v1 = vadd.f32 %v9361_v15, %v1132_v18  ;;  %v3870_v18 = vld [vmem:[#allocation2 + $0x52] sm:$0xff] }
 0x1df   : > { %13720 = vst [vmem:[#allocation16_spill] sm:$0xff] %v11506_v48  ;;  %v9312_v36 = vpop.f32.mrf.mxu1 }
 0x1e0   : > { %v9364_v24 = vpop.f32.mrf.mxu0  ;;  %9623 = vmatmul.mubr.msk.f32.gmra.mxu1 %vm277_vm1, %v11200_v45  ;;  %9675 = vmatmul.mubr.msk.f32.gmra.mxu0 %vm277_vm1, %v11350_v32  ;;  %v1142_v37 = vadd.f32 %v9312_v36, %v10996_v40  ;;  %v3867_v45 = vld [vmem:[#allocation2 + $0x32] sm:$0xff]  ;;  %v3871_v36 = vld [vmem:[#allocation2 + $0x62] sm:$0xff] }
 0x1e1   : > { %9625 = vmatprep.mubr.msk.f32.mxu1 %vm277_vm1, %v3122_v20  ;;  %9677 = vmatprep.mubr.msk.f32.mxu0 %vm277_vm1, %v3510_v34  ;;  %v11517_v44 = vpop.f32.mrf.mxu1 }
 0x1e2   : > { %13721 = vst [vmem:[#allocation17_spill] sm:$0xff] %v11517_v44  ;;  %v11519_v56 = vpop.f32.mrf.mxu0  ;;  %v11521_v58 = vadd.f32 %v9364_v24, %v1142_v37 }
 0x1e3   : > { %13722 = vst [vmem:[#allocation18_spill] sm:$0xff] %v11519_v56  ;;  %v9315_v63 = vpop.f32.mrf.mxu1 }
 0x1e4   : > { %v9367_v47 = vpop.f32.mrf.mxu0  ;;  %9626 = vmatmul.mubr.msk.f32.gmra.mxu1 %vm277_vm1, %v3123_v12  ;;  %9678 = vmatmul.mubr.msk.f32.gmra.mxu0 %vm277_vm1, %v3511_v27  ;;  %v1152_v32 = vadd.f32 %v9315_v63, %v10996_v40  ;;  %v3872_v63 = vld [vmem:[#allocation2 + $0x6a] sm:$0xff] }
 0x1e5   : > { %9684 = vmatprep.mubr.msk.f32.mxu1 %vm277_vm1, %v3867_v45  ;;  %v11527_v29 = vpop.f32.mrf.mxu1  ;;  %9736 = vmatprep.mubr.msk.f32.mxu0 %vm277_vm1, %v4320_v57  ;;  %v4682_v57 = vld [vmem:[#allocation3 + $0x9] sm:$0xff] }
 0x1e6   : > { %13723 = vst [vmem:[#allocation19_spill] sm:$0xff] %v11527_v29  ;;  %v11529_v23 = vpop.f32.mrf.mxu0  ;;  %v11531_v60 = vadd.f32 %v9367_v47, %v1152_v32  ;;  %v3873_v32 = vld [vmem:[#allocation2 + $0x7a] sm:$0xff] }
 0x1e7   : > { %13724 = vst [vmem:[#allocation20_spill] sm:$0xff] %v11529_v23  ;;  %v9374_v39 = vpop.f32.mrf.mxu1 }
 0x1e8   : > { %v9426_v51 = vpop.f32.mrf.mxu0  ;;  %9685 = vmatmul.mubr.msk.f32.vlgmr.msra.gmra.mxu1 %vm277_vm1, %v3868_v31  ;;  %v1898_v62 = vadd.f32 %v9374_v39, %v11010_v55 }
 0x1e9   : > { %9687 = vmatprep.mubr.msk.f32.mxu1 %vm277_vm1, %v3869_v35  ;;  %v11536_v0 = vpop.f32.mrf.mxu1 }
 0x1ea   : > { %v11538_v3 = vpop.f32.mrf.mxu0  ;;  %v11540_v15 = vadd.f32 %v9426_v51, %v1898_v62 }
 0x1ec   : > { %v9377_v20 = vpop.f32.mrf.mxu1  ;;  %v9429_v34 = vpop.f32.mrf.mxu0  ;;  %9688 = vmatmul.mubr.msk.f32.gmra.mxu1 %vm277_vm1, %v3870_v18 }
 0x1ed   : > { %v1900_v24 = vadd.f32 %v9377_v20, %v11377_v46  ;;  %9690 = vmatprep.mubr.msk.f32.mxu1 %vm277_vm1, %v3871_v36  ;;  %v3875_v20 = vld [vmem:[#allocation2 + $0x92] sm:$0xff] }
 0x1ee   : > { %v1748_v37 = vpop.f32.mrf.mxu1  ;;  %v11545_v55 = vpop.f32.mrf.mxu0 }
 0x1ef   : > { %v11547_v12 = vadd.f32 %v9429_v34, %v1900_v24  ;;  %v11550_v27 = vadd.f32 %v1748_v37, %v11382_v5  ;;  %v3874_v5 = vld [vmem:[#allocation2 + $0x82] sm:$0xff] }
 0x1f0   : > { %v9380_v47 = vpop.f32.mrf.mxu1  ;;  %v9432_v45 = vpop.f32.mrf.mxu0  ;;  %9691 = vmatmul.mubr.msk.f32.gmra.mxu1 %vm277_vm1, %v3872_v63  ;;  %v3876_v63 = vld [vmem:[#allocation2 + $0x9a] sm:$0xff] }
 0x1f1   : > { %v1902_v31 = vadd.f32 %v9380_v47, %v11387_v42  ;;  %9693 = vmatprep.mubr.msk.f32.mxu1 %vm277_vm1, %v3873_v32  ;;  %v4353_v42 = vld [vmem:[%s13656_s5 + $0x8] sm:$0xff] }
 0x1f2   : > { %v1758_v46 = vpop.f32.mrf.mxu1  ;;  %v11555_v39 = vpop.f32.mrf.mxu0  ;;  %9732 = vmatprep.subr.mxu0 %v4353_v42 }
 0x1f3   : > { %v11557_v51 = vadd.f32 %v9432_v45, %v1902_v31  ;;  %v11560_v35 = vadd.f32 %v1758_v46, %v11392_v4  ;;  %9733 = vmatpush3.msra.mxu0 %v4353_v42 }
 0x1f4   : > { %v9383_v62 = vpop.f32.mrf.mxu1  ;;  %v9435_v18 = vpop.f32.mrf.mxu0  ;;  %9694 = vmatmul.mubr.msk.f32.gmra.mxu1 %vm277_vm1, %v3874_v5 }
 0x1f5   : > { %v1904_v34 = vadd.f32 %v9383_v62, %v11397_v16  ;;  %9696 = vmatprep.mubr.msk.f32.mxu1 %vm277_vm1, %v3875_v20  ;;  %v3877_v16 = vld [vmem:[#allocation2 + $0xaa] sm:$0xff] }
 0x1f6   : > { %v1768_v36 = vpop.f32.mrf.mxu1  ;;  %v11568_v24 = vpop.f32.mrf.mxu0 }
 0x1f7   : > { %v11570_v4 = vadd.f32 %v9435_v18, %v1904_v34  ;;  %v11573_v37 = vadd.f32 %v1768_v36, %v11402_v25  ;;  %v3878_v25 = vld [vmem:[#allocation2 + $0xb2] sm:$0xff]  ;;  %v3879_v34 = vld [vmem:[#allocation2 + $0xc2] sm:$0xff] }
 0x1f8   : > { %v9386_v47 = vpop.f32.mrf.mxu1  ;;  %v9438_v45 = vpop.f32.mrf.mxu0  ;;  %9697 = vmatmul.mubr.msk.f32.gmra.mxu1 %vm277_vm1, %v3876_v63 }
 0x1f9   : > { %v1906_v32 = vadd.f32 %v9386_v47, %v11407_v59  ;;  %9699 = vmatprep.mubr.msk.f32.mxu1 %vm277_vm1, %v3877_v16 }
 0x1fa   : > { %v1778_v31 = vpop.f32.mrf.mxu1  ;;  %v11578_v46 = vpop.f32.mrf.mxu0 }
 0x1fb   : > { %v11580_v5 = vadd.f32 %v9438_v45, %v1906_v32  ;;  %v11583_v62 = vadd.f32 %v1778_v31, %v11412_v10  ;;  %v3880_v10 = vld [vmem:[#allocation2 + $0xca] sm:$0xff]  ;;  %v3881_v32 = vld [vmem:[#allocation2 + $0xda] sm:$0xff] }
 0x1fc   : > { %v9389_v18 = vpop.f32.mrf.mxu1  ;;  %v9441_v20 = vpop.f32.mrf.mxu0  ;;  %9700 = vmatmul.mubr.msk.f32.gmra.mxu1 %vm277_vm1, %v3878_v25 }
 0x1fd   : > { %v1908_v42 = vadd.f32 %v9389_v18, %v11417_v28  ;;  %9702 = vmatprep.mubr.msk.f32.mxu1 %vm277_vm1, %v3879_v34 }
 0x1fe   : > { %v1788_v59 = vpop.f32.mrf.mxu1  ;;  %v11588_v36 = vpop.f32.mrf.mxu0 }
 0x1ff   : > { %v11590_v63 = vadd.f32 %v9441_v20, %v1908_v42  ;;  %v11593_v47 = vadd.f32 %v1788_v59, %v11422_v33  ;;  %v3882_v33 = vld [vmem:[#allocation2 + $0xe2] sm:$0xff]  ;;  %v3883_v59 = vld [vmem:[#allocation2 + $0xf2] sm:$0xff] }
 0x200   : > { %v9392_v45 = vpop.f32.mrf.mxu1  ;;  %v9444_v16 = vpop.f32.mrf.mxu0  ;;  %9703 = vmatmul.mubr.msk.f32.gmra.mxu1 %vm277_vm1, %v3880_v10  ;;  %v1077_v10 = vadd.f32 %v10996_v40, %v11447_v41 }
 0x201   : > { %v1910_v31 = vadd.f32 %v9392_v45, %v11427_v54  ;;  %9705 = vmatprep.mubr.msk.f32.mxu1 %vm277_vm1, %v3881_v32 }
 0x202   : > { %v1798_v28 = vpop.f32.mrf.mxu1  ;;  %v11598_v25 = vpop.f32.mrf.mxu0  ;;  %v1526_v40 = vadd.f32 %v11449_v53, %v1077_v10 }
 0x203   : > { %13725 = vst [vmem:[#allocation21_spill] sm:$0xff] %v11598_v25  ;;  %v11600_v18 = vadd.f32 %v9444_v16, %v1910_v31  ;;  %v11603_v20 = vadd.f32 %v1798_v28, %v11432_v2  ;;  %v3884_v31 = vld [vmem:[#allocation2 + $0xfa] sm:$0xff] }
 0x204   : > { %v9395_v34 = vpop.f32.mrf.mxu1  ;;  %v9447_v42 = vpop.f32.mrf.mxu0  ;;  %9706 = vmatmul.mubr.msk.f32.gmra.mxu1 %vm277_vm1, %v3882_v33  ;;  %v3885_v33 = vld [vmem:[#allocation2 + $0x10a] sm:$0xff] }
 0x205   : > { %v1912_v54 = vadd.f32 %v9395_v34, %v11437_v11  ;;  %9708 = vmatprep.mubr.msk.f32.mxu1 %vm277_vm1, %v3883_v59 }
 0x206   : > { %v1808_v45 = vpop.f32.mrf.mxu1  ;;  %v11610_v32 = vpop.f32.mrf.mxu0 }
 0x207   : > { %13726 = vst [vmem:[#allocation22_spill] sm:$0xff] %v11610_v32  ;;  %v11612_v16 = vadd.f32 %v9447_v42, %v1912_v54  ;;  %v11615_v2 = vadd.f32 %v1808_v45, %v11442_v19  ;;  %v3886_v19 = vld [vmem:[#allocation2 + $0x112] sm:$0xff] }
 0x208   : > { %v9398_v28 = vpop.f32.mrf.mxu1  ;;  %v9450_v23 = vpop.f32.mrf.mxu0  ;;  %9709 = vmatmul.mubr.msk.f32.gmra.mxu1 %vm277_vm1, %v3884_v31  ;;  %v3887_v31 = vld [vmem:[#allocation2 + $0x122] sm:$0xff] }
 0x209   : > { %13727 = vst [vmem:[#allocation23_spill] sm:$0xff] %v11615_v2  ;;  %v1914_v11 = vadd.f32 %v9398_v28, %v11451_v6  ;;  %9711 = vmatprep.mubr.msk.f32.mxu1 %vm277_vm1, %v3885_v33 }
 0x20a   : > { %v1818_v41 = vpop.f32.mrf.mxu1  ;;  %v11621_v34 = vpop.f32.mrf.mxu0 }
 0x20b   : > { %13728 = vst [vmem:[#allocation24_spill] sm:$0xff] %v11621_v34  ;;  %v11623_v42 = vadd.f32 %v9450_v23, %v1914_v11  ;;  %v11625_v59 = vadd.f32 %v1818_v41, %v1526_v40  ;;  %v3888_v23 = vld [vmem:[#allocation2 + $0x12a] sm:$0xff]  ;;  %v3889_v40 = vld [vmem:[#allocation2 + $0x13a] sm:$0xff] }
 0x20c   : > { %v9401_v54 = vpop.f32.mrf.mxu1  ;;  %v9453_v45 = vpop.f32.mrf.mxu0  ;;  %9712 = vmatmul.mubr.msk.f32.gmra.mxu1 %vm277_vm1, %v3886_v19 }
 0x20d   : > { %13729 = vst [vmem:[#allocation25_spill] sm:$0xff] %v11625_v59  ;;  %v1916_v29 = vadd.f32 %v9401_v54, %v11462_v30  ;;  %9714 = vmatprep.mubr.msk.f32.mxu1 %vm277_vm1, %v3887_v31  ;;  %v3890_v54 = vld [vmem:[#allocation2 + $0x142] sm:$0xff] }
 0x20e   : > { %v11630_v53 = vpop.f32.mrf.mxu1  ;;  %v11632_v6 = vpop.f32.mrf.mxu0 }
 0x20f   : > { %13730 = vst [vmem:[#allocation26_spill] sm:$0xff] %v11630_v53  ;;  %13731 = vst [vmem:[#allocation27_spill] sm:$0xff] %v11632_v6  ;;  %v11634_v10 = vadd.f32 %v9453_v45, %v1916_v29  ;;  %v3891_v45 = vld [vmem:[#allocation2 + $0x152] sm:$0xff] }
 0x210   : > { %v9404_v28 = vpop.f32.mrf.mxu1  ;;  %v9456_v33 = vpop.f32.mrf.mxu0  ;;  %9715 = vmatmul.mubr.msk.f32.gmra.mxu1 %vm277_vm1, %v3888_v23 }
 0x211   : > { %v1918_v11 = vadd.f32 %v9404_v28, %v11473_v7  ;;  %9717 = vmatprep.mubr.msk.f32.mxu1 %vm277_vm1, %v3889_v40  ;;  %v4352_v7 = vld [vmem:[%s13656_s5] sm:$0xff] }
 0x212   : > { %v11639_v41 = vpop.f32.mrf.mxu1  ;;  %v11641_v30 = vpop.f32.mrf.mxu0  ;;  %9734 = vmatprep.subr.mxu0 %v4352_v7  ;;  %v3892_v40 = vld [vmem:[#allocation2 + $0x15a] sm:$0xff] }
 0x213   : > { %13732 = vst [vmem:[#allocation28_spill] sm:$0xff] %v11639_v41  ;;  %13733 = vst [vmem:[#allocation29_spill] sm:$0xff] %v11641_v30  ;;  %v11643_v19 = vadd.f32 %v9456_v33, %v1918_v11  ;;  %9735 = vmatpush3.msra.mxu0 %v4352_v7 }
 0x214   : > { %v9407_v31 = vpop.f32.mrf.mxu1  ;;  %v9459_v29 = vpop.f32.mrf.mxu0  ;;  %9718 = vmatmul.mubr.msk.f32.gmra.mxu1 %vm277_vm1, %v3890_v54  ;;  %9836 = vmatprep.subr.mxu0 %v5101_v14 }
 0x215   : > { %v1920_v56 = vadd.f32 %v9407_v31, %v11484_v21  ;;  %9720 = vmatprep.mubr.msk.f32.mxu1 %vm277_vm1, %v3891_v45  ;;  %v3893_v21 = vld [vmem:[#allocation2 + $0x16a] sm:$0xff] }
 0x216   : > { %v11651_v23 = vpop.f32.mrf.mxu1  ;;  %v11653_v28 = vpop.f32.mrf.mxu0 }
 0x217   : > { %13734 = vst [vmem:[#allocation30_spill] sm:$0xff] %v11651_v23  ;;  %13735 = vst [vmem:[#allocation31_spill] sm:$0xff] %v11653_v28  ;;  %v11655_v33 = vadd.f32 %v9459_v29, %v1920_v56  ;;  %v3894_v28 = vld [vmem:[#allocation2 + $0x172] sm:$0xff] }
 0x218   : > { %v9410_v11 = vpop.f32.mrf.mxu1  ;;  %v9462_v54 = vpop.f32.mrf.mxu0  ;;  %9721 = vmatmul.mubr.msk.f32.gmra.mxu1 %vm277_vm1, %v3892_v40 }
 0x219   : > { %v1922_v31 = vadd.f32 %v9410_v11, %v11495_v61  ;;  %9723 = vmatprep.mubr.msk.f32.mxu1 %vm277_vm1, %v3893_v21  ;;  %v3897_v11 = vld [vmem:[#allocation2 + $0x19a] sm:$0xff] }
 0x21a   : > { %v11660_v45 = vpop.f32.mrf.mxu1  ;;  %v11662_v44 = vpop.f32.mrf.mxu0 }
 0x21b   : > { %13736 = vst [vmem:[#allocation32_spill] sm:$0xff] %v11660_v45  ;;  %13737 = vst [vmem:[#allocation33_spill] sm:$0xff] %v11662_v44  ;;  %v11664_v48 = vadd.f32 %v9462_v54, %v1922_v31 }
 0x21c   : > { %v9413_v56 = vpop.f32.mrf.mxu1  ;;  %v9465_v29 = vpop.f32.mrf.mxu0  ;;  %9724 = vmatmul.mubr.msk.f32.gmra.mxu1 %vm277_vm1, %v3894_v28 }
 0x21d   : > { %v1924_v7 = vadd.f32 %v9413_v56, %v11508_v1  ;;  %9726 = vmatprep.mubr.msk.f32.mxu1 %vm277_vm1, %v11344_v26  ;;  %v3898_v1 = vld [vmem:[#allocation2 + $0x1a2] sm:$0xff] }
 0x21e   : > { %v11670_v40 = vpop.f32.mrf.mxu1  ;;  %v11672_v61 = vpop.f32.mrf.mxu0 }
 0x21f   : > { %13738 = vst [vmem:[#allocation34_spill] sm:$0xff] %v11670_v40  ;;  %13739 = vst [vmem:[#allocation35_spill] sm:$0xff] %v11672_v61  ;;  %v11674_v21 = vadd.f32 %v9465_v29, %v1924_v7 }
 0x220   : > { %v9416_v44 = vpop.f32.mrf.mxu1  ;;  %v9468_v54 = vpop.f32.mrf.mxu0  ;;  %9727 = vmatmul.mubr.msk.f32.gmra.mxu1 %vm277_vm1, %v11352_v43 }
 0x221   : > { %v1926_v31 = vadd.f32 %v9416_v44, %v11521_v58  ;;  %9729 = vmatprep.mubr.msk.f32.mxu1 %vm277_vm1, %v3897_v11 }
 0x222   : > { %v11680_v28 = vpop.f32.mrf.mxu1  ;;  %v11682_v26 = vpop.f32.mrf.mxu0 }
 0x223   : > { %13740 = vst [vmem:[#allocation36_spill] sm:$0xff] %v11680_v28  ;;  %13741 = vst [vmem:[#allocation37_spill] sm:$0xff] %v11682_v26  ;;  %v11684_v56 = vadd.f32 %v9468_v54, %v1926_v31 }
 0x224   : > { %v9419_v61 = vpop.f32.mrf.mxu1  ;;  %v9471_v40 = vpop.f32.mrf.mxu0  ;;  %9730 = vmatmul.mubr.msk.f32.gmra.mxu1 %vm277_vm1, %v3898_v1 }
 0x225   : > { %v1928_v29 = vadd.f32 %v9419_v61, %v11531_v60 }
 0x226   : > { %v11688_v7 = vpop.f32.mrf.mxu1  ;;  %v11690_v43 = vpop.f32.mrf.mxu0 }
 0x227   : > { %13742 = vst [vmem:[#allocation38_spill] sm:$0xff] %v11688_v7  ;;  %13743 = vst [vmem:[#allocation39_spill] sm:$0xff] %v11690_v43  ;;  %v11692_v44 = vadd.f32 %v9471_v40, %v1928_v29 }
 0x228   : > { %v9478_v58 = vpop.f32.mrf.mxu1  ;;  %v11694_v11 = vpop.f32.mrf.mxu0 }
 0x229   : > { %v11697_v28 = vadd.f32 %v9478_v58, %v11540_v15 }
 0x22a   : > { %v11699_v54 = vpop.f32.mrf.mxu1  ;;  %v11701_v31 = vpop.f32.mrf.mxu0 }
 0x22c   : > { %v9481_v26 = vpop.f32.mrf.mxu1  ;;  %v11703_v1 = vpop.f32.mrf.mxu0 }
 0x22d   : > { %v11706_v60 = vadd.f32 %v9481_v26, %v11547_v12  ;;  %v4714_v26 = vld [vmem:[%s13656_s5 + $0x18] sm:$0xff] }
 0x22e   : > { %v11708_v61 = vpop.f32.mrf.mxu1  ;;  %v11710_v40 = vpop.f32.mrf.mxu0  ;;  %9784 = vmatprep.subr.mxu1 %v4714_v26 }
 0x22f   : > { %9785 = vmatpush3.msra.mxu1 %v4714_v26 }
 0x230   : > { %v9484_v29 = vpop.f32.mrf.mxu1  ;;  %v11712_v43 = vpop.f32.mrf.mxu0 }
 0x231   : > { %v11715_v15 = vadd.f32 %v9484_v29, %v11557_v51  ;;  %v4321_v51 = vld [vmem:[#allocation3 + $0x8] sm:$0xff]  ;;  %v4713_v29 = vld [vmem:[%s13656_s5 + $0x10] sm:$0xff] }
 0x232   : > { %v11717_v58 = vpop.f32.mrf.mxu1  ;;  %v11719_v7 = vpop.f32.mrf.mxu0  ;;  %9737 = vmatmul.mubr.msk.f32.vlgmr.msra.gmra.mxu0 %vm277_vm1, %v4321_v51  ;;  %9786 = vmatprep.subr.mxu1 %v4713_v29 }
 0x233   : > { %9787 = vmatpush3.msra.mxu1 %v4713_v29  ;;  %9837 = vmatpush3.msra.mxu0 %v5101_v14 }
 0x234   : > { %v9487_v45 = vpop.f32.mrf.mxu1  ;;  %v11721_v50 = vpop.f32.mrf.mxu0 }
 0x235   : > { %v11724_v12 = vadd.f32 %v9487_v45, %v11570_v4  ;;  %v4681_v4 = vld [vmem:[#allocation3 + $0x1] sm:$0xff] }
 0x236   : > { %v11729_v23 = vpop.f32.mrf.mxu1  ;;  %v11731_v30 = vpop.f32.mrf.mxu0  ;;  %9788 = vmatprep.mubr.msk.f32.mxu1 %vm277_vm1, %v4681_v4 }
 0x237   : > { %9789 = vmatmul.mubr.msk.f32.vlgmr.msra.gmra.mxu1 %vm277_vm1, %v4682_v57 }
 0x238   : > { %v9490_v45 = vpop.f32.mrf.mxu1  ;;  %v11737_v49 = vpop.f32.mrf.mxu0 }
 0x239   : > { %v11744_v41 = vadd.f32 %v9490_v45, %v11580_v5 }
 0x23a   : > { %v11747_v26 = vpop.f32.mrf.mxu1  ;;  %v11749_v6 = vpop.f32.mrf.mxu0 }
 0x23c   : > { %v9493_v51 = vpop.f32.mrf.mxu1  ;;  %v11752_v9 = vpop.f32.mrf.mxu0 }
 0x23d   : > { %13744 = vst [vmem:[#allocation40_spill] sm:$0xff] %v11752_v9  ;;  %v11755_v38 = vadd.f32 %v9493_v51, %v11590_v63 }
 0x23e   : > { %v11757_v5 = vpop.f32.mrf.mxu1  ;;  %v11759_v29 = vpop.f32.mrf.mxu0 }
 0x23f   : > { %13745 = vst [vmem:[#allocation41_spill] sm:$0xff] %v11755_v38  ;;  %13746 = vst [vmem:[#allocation42_spill] sm:$0xff] %v11759_v29 }
 0x240   : > { %v9496_v4 = vpop.f32.mrf.mxu1  ;;  %v11761_v45 = vpop.f32.mrf.mxu0 }
 0x241   : > { %13747 = vst [vmem:[#allocation43_spill] sm:$0xff] %v11761_v45  ;;  %v11764_v53 = vadd.f32 %v9496_v4, %v11600_v18 }
 0x242   : > { %v11766_v34 = vpop.f32.mrf.mxu1  ;;  %v11768_v57 = vpop.f32.mrf.mxu0 }
 0x243   : > { %13748 = vst [vmem:[#allocation44_spill] sm:$0xff] %v11764_v53  ;;  %13749 = vst [vmem:[#allocation45_spill] sm:$0xff] %v11766_v34 }
 0x244   : > { %13750 = vst [vmem:[#allocation46_spill] sm:$0xff] %v11768_v57  ;;  %v9499_v14 = vpop.f32.mrf.mxu1  ;;  %v11770_v59 = vpop.f32.mrf.mxu0 }
 0x245   : > { %13751 = vst [vmem:[#allocation47_spill] sm:$0xff] %v11770_v59  ;;  %v11773_v63 = vadd.f32 %v9499_v14, %v11612_v16 }
 0x246   : > { %v11775_v51 = vpop.f32.mrf.mxu1  ;;  %v11777_v52 = vpop.f32.mrf.mxu0 }
 0x247   : > { %13752 = vst [vmem:[#allocation48_spill] sm:$0xff] %v11773_v63  ;;  %13753 = vst [vmem:[#allocation49_spill] sm:$0xff] %v11775_v51 }
 0x248   : > { %13754 = vst [vmem:[#allocation50_spill] sm:$0xff] %v11777_v52  ;;  %v9502_v22 = vpop.f32.mrf.mxu1  ;;  %v11779_v32 = vpop.f32.mrf.mxu0 }
 0x249   : > { %13755 = vst [vmem:[#allocation51_spill] sm:$0xff] %v11779_v32  ;;  %v11782_v18 = vadd.f32 %v9502_v22, %v11623_v42 }
 0x24a   : > { %v11784_v4 = vpop.f32.mrf.mxu1  ;;  %v11786_v45 = vpop.f32.mrf.mxu0 }
 0x24b   : > { %13756 = vst [vmem:[#allocation52_spill] sm:$0xff] %v11782_v18  ;;  %13757 = vst [vmem:[#allocation53_spill] sm:$0xff] %v11784_v4 }
 0x24c   : > { %13758 = vst [vmem:[#allocation54_spill] sm:$0xff] %v11786_v45  ;;  %v9505_v57 = vpop.f32.mrf.mxu1  ;;  %v11788_v53 = vpop.f32.mrf.mxu0 }
 0x24d   : > { %13759 = vst [vmem:[#allocation55_spill] sm:$0xff] %v11788_v53  ;;  %v11791_v16 = vadd.f32 %v9505_v57, %v11634_v10 }
 0x24e   : > { %v11793_v14 = vpop.f32.mrf.mxu1  ;;  %v11795_v59 = vpop.f32.mrf.mxu0 }
 0x24f   : > { %13760 = vst [vmem:[#allocation56_spill] sm:$0xff] %v11791_v16  ;;  %13761 = vst [vmem:[#allocation57_spill] sm:$0xff] %v11793_v14 }
 0x250   : > { %13762 = vst [vmem:[#allocation58_spill] sm:$0xff] %v11795_v59  ;;  %v9508_v52 = vpop.f32.mrf.mxu1  ;;  %v11797_v63 = vpop.f32.mrf.mxu0 }
 0x251   : > { %13763 = vst [vmem:[#allocation59_spill] sm:$0xff] %v11797_v63  ;;  %v11800_v22 = vadd.f32 %v9508_v52, %v11643_v19  ;;  %v5100_v63 = vld [vmem:[%s13656_s5 + $0x20] sm:$0xff] }
 0x252   : > { %v11802_v42 = vpop.f32.mrf.mxu1  ;;  %v11804_v32 = vpop.f32.mrf.mxu0  ;;  %9838 = vmatprep.subr.mxu0 %v5100_v63 }
 0x253   : > { %13764 = vst [vmem:[#allocation60_spill] sm:$0xff] %v11800_v22  ;;  %13765 = vst [vmem:[#allocation61_spill] sm:$0xff] %v11802_v42  ;;  %9839 = vmatpush3.msra.mxu0 %v5100_v63 }
 0x254   : > { %13766 = vst [vmem:[#allocation62_spill] sm:$0xff] %v11804_v32  ;;  %v9511_v45 = vpop.f32.mrf.mxu1  ;;  %v11806_v18 = vpop.f32.mrf.mxu0 }
 0x255   : > { %13767 = vst [vmem:[#allocation63_spill] sm:$0xff] %v11806_v18  ;;  %v11809_v10 = vadd.f32 %v9511_v45, %v11655_v33 }
 0x256   : > { %v11811_v57 = vpop.f32.mrf.mxu1  ;;  %v11813_v53 = vpop.f32.mrf.mxu0 }
 0x257   : > { %13768 = vst [vmem:[#allocation64_spill] sm:$0xff] %v11809_v10  ;;  %13769 = vst [vmem:[#allocation65_spill] sm:$0xff] %v11811_v57 }
 0x258   : > { %13770 = vst [vmem:[#allocation66_spill] sm:$0xff] %v11813_v53  ;;  %v9514_v52 = vpop.f32.mrf.mxu1  ;;  %v11818_v19 = vpop.f32.mrf.mxu0 }
 0x259   : > { %13771 = vst [vmem:[#allocation67_spill] sm:$0xff] %v11818_v19  ;;  %v11821_v32 = vadd.f32 %v9514_v52, %v11664_v48 }
 0x25a   : > { %v11823_v18 = vpop.f32.mrf.mxu1  ;;  %v11825_v33 = vpop.f32.mrf.mxu0 }
 0x25b   : > { %13772 = vst [vmem:[#allocation68_spill] sm:$0xff] %v11821_v32  ;;  %13773 = vst [vmem:[#allocation69_spill] sm:$0xff] %v11823_v18 }
 0x25c   : > { %13774 = vst [vmem:[#allocation70_spill] sm:$0xff] %v11825_v33  ;;  %v9517_v45 = vpop.f32.mrf.mxu1  ;;  %v11827_v10 = vpop.f32.mrf.mxu0 }
 0x25d   : > { %13775 = vst [vmem:[#allocation71_spill] sm:$0xff] %v11827_v10  ;;  %v11830_v53 = vadd.f32 %v9517_v45, %v11674_v21 }
 0x25e   : > { %v11832_v57 = vpop.f32.mrf.mxu1  ;;  %v11834_v22 = vpop.f32.mrf.mxu0 }
 0x25f   : > { %13776 = vst [vmem:[#allocation72_spill] sm:$0xff] %v11830_v53  ;;  %13777 = vst [vmem:[#allocation73_spill] sm:$0xff] %v11832_v57 }
 0x260   : > { %13778 = vst [vmem:[#allocation74_spill] sm:$0xff] %v11834_v22  ;;  %v9520_v19 = vpop.f32.mrf.mxu1  ;;  %v11836_v42 = vpop.f32.mrf.mxu0 }
 0x261   : > { %13779 = vst [vmem:[#allocation75_spill] sm:$0xff] %v11836_v42  ;;  %v11839_v48 = vadd.f32 %v9520_v19, %v11684_v56 }
 0x262   : > { %v11841_v63 = vpop.f32.mrf.mxu1  ;;  %v11843_v52 = vpop.f32.mrf.mxu0 }
 0x263   : > { %13780 = vst [vmem:[#allocation76_spill] sm:$0xff] %v11839_v48  ;;  %13781 = vst [vmem:[#allocation77_spill] sm:$0xff] %v11841_v63 }
 0x264   : > { %13782 = vst [vmem:[#allocation78_spill] sm:$0xff] %v11843_v52  ;;  %v9523_v33 = vpop.f32.mrf.mxu1  ;;  %v11845_v32 = vpop.f32.mrf.mxu0 }
 0x265   : > { %13783 = vst [vmem:[#allocation79_spill] sm:$0xff] %v11845_v32  ;;  %v11848_v21 = vadd.f32 %v9523_v33, %v11692_v44  ;;  %v8359_v33 = vld [vmem:[%s13656_s5 + $0x38] sm:$0xff] }
 0x266   : > { %v11850_v45 = vpop.f32.mrf.mxu1  ;;  %v11852_v10 = vpop.f32.mrf.mxu0  ;;  %9888 = vmatprep.subr.mxu1 %v8359_v33 }
 0x267   : > { %13784 = vst [vmem:[#allocation80_spill] sm:$0xff] %v11848_v21  ;;  %13785 = vst [vmem:[#allocation81_spill] sm:$0xff] %v11850_v45  ;;  %v11879_v21 = vld [vmem:[%s13656_s5 + $0x48] sm:$0xff]  ;;  %9889 = vmatpush3.msra.mxu1 %v8359_v33 }
 0x268   : > { %13786 = vst [vmem:[#allocation82_spill] sm:$0xff] %v11852_v10  ;;  %v11854_v22 = vpop.f32.mrf.mxu1  ;;  %v11856_v42 = vpop.f32.mrf.mxu0  ;;  %v8358_v10 = vld [vmem:[%s13656_s5 + $0x30] sm:$0xff]  ;;  %13787 = vst [vmem:[#allocation83_spill] sm:$0xff] %v11879_v21  ;;  %9940 = vmatprep.subr.mxu0 %v11879_v21 }
 0x269   : > { %9890 = vmatprep.subr.mxu1 %v8358_v10 }
 0x26a   : > { %v11858_v56 = vpop.f32.mrf.mxu1  ;;  %v11860_v19 = vpop.f32.mrf.mxu0  ;;  %9891 = vmatpush3.msra.mxu1 %v8358_v10 }
 0x26c   : > { %v11862_v48 = vpop.f32.mrf.mxu1  ;;  %v11866_v32 = vpop.f32.mrf.mxu0 }
 0x26e   : > { %v11864_v52 = vpop.f32.mrf.mxu1  ;;  %v11884_v63 = vpop.f32.mrf.mxu0 }
 0x270   : > { %v11868_v44 = vpop.f32.mrf.mxu1  ;;  %v11890_v18 = vpop.f32.mrf.mxu0 }
 0x272   : > { %v11881_v45 = vpop.f32.mrf.mxu1  ;;  %v11896_v14 = vpop.f32.mrf.mxu0 }
 0x274   : > { %v11886_v53 = vpop.f32.mrf.mxu1  ;;  %v11902_v21 = vpop.f32.mrf.mxu0 }
 0x276   : > { %v11888_v57 = vpop.f32.mrf.mxu1  ;;  %v11908_v10 = vpop.f32.mrf.mxu0 }
 0x277   : > { %13793 = vst [vmem:[#allocation89_spill] sm:$0xff] %v11908_v10 }
 0x278   : > { %v11892_v59 = vpop.f32.mrf.mxu1  ;;  %v11914_v17 = vpop.f32.mrf.mxu0 }
 0x279   : > { %13796 = vst [vmem:[#allocation92_spill] sm:$0xff] %v11914_v17 }
 0x27a   : > { %v11894_v16 = vpop.f32.mrf.mxu1 }
 0x27b   : > { %13788 = vst [vmem:[#allocation84_spill] sm:$0xff] %v11894_v16 }
 0x27c   : > { %v11898_v4 = vpop.f32.mrf.mxu1 }
 0x27d   : > { %13789 = vst [vmem:[#allocation85_spill] sm:$0xff] %v11898_v4  ;;  %v11920_v4 = vpop.f32.mrf.mxu0 }
 0x27e   : > { %v11900_v33 = vpop.f32.mrf.mxu1  ;;  %13799 = vst [vmem:[#allocation95_spill] sm:$0xff] %v11920_v4 }
 0x27f   : > { %13790 = vst [vmem:[#allocation86_spill] sm:$0xff] %v11900_v33 }
 0x280   : > { %v11904_v51 = vpop.f32.mrf.mxu1 }
 0x281   : > { %13791 = vst [vmem:[#allocation87_spill] sm:$0xff] %v11904_v51  ;;  %v11926_v51 = vpop.f32.mrf.mxu0 }
 0x282   : > { %v11906_v2 = vpop.f32.mrf.mxu1  ;;  %13802 = vst [vmem:[#allocation98_spill] sm:$0xff] %v11926_v51 }
 0x283   : > { %13792 = vst [vmem:[#allocation88_spill] sm:$0xff] %v11906_v2 }
 0x284   : > { %v11910_v34 = vpop.f32.mrf.mxu1 }
 0x285   : > { %13794 = vst [vmem:[#allocation90_spill] sm:$0xff] %v11910_v34 }
 0x286   : > { %v11912_v29 = vpop.f32.mrf.mxu1 }
 0x287   : > { %13795 = vst [vmem:[#allocation91_spill] sm:$0xff] %v11912_v29  ;;  %v11935_v29 = vld [vmem:[%s13655_s4] ss:$0 sm:$0xff] }
 0x288   : > { %v11916_v16 = vpop.f32.mrf.mxu1 }
 0x289   : > { %13797 = vst [vmem:[#allocation93_spill] sm:$0xff] %v11916_v16  ;;  %v11939_v16 = vpop.f32.mrf.mxu0 }
 0x28a   : > { %v11918_v9 = vpop.f32.mrf.mxu1  ;;  %13805 = vst [vmem:[#allocation101_spill] sm:$0xff] %v11939_v16 }
 0x28b   : > { %13798 = vst [vmem:[#allocation94_spill] sm:$0xff] %v11918_v9  ;;  %v997_v9 = vadd.f32 %v11935_v29, %v11369_v13  ;;  %v11946_v51 = vpop.f32.mrf.mxu0 }
 0x28c   : > { %v11922_v33 = vpop.f32.mrf.mxu1 }
 0x28d   : > { %13800 = vst [vmem:[#allocation96_spill] sm:$0xff] %v11922_v33  ;;  %v11953_v17 = vpop.f32.mrf.mxu0 }
 0x28e   : > { %v11924_v38 = vpop.f32.mrf.mxu1 }
 0x28f   : > { %13801 = vst [vmem:[#allocation97_spill] sm:$0xff] %v11924_v38  ;;  %v1510_v38 = vadd.f32 %v11365_v8, %v997_v9  ;;  %v2287_v9 = vadd.f32 %v11545_v55, %v11550_v27  ;;  %v3062_v55 = vadd.f32 %v11703_v1, %v11706_v60  ;;  %v3064_v1 = vadd.f32 %v11712_v43, %v11715_v15 }
 0x290   : > { %v11928_v2 = vpop.f32.mrf.mxu1  ;;  %v3066_v43 = vadd.f32 %v11721_v50, %v11724_v12 }
 0x291   : > { %13803 = vst [vmem:[#allocation99_spill] sm:$0xff] %v11928_v2 }
 0x292   : > { %v11930_v10 = vpop.f32.mrf.mxu1  ;;  %v3455_v50 = vadd.f32 %v11886_v53, %v3066_v43 }
 0x293   : > { %13804 = vst [vmem:[#allocation100_spill] sm:$0xff] %v11930_v10  ;;  %v1897_v10 = vadd.f32 %v11536_v0, %v1510_v38  ;;  %v3060_v38 = vadd.f32 %v11694_v11, %v11697_v28 }
 0x294   : > { %v11941_v34 = vpop.f32.mrf.mxu1 }
 0x295   : > { %13806 = vst [vmem:[#allocation102_spill] sm:$0xff] %v11941_v34  ;;  %v2285_v13 = vadd.f32 %v11538_v3, %v1897_v10  ;;  %v11961_v34 = vpop.f32.mrf.mxu0  ;;  %v2674_v3 = vadd.f32 %v11708_v61, %v2287_v9  ;;  %v3449_v10 = vadd.f32 %v11854_v22, %v3060_v38  ;;  %v3451_v22 = vadd.f32 %v11862_v48, %v3062_v55 }
 0x296   : > { %v11943_v33 = vpop.f32.mrf.mxu1  ;;  %v2293_v38 = vadd.f32 %v11578_v46, %v11583_v62 }
 0x297   : > { %13807 = vst [vmem:[#allocation103_spill] sm:$0xff] %v11943_v33  ;;  %v2672_v33 = vadd.f32 %v11699_v54, %v2285_v13  ;;  %v2289_v54 = vadd.f32 %v11555_v39, %v11560_v35  ;;  %v11976_v13 = vpop.f32.mrf.mxu0  ;;  %v3836_v61 = vadd.f32 %v11856_v42, %v3449_v10  ;;  %v2291_v39 = vadd.f32 %v11568_v24, %v11573_v37 }
 0x298   : > { %v11948_v2 = vpop.f32.mrf.mxu1  ;;  %v3838_v48 = vadd.f32 %v11866_v32, %v3451_v22  ;;  %v3453_v24 = vadd.f32 %v11868_v44, %v3064_v1  ;;  %v13811_v22 = vld [vmem:[#allocation41_spill] sm:$0xff] }
 0x299   : > { %v2676_v28 = vadd.f32 %v11717_v58, %v2289_v54  ;;  %v11991_v35 = vpop.f32.mrf.mxu0  ;;  %v2678_v42 = vadd.f32 %v11729_v23, %v2291_v39  ;;  %v13812_v39 = vld [vmem:[#allocation40_spill] sm:$0xff] }
 0x29a   : > { %v11951_v4 = vpop.f32.mrf.mxu1  ;;  %v3840_v46 = vadd.f32 %v11890_v18, %v3453_v24 }
 0x29b   : > { %v12005_v15 = vpop.f32.mrf.mxu0  ;;  %v3065_v44 = vadd.f32 %v11731_v30, %v2678_v42 }
 0x29c   : > { %v11955_v25 = vpop.f32.mrf.mxu1 }
 0x29d   : > { %13808 = vst [vmem:[#allocation104_spill] sm:$0xff] %v11955_v25  ;;  %v3059_v25 = vadd.f32 %v11701_v31, %v2672_v33  ;;  %v3061_v31 = vadd.f32 %v11710_v40, %v2674_v3  ;;  %v3063_v40 = vadd.f32 %v11719_v7, %v2676_v28  ;;  %v2680_v3 = vadd.f32 %v11747_v26, %v2293_v38  ;;  %v12019_v54 = vpop.f32.mrf.mxu0  ;;  %v12024_v26 = vld [vmem:[%s13656_s5 + $0x58] sm:$0xff] }
 0x29e   : > { %v11958_v16 = vpop.f32.mrf.mxu1  ;;  %v3454_v18 = vadd.f32 %v11888_v57, %v3065_v44  ;;  %9992 = vmatprep.subr.mxu1 %v12024_v26  ;;  %v13810_v57 = vld [vmem:[#allocation21_spill] sm:$0xff] }
 0x29f   : > { %v3448_v27 = vadd.f32 %v11858_v56, %v3059_v25  ;;  %v3450_v60 = vadd.f32 %v11864_v52, %v3061_v31  ;;  %v3452_v23 = vadd.f32 %v11881_v45, %v3063_v40  ;;  %v3068_v45 = vadd.f32 %v11737_v49, %v11744_v41  ;;  %v12039_v1 = vpop.f32.mrf.mxu0  ;;  %v13815_v40 = vld [vmem:[#allocation8_spill] sm:$0xff] }
 0x2a0   : > { %v11963_v8 = vpop.f32.mrf.mxu1  ;;  %v3067_v49 = vadd.f32 %v11749_v6, %v2680_v3  ;;  %v3842_v41 = vadd.f32 %v11902_v21, %v3455_v50  ;;  %v1087_v42 = vadd.f32 %v11935_v29, %v13815_v40 }
 0x2a1   : > { %13809 = vst [vmem:[#allocation105_spill] sm:$0xff] %v11963_v8  ;;  %v3835_v25 = vadd.f32 %v11860_v19, %v3448_v27  ;;  %v3837_v7 = vadd.f32 %v11884_v63, %v3450_v60  ;;  %v2295_v63 = vadd.f32 %v11588_v36, %v11593_v47  ;;  %v3839_v53 = vadd.f32 %v11896_v14, %v3452_v23  ;;  %v13814_v60 = vld [vmem:[#allocation84_spill] sm:$0xff]  ;;  %v13819_v23 = vld [vmem:[#allocation85_spill] sm:$0xff] }
 0x2a2   : > { %v11969_v0 = vpop.f32.mrf.mxu1  ;;  %v3457_v28 = vadd.f32 %v11892_v59, %v3068_v45  ;;  %v12067_v45 = vpop.f32.mrf.mxu0 }
 0x2a3   : > { %v2682_v36 = vadd.f32 %v11757_v5, %v2295_v63 }
 0x2a4   : > { %v11978_v8 = vpop.f32.mrf.mxu1 }
 0x2a6   : > { %v11984_v11 = vpop.f32.mrf.mxu1 }
 0x2a8   : > { %v9686_v33 = vpop.f32.mrf.mxu1 }
 0x2a9   : > { %v4223_v58 = vadd.f32 %v9686_v33, %v3836_v61  ;;  %v2297_v61 = vadd.f32 %v13810_v57, %v11603_v20  ;;  %v3070_v33 = vadd.f32 %v13812_v39, %v13811_v22  ;;  %v13817_v20 = vld [vmem:[#allocation45_spill] sm:$0xff] }
 0x2aa   : > { %v4063_v56 = vpop.f32.mrf.mxu1 }
 0x2ab   : > { %v4255_v37 = vmax.f32 %v4223_v58, 0.0  ;;  %v4222_v9 = vadd.f32 %v4063_v56, %v3835_v25  ;;  %v13813_v25 = vld [vmem:[#allocation89_spill] sm:$0xff]  ;;  %v3456_v58 = vadd.f32 %v13814_v60, %v3067_v49  ;;  %v13816_v56 = vld [vmem:[#allocation42_spill] sm:$0xff]  ;;  %v2684_v24 = vadd.f32 %v13817_v20, %v2297_v61 }
 0x2ac   : > { %v9689_v52 = vpop.f32.mrf.mxu1  ;;  %v3841_v5 = vadd.f32 %v13813_v25, %v3454_v18  ;;  %v13829_v61 = vld [vmem:[#allocation49_spill] sm:$0xff] }
 0x2ad   : > { %4288 = vst.msk [vmem:[#allocation3 + $0x21] sm:$0xff] %vm277_vm1, %v4255_v37  ;;  %v4254_v32 = vmax.f32 %v4222_v9, 0.0  ;;  %v4225_v19 = vadd.f32 %v9689_v52, %v3838_v48  ;;  %v3069_v48 = vadd.f32 %v13816_v56, %v2682_v36  ;;  %v13818_v52 = vld [vmem:[#allocation92_spill] sm:$0xff]  ;;  %v13833_v56 = vld [vmem:[#allocation25_spill] sm:$0xff] }
 0x2ae   : > { %v4073_v10 = vpop.f32.mrf.mxu1 }
 0x2af   : > { %4287 = vst.msk [vmem:[#allocation3 + $0x19] sm:$0xff] %vm277_vm1, %v4254_v32  ;;  %v4257_v62 = vmax.f32 %v4225_v19, 0.0  ;;  %v4224_v12 = vadd.f32 %v4073_v10, %v3837_v7  ;;  %v3844_v7 = vadd.f32 %v13818_v52, %v3457_v28  ;;  %v3459_v32 = vadd.f32 %v13819_v23, %v3070_v33  ;;  %v13820_v10 = vld [vmem:[#allocation23_spill] sm:$0xff]  ;;  %v13827_v28 = vld [vmem:[#allocation10_spill] sm:$0xff]  ;;  %v13836_v52 = vld [vmem:[#allocation48_spill] sm:$0xff] }
 0x2b0   : > { %v9692_v30 = vpop.f32.mrf.mxu1 }
 0x2b1   : > { %4290 = vst.msk [vmem:[#allocation3 + $0x39] sm:$0xff] %vm277_vm1, %v4257_v62  ;;  %v4256_v55 = vmax.f32 %v4224_v12, 0.0  ;;  %v4227_v27 = vadd.f32 %v9692_v30, %v3840_v46  ;;  %v13821_v46 = vld [vmem:[#allocation22_spill] sm:$0xff]  ;;  %v13822_v62 = vld [vmem:[#allocation44_spill] sm:$0xff]  ;;  %v13823_v12 = vld [vmem:[#allocation43_spill] sm:$0xff] }
 0x2b2   : > { %v4083_v47 = vpop.f32.mrf.mxu1  ;;  %v2299_v50 = vadd.f32 %v13821_v46, %v13820_v10  ;;  %v3072_v63 = vadd.f32 %v13823_v12, %v13822_v62  ;;  %v13839_v46 = vld [vmem:[#allocation88_spill] sm:$0xff] }
 0x2b3   : > { %4289 = vst.msk [vmem:[#allocation3 + $0x31] sm:$0xff] %vm277_vm1, %v4256_v55  ;;  %v4259_v14 = vmax.f32 %v4227_v27, 0.0  ;;  %v4226_v31 = vadd.f32 %v4083_v47, %v3839_v53  ;;  %v13824_v53 = vld [vmem:[#allocation95_spill] sm:$0xff]  ;;  %v13825_v55 = vld [vmem:[#allocation86_spill] sm:$0xff] }
 0x2b4   : > { %v9695_v6 = vpop.f32.mrf.mxu1  ;;  %v12061_v3 = vld [vmem:[#allocation3 + $0x21] sm:$0xff]  ;;  %v3843_v18 = vadd.f32 %v13824_v53, %v3456_v58  ;;  %v3458_v27 = vadd.f32 %v13825_v55, %v3069_v48  ;;  %v13826_v47 = vld [vmem:[#allocation7_spill] sm:$0xff]  ;;  %v2686_v22 = vadd.f32 %v13829_v61, %v2299_v50  ;;  %v13834_v48 = vld [vmem:[#allocation24_spill] sm:$0xff] }
 0x2b5   : > { %4292 = vst.msk [vmem:[#allocation3 + $0x51] sm:$0xff] %vm277_vm1, %v4259_v14  ;;  %v4258_v59 = vmax.f32 %v4226_v31, 0.0  ;;  %v4229_v21 = vadd.f32 %v9695_v6, %v3842_v41  ;;  %v1528_v41 = vadd.f32 %v13826_v47, %v1087_v42  ;;  %v1097_v14 = vadd.f32 %v11935_v29, %v13827_v28  ;;  %v13828_v31 = vld [vmem:[#allocation46_spill] sm:$0xff]  ;;  %v13832_v58 = vld [vmem:[#allocation87_spill] sm:$0xff] }
 0x2b6   : > { %v4093_v37 = vpop.f32.mrf.mxu1  ;;  %v12048_v9 = vld [vmem:[#allocation3 + $0x18] sm:$0xff]  ;;  %v12052_v43 = vld [vmem:[#allocation3 + $0x20] sm:$0xff]  ;;  %v3071_v57 = vadd.f32 %v13828_v31, %v2684_v24  ;;  %v2301_v20 = vadd.f32 %v13834_v48, %v13833_v56  ;;  %v13835_v24 = vld [vmem:[#allocation26_spill] sm:$0xff] }
 0x2b7   : > { %v12050_v38 = vld [vmem:[#allocation3 + $0x19] sm:$0xff]  ;;  %4291 = vst.msk [vmem:[#allocation3 + $0x49] sm:$0xff] %vm277_vm1, %v4258_v59  ;;  %v4261_v19 = vmax.f32 %v4229_v21, 0.0  ;;  %v4228_v44 = vadd.f32 %v4093_v37, %v3841_v5  ;;  %9739 = vmatprep.mubr.msk.f32.mxu0 %vm277_vm1, %v12048_v9  ;;  %v13831_v5 = vld [vmem:[#allocation98_spill] sm:$0xff]  ;;  %v3461_v59 = vadd.f32 %v13832_v58, %v3072_v63  ;;  %v1915_v37 = vadd.f32 %v13835_v24, %v1528_v41  ;;  %v13841_v53 = vld [vmem:[#allocation11_spill] sm:$0xff] }
 0x2b8   : > { %9791 = vmatprep.mubr.msk.f32.mxu1 %vm277_vm1, %v12050_v38  ;;  %v9698_v30 = vpop.f32.mrf.mxu1  ;;  %9740 = vmatmul.mubr.msk.f32.gmra.mxu0 %vm277_vm1, %v12052_v43  ;;  %v3846_v60 = vadd.f32 %v13831_v5, %v3459_v32  ;;  %v12094_v42 = vld [vmem:[#allocation3 + $0x39] sm:$0xff]  ;;  %v12101_v32 = vpop.f32.mrf.mxu0  ;;  %v3460_v50 = vadd.f32 %v13839_v46, %v3071_v57  ;;  %v13842_v55 = vld [vmem:[#allocation50_spill] sm:$0xff] }
 0x2b9   : > { %9792 = vmatmul.mubr.msk.f32.gmra.mxu1 %vm277_vm1, %v12061_v3  ;;  %4294 = vst.msk [vmem:[#allocation3 + $0x69] sm:$0xff] %vm277_vm1, %v4261_v19  ;;  %v4260_v49 = vmax.f32 %v4228_v44, 0.0  ;;  %v4231_v36 = vadd.f32 %v9698_v30, %v3844_v7  ;;  %v13837_v7 = vld [vmem:[#allocation47_spill] sm:$0xff]  ;;  %v13838_v44 = vld [vmem:[#allocation101_spill] sm:$0xff]  ;;  %v3848_v57 = vadd.f32 %v11946_v51, %v3461_v59  ;;  %v13844_v61 = vld [vmem:[#allocation90_spill] sm:$0xff] }
 0x2ba   : > { %v4103_v39 = vpop.f32.mrf.mxu1  ;;  %v12081_v33 = vld [vmem:[#allocation3 + $0x30] sm:$0xff]  ;;  %v12085_v25 = vld [vmem:[#allocation3 + $0x38] sm:$0xff]  ;;  %v3074_v23 = vadd.f32 %v13837_v7, %v13836_v52  ;;  %v3845_v10 = vadd.f32 %v13838_v44, %v3458_v27  ;;  %v13840_v63 = vld [vmem:[#allocation9_spill] sm:$0xff]  ;;  %v12134_v48 = vpop.f32.mrf.mxu0  ;;  %v3847_v24 = vadd.f32 %v11953_v17, %v3460_v50 }
 0x2bb   : > { %v12083_v6 = vld [vmem:[#allocation3 + $0x31] sm:$0xff]  ;;  %13830 = vst [vmem:[#allocation21_spill] sm:$0xff] %v12085_v25  ;;  %4293 = vst.msk [vmem:[#allocation3 + $0x61] sm:$0xff] %vm277_vm1, %v4260_v49  ;;  %v4263_v21 = vmax.f32 %v4231_v36, 0.0  ;;  %v4230_v40 = vadd.f32 %v4103_v39, %v3843_v18  ;;  %9742 = vmatprep.mubr.msk.f32.mxu0 %vm277_vm1, %v12081_v33  ;;  %v1530_v30 = vadd.f32 %v13840_v63, %v1097_v14  ;;  %v13843_v36 = vld [vmem:[#allocation53_spill] sm:$0xff] }
 0x2bc   : > { %9794 = vmatprep.mubr.msk.f32.mxu1 %vm277_vm1, %v12083_v6  ;;  %v9701_v19 = vpop.f32.mrf.mxu1  ;;  %9743 = vmatmul.mubr.msk.f32.gmra.mxu0 %vm277_vm1, %v12085_v25  ;;  %v1107_v18 = vadd.f32 %v11935_v29, %v13841_v53  ;;  %v3073_v49 = vadd.f32 %v13842_v55, %v2686_v22  ;;  %v2688_v47 = vadd.f32 %v13843_v36, %v2301_v20  ;;  %v12128_v22 = vld [vmem:[#allocation3 + $0x51] sm:$0xff]  ;;  %v13853_v63 = vld [vmem:[#allocation57_spill] sm:$0xff] }
 0x2bd   : > { %9795 = vmatmul.mubr.msk.f32.gmra.mxu1 %vm277_vm1, %v12094_v42  ;;  %4296 = vst.msk [vmem:[#allocation3 + $0x81] sm:$0xff] %vm277_vm1, %v4263_v21  ;;  %v4262_v62 = vmax.f32 %v4230_v40, 0.0  ;;  %v4233_v12 = vadd.f32 %v9701_v19, %v3846_v60  ;;  %v3463_v39 = vadd.f32 %v13844_v61, %v3074_v23  ;;  %v13845_v60 = vld [vmem:[#allocation27_spill] sm:$0xff]  ;;  %v13846_v21 = vld [vmem:[#allocation28_spill] sm:$0xff]  ;;  %v13857_v61 = vld [vmem:[#allocation29_spill] sm:$0xff] }
 0x2be   : > { %v4113_v41 = vpop.f32.mrf.mxu1  ;;  %v12115_v28 = vld [vmem:[#allocation3 + $0x48] sm:$0xff]  ;;  %v12119_v27 = vld [vmem:[#allocation3 + $0x50] sm:$0xff]  ;;  %v2303_v58 = vadd.f32 %v13845_v60, %v1915_v37  ;;  %v1917_v40 = vadd.f32 %v13846_v21, %v1530_v30  ;;  %v13847_v56 = vld [vmem:[#allocation52_spill] sm:$0xff]  ;;  %v12167_v21 = vpop.f32.mrf.mxu0 }
 0x2bf   : > { %v12117_v31 = vld [vmem:[#allocation3 + $0x49] sm:$0xff]  ;;  %4295 = vst.msk [vmem:[#allocation3 + $0x79] sm:$0xff] %vm277_vm1, %v4262_v62  ;;  %v4265_v14 = vmax.f32 %v4233_v12, 0.0  ;;  %v4232_v5 = vadd.f32 %v4113_v41, %v3845_v10  ;;  %9745 = vmatprep.mubr.msk.f32.mxu0 %vm277_vm1, %v12115_v28  ;;  %v13850_v19 = vld [vmem:[#allocation12_spill] sm:$0xff]  ;;  %v13851_v10 = vld [vmem:[#allocation13_spill] sm:$0xff]  ;;  %v3850_v50 = vadd.f32 %v11961_v34, %v3463_v39 }
 0x2c0   : > { %9797 = vmatprep.mubr.msk.f32.mxu1 %vm277_vm1, %v12117_v31  ;;  %v13848_v51 = vld [vmem:[#allocation51_spill] sm:$0xff]  ;;  %v9704_v20 = vpop.f32.mrf.mxu1  ;;  %9746 = vmatmul.mubr.msk.f32.gmra.mxu0 %vm277_vm1, %v12119_v27  ;;  %v1532_v44 = vadd.f32 %v13850_v19, %v1107_v18  ;;  %v1117_v46 = vadd.f32 %v11935_v29, %v13851_v10  ;;  %v13852_v62 = vld [vmem:[#allocation54_spill] sm:$0xff]  ;;  %v2690_v30 = vadd.f32 %v13853_v63, %v2303_v58  ;;  %v13859_v58 = vld [vmem:[#allocation56_spill] sm:$0xff] }
 0x2c1   : > { %v3076_v59 = vadd.f32 %v13848_v51, %v13847_v56  ;;  %9798 = vmatmul.mubr.msk.f32.gmra.mxu1 %vm277_vm1, %v12128_v22  ;;  %v13849_v52 = vld [vmem:[#allocation91_spill] sm:$0xff]  ;;  %4298 = vst.msk [vmem:[#allocation3 + $0x99] sm:$0xff] %vm277_vm1, %v4265_v14  ;;  %v4264_v37 = vmax.f32 %v4232_v5, 0.0  ;;  %v4235_v23 = vadd.f32 %v9704_v20, %v3848_v57  ;;  %v3075_v12 = vadd.f32 %v13852_v62, %v2688_v47  ;;  %v13858_v5 = vld [vmem:[#allocation30_spill] sm:$0xff]  ;;  %v13865_v62 = vld [vmem:[#allocation61_spill] sm:$0xff] }
 0x2c2   : > { %v3462_v7 = vadd.f32 %v13849_v52, %v3073_v49  ;;  %v4123_v53 = vpop.f32.mrf.mxu1  ;;  %v12148_v55 = vld [vmem:[#allocation3 + $0x60] sm:$0xff]  ;;  %v12152_v17 = vld [vmem:[#allocation3 + $0x68] sm:$0xff]  ;;  %v2305_v14 = vadd.f32 %v13857_v61, %v1917_v40  ;;  %v1919_v60 = vadd.f32 %v13858_v5, %v1532_v44  ;;  %v13860_v34 = vld [vmem:[#allocation55_spill] sm:$0xff] }
 0x2c3   : > { %13854 = vst [vmem:[#allocation41_spill] sm:$0xff] %v12148_v55  ;;  %v12150_v36 = vld [vmem:[#allocation3 + $0x61] sm:$0xff]  ;;  %13855 = vst [vmem:[#allocation40_spill] sm:$0xff] %v12152_v17  ;;  %v4267_v18 = vmax.f32 %v4235_v23, 0.0  ;;  %v4234_v57 = vadd.f32 %v4123_v53, %v3847_v24  ;;  %9748 = vmatprep.mubr.msk.f32.mxu0 %vm277_vm1, %v12148_v55  ;;  %v12161_v47 = vld [vmem:[#allocation3 + $0x69] sm:$0xff]  ;;  %v3078_v39 = vadd.f32 %v13860_v34, %v13859_v58 }
 0x2c4   : > { %v13856_v49 = vld [vmem:[#allocation93_spill] sm:$0xff]  ;;  %4297 = vst.msk [vmem:[#allocation3 + $0x91] sm:$0xff] %vm277_vm1, %v4264_v37  ;;  %9800 = vmatprep.mubr.msk.f32.mxu1 %vm277_vm1, %v12150_v36  ;;  %v9707_v56 = vpop.f32.mrf.mxu1  ;;  %9749 = vmatmul.mubr.msk.f32.gmra.mxu0 %vm277_vm1, %v12152_v17  ;;  %v3849_v51 = vadd.f32 %v11976_v13, %v3462_v7  ;;  %v13862_v52 = vld [vmem:[#allocation14_spill] sm:$0xff]  ;;  %v13863_v23 = vld [vmem:[#allocation15_spill] sm:$0xff]  ;;  %v2692_v63 = vadd.f32 %v13865_v62, %v2305_v14 }
 0x2c5   : > { %v3465_v41 = vadd.f32 %v13856_v49, %v3076_v59  ;;  %9801 = vmatmul.mubr.msk.f32.gmra.mxu1 %vm277_vm1, %v12161_v47  ;;  %v13861_v59 = vld [vmem:[#allocation94_spill] sm:$0xff]  ;;  %4300 = vst.msk [vmem:[#allocation3 + $0xb1] sm:$0xff] %vm277_vm1, %v4267_v18  ;;  %v4266_v40 = vmax.f32 %v4234_v57, 0.0  ;;  %v4237_v24 = vadd.f32 %v9707_v56, %v3850_v50  ;;  %v1534_v37 = vadd.f32 %v13862_v52, %v1117_v46  ;;  %v13870_v57 = vld [vmem:[#allocation31_spill] sm:$0xff]  ;;  %v13871_v5 = vld [vmem:[#allocation32_spill] sm:$0xff] }
 0x2c6   : > { %v3464_v20 = vadd.f32 %v13861_v59, %v3075_v12  ;;  %v1127_v19 = vadd.f32 %v11935_v29, %v13863_v23  ;;  %v13864_v44 = vld [vmem:[#allocation58_spill] sm:$0xff]  ;;  %v4133_v53 = vpop.f32.mrf.mxu1  ;;  %v12181_v49 = vld [vmem:[#allocation3 + $0x78] sm:$0xff]  ;;  %v12185_v13 = vld [vmem:[#allocation3 + $0x80] sm:$0xff]  ;;  %v2307_v14 = vadd.f32 %v13870_v57, %v1919_v60 }
 0x2c7   : > { %v3077_v10 = vadd.f32 %v13864_v44, %v2690_v30  ;;  %13866 = vst [vmem:[#allocation89_spill] sm:$0xff] %v12181_v49  ;;  %v12183_v61 = vld [vmem:[#allocation3 + $0x79] sm:$0xff]  ;;  %13867 = vst [vmem:[#allocation84_spill] sm:$0xff] %v12185_v13  ;;  %v3852_v7 = vadd.f32 %v11991_v35, %v3465_v41  ;;  %v4269_v46 = vmax.f32 %v4237_v24, 0.0  ;;  %v4236_v18 = vadd.f32 %v4133_v53, %v3849_v51  ;;  %v12194_v30 = vld [vmem:[#allocation3 + $0x81] sm:$0xff] }
 0x2c8   : > { %v13868_v12 = vld [vmem:[#allocation96_spill] sm:$0xff]  ;;  %4299 = vst.msk [vmem:[#allocation3 + $0xa9] sm:$0xff] %vm277_vm1, %v4266_v40  ;;  %9751 = vmatprep.mubr.msk.f32.mxu0 %vm277_vm1, %v12181_v49  ;;  %9803 = vmatprep.mubr.msk.f32.mxu1 %vm277_vm1, %v12183_v61  ;;  %13869 = vst [vmem:[#allocation8_spill] sm:$0xff] %v12194_v30  ;;  %v1921_v58 = vadd.f32 %v13871_v5, %v1534_v37  ;;  %v13873_v35 = vld [vmem:[#allocation59_spill] sm:$0xff]  ;;  %v9710_v56 = vpop.f32.mrf.mxu1  ;;  %v3851_v51 = vadd.f32 %v12005_v15, %v3464_v20 }
 0x2c9   : > { %v3467_v50 = vadd.f32 %v13868_v12, %v3078_v39  ;;  %v13872_v34 = vld [vmem:[#allocation60_spill] sm:$0xff]  ;;  %v12200_v39 = vpop.f32.mrf.mxu0  ;;  %9752 = vmatmul.mubr.msk.f32.gmra.mxu0 %vm277_vm1, %v12185_v13  ;;  %9804 = vmatmul.mubr.msk.f32.gmra.mxu1 %vm277_vm1, %v12194_v30  ;;  %v13874_v59 = vld [vmem:[#allocation97_spill] sm:$0xff]  ;;  %4302 = vst.msk [vmem:[#allocation3 + $0xc9] sm:$0xff] %vm277_vm1, %v4269_v46  ;;  %v4268_v60 = vmax.f32 %v4236_v18, 0.0  ;;  %v4239_v24 = vadd.f32 %v9710_v56, %v3852_v7  ;;  %v13877_v62 = vld [vmem:[#allocation62_spill] sm:$0xff] }
 0x2ca   : > { %v3080_v41 = vadd.f32 %v13873_v35, %v13872_v34  ;;  %v3466_v40 = vadd.f32 %v13874_v59, %v3077_v10  ;;  %v13875_v52 = vld [vmem:[#allocation16_spill] sm:$0xff]  ;;  %v13876_v23 = vld [vmem:[#allocation17_spill] sm:$0xff]  ;;  %v3079_v53 = vadd.f32 %v13877_v62, %v2692_v63  ;;  %v4143_v5 = vpop.f32.mrf.mxu1  ;;  %v13882_v10 = vld [vmem:[#allocation99_spill] sm:$0xff] }
 0x2cb   : > { %v1536_v37 = vadd.f32 %v13875_v52, %v1127_v19  ;;  %v1137_v44 = vadd.f32 %v11935_v29, %v13876_v23  ;;  %v13878_v12 = vld [vmem:[#allocation65_spill] sm:$0xff]  ;;  %v12214_v34 = vld [vmem:[#allocation3 + $0x90] sm:$0xff]  ;;  %v12218_v15 = vld [vmem:[#allocation3 + $0x98] sm:$0xff]  ;;  %v3854_v20 = vadd.f32 %v12019_v54, %v3467_v50  ;;  %4301 = vst.msk [vmem:[#allocation3 + $0xc1] sm:$0xff] %vm277_vm1, %v4268_v60  ;;  %v4271_v19 = vmax.f32 %v4239_v24, 0.0 }
 0x2cc   : > { %v2694_v57 = vadd.f32 %v13878_v12, %v2307_v14  ;;  %13879 = vst [vmem:[#allocation42_spill] sm:$0xff] %v12214_v34  ;;  %v12216_v35 = vld [vmem:[#allocation3 + $0x91] sm:$0xff]  ;;  %13881 = vst [vmem:[#allocation92_spill] sm:$0xff] %v12218_v15  ;;  %v3469_v7 = vadd.f32 %v13882_v10, %v3080_v41  ;;  %v4238_v46 = vadd.f32 %v4143_v5, %v3851_v51  ;;  %9754 = vmatprep.mubr.msk.f32.mxu0 %vm277_vm1, %v12214_v34  ;;  %v12227_v63 = vld [vmem:[#allocation3 + $0x99] sm:$0xff]  ;;  %v12233_v41 = vpop.f32.mrf.mxu0  ;;  %v9713_v60 = vpop.f32.mrf.mxu1 }
 0x2cd   : > { %13880 = vst [vmem:[#allocation45_spill] sm:$0xff] %v12216_v35  ;;  %9806 = vmatprep.mubr.msk.f32.mxu1 %vm277_vm1, %v12216_v35  ;;  %13883 = vst [vmem:[#allocation85_spill] sm:$0xff] %v12227_v63  ;;  %v13884_v18 = vld [vmem:[#allocation33_spill] sm:$0xff]  ;;  %v13885_v56 = vld [vmem:[#allocation34_spill] sm:$0xff]  ;;  %9755 = vmatmul.mubr.msk.f32.gmra.mxu0 %vm277_vm1, %v12218_v15  ;;  %v3853_v51 = vadd.f32 %v12039_v1, %v3466_v40 }
 0x2ce   : > { %v2309_v14 = vadd.f32 %v13884_v18, %v1921_v58  ;;  %v1923_v59 = vadd.f32 %v13885_v56, %v1536_v37  ;;  %v13886_v52 = vld [vmem:[#allocation64_spill] sm:$0xff]  ;;  %v13887_v54 = vld [vmem:[#allocation63_spill] sm:$0xff]  ;;  %9807 = vmatmul.mubr.msk.f32.gmra.mxu1 %vm277_vm1, %v12227_v63  ;;  %4304 = vst.msk [vmem:[#allocation3 + $0xe1] sm:$0xff] %vm277_vm1, %v4271_v19  ;;  %v4270_v58 = vmax.f32 %v4238_v46, 0.0  ;;  %v4241_v37 = vadd.f32 %v9713_v60, %v3854_v20  ;;  %v13889_v62 = vld [vmem:[#allocation18_spill] sm:$0xff]  ;;  %v4153_v35 = vpop.f32.mrf.mxu1 }
 0x2cf   : > { %v3082_v50 = vadd.f32 %v13887_v54, %v13886_v52  ;;  %v13888_v24 = vld [vmem:[#allocation100_spill] sm:$0xff]  ;;  %v1538_v12 = vadd.f32 %v13889_v62, %v1137_v44  ;;  %v13890_v5 = vld [vmem:[#allocation19_spill] sm:$0xff]  ;;  %v13891_v18 = vld [vmem:[#allocation66_spill] sm:$0xff]  ;;  %v3856_v40 = vadd.f32 %v12067_v45, %v3469_v7  ;;  %v4240_v19 = vadd.f32 %v4153_v35, %v3853_v51 }
 0x2d0   : > { %v3468_v23 = vadd.f32 %v13888_v24, %v3079_v53  ;;  %v1147_v10 = vadd.f32 %v11935_v29, %v13890_v5  ;;  %v3081_v56 = vadd.f32 %v13891_v18, %v2694_v57  ;;  %v13892_v52 = vld [vmem:[#allocation69_spill] sm:$0xff]  ;;  %v12247_v30 = vld [vmem:[#allocation3 + $0xa8] sm:$0xff]  ;;  %v12251_v1 = vld [vmem:[#allocation3 + $0xb0] sm:$0xff]  ;;  %4303 = vst.msk [vmem:[#allocation3 + $0xd9] sm:$0xff] %vm277_vm1, %v4270_v58  ;;  %v4273_v44 = vmax.f32 %v4241_v37, 0.0  ;;  %v9716_v58 = vpop.f32.mrf.mxu1 }
 0x2d1   : > { %v2696_v54 = vadd.f32 %v13892_v52, %v2309_v14  ;;  %13893 = vst [vmem:[#allocation23_spill] sm:$0xff] %v12247_v30  ;;  %v12249_v63 = vld [vmem:[#allocation3 + $0xa9] sm:$0xff]  ;;  %13894 = vst [vmem:[#allocation22_spill] sm:$0xff] %v12251_v1  ;;  %9757 = vmatprep.mubr.msk.f32.mxu0 %vm277_vm1, %v12247_v30  ;;  %v12260_v29 = vld [vmem:[#allocation3 + $0xb1] sm:$0xff]  ;;  %v4243_v62 = vadd.f32 %v9716_v58, %v3856_v40 }
 0x2d2   : > { %v13895_v53 = vld [vmem:[#allocation102_spill] sm:$0xff]  ;;  %9809 = vmatprep.mubr.msk.f32.mxu1 %vm277_vm1, %v12249_v63  ;;  %13896 = vst [vmem:[#allocation44_spill] sm:$0xff] %v12260_v29  ;;  %v13897_v57 = vld [vmem:[#allocation35_spill] sm:$0xff]  ;;  %v13898_v14 = vld [vmem:[#allocation36_spill] sm:$0xff]  ;;  %9758 = vmatmul.mubr.msk.f32.gmra.mxu0 %vm277_vm1, %v12251_v1  ;;  %v3855_v35 = vadd.f32 %v12101_v32, %v3468_v23 }
 0x2d3   : > { %v3471_v20 = vadd.f32 %v13895_v53, %v3082_v50  ;;  %v2311_v46 = vadd.f32 %v13897_v57, %v1923_v59  ;;  %v1925_v60 = vadd.f32 %v13898_v14, %v1538_v12  ;;  %v13899_v24 = vld [vmem:[#allocation68_spill] sm:$0xff]  ;;  %v13900_v45 = vld [vmem:[#allocation67_spill] sm:$0xff]  ;;  %v12266_v50 = vpop.f32.mrf.mxu0  ;;  %9810 = vmatmul.mubr.msk.f32.gmra.mxu1 %vm277_vm1, %v12260_v29  ;;  %4306 = vst.msk [vmem:[#allocation3 + $0xf9] sm:$0xff] %vm277_vm1, %v4273_v44  ;;  %v4272_v59 = vmax.f32 %v4240_v19, 0.0  ;;  %v13903_v18 = vld [vmem:[#allocation70_spill] sm:$0xff]  ;;  %v4163_v14 = vpop.f32.mrf.mxu1 }
 0x2d4   : > { %v3084_v7 = vadd.f32 %v13900_v45, %v13899_v24  ;;  %v13901_v51 = vld [vmem:[#allocation103_spill] sm:$0xff]  ;;  %v13902_v12 = vld [vmem:[#allocation20_spill] sm:$0xff]  ;;  %v3083_v52 = vadd.f32 %v13903_v18, %v2696_v54  ;;  %v13904_v53 = vld [vmem:[#allocation73_spill] sm:$0xff]  ;;  %v4242_v40 = vadd.f32 %v4163_v14, %v3855_v35 }
 0x2d5   : > { %v3470_v37 = vadd.f32 %v13901_v51, %v3081_v56  ;;  %v1540_v5 = vadd.f32 %v13902_v12, %v1147_v10  ;;  %v2698_v57 = vadd.f32 %v13904_v53, %v2311_v46  ;;  %v12278_v24 = vld [vmem:[#allocation3 + $0xc0] sm:$0xff]  ;;  %v12282_v29 = vld [vmem:[#allocation3 + $0xc8] sm:$0xff]  ;;  %v3858_v32 = vadd.f32 %v12134_v48, %v3471_v20  ;;  %4305 = vst.msk [vmem:[#allocation3 + $0xf1] sm:$0xff] %vm277_vm1, %v4272_v59  ;;  %v13909_v58 = vld [vmem:[#allocation72_spill] sm:$0xff] }
 0x2d6   : > { %13905 = vst [vmem:[#allocation43_spill] sm:$0xff] %v12278_v24  ;;  %v12280_v45 = vld [vmem:[#allocation3 + $0xc1] sm:$0xff]  ;;  %13906 = vst [vmem:[#allocation95_spill] sm:$0xff] %v12282_v29  ;;  %v3473_v23 = vadd.f32 %v11948_v2, %v3084_v7  ;;  %v4275_v56 = vmax.f32 %v4243_v62, 0.0  ;;  %9760 = vmatprep.mubr.msk.f32.mxu0 %vm277_vm1, %v12278_v24  ;;  %v12291_v10 = vld [vmem:[#allocation3 + $0xc9] sm:$0xff]  ;;  %v3806_v2 = vpop.f32.mrf.mxu0  ;;  %v9719_v7 = vpop.f32.mrf.mxu1  ;;  %v3472_v51 = vadd.f32 %v11951_v4, %v3083_v52 }
 0x2d7   : > { %9812 = vmatprep.mubr.msk.f32.mxu1 %vm277_vm1, %v12280_v45  ;;  %v13907_v54 = vld [vmem:[#allocation37_spill] sm:$0xff]  ;;  %v13908_v19 = vld [vmem:[#allocation38_spill] sm:$0xff]  ;;  %v13910_v48 = vld [vmem:[#allocation71_spill] sm:$0xff]  ;;  %9761 = vmatmul.mubr.msk.f32.gmra.mxu0 %vm277_vm1, %v12282_v29  ;;  %v3857_v35 = vadd.f32 %v12167_v21, %v3470_v37  ;;  %v4245_v59 = vadd.f32 %v9719_v7, %v3858_v32 }
 0x2d8   : > { %v2313_v44 = vadd.f32 %v13907_v54, %v1925_v60  ;;  %v1927_v46 = vadd.f32 %v13908_v19, %v1540_v5  ;;  %v3086_v20 = vadd.f32 %v13910_v48, %v13909_v58  ;;  %9813 = vmatmul.mubr.msk.f32.gmra.mxu1 %vm277_vm1, %v12291_v10  ;;  %4308 = vst.msk [vmem:[#allocation3 + $0x111] sm:$0xff] %vm277_vm1, %v4275_v56  ;;  %v4274_v60 = vmax.f32 %v4242_v40, 0.0  ;;  %v13911_v62 = vld [vmem:[#allocation74_spill] sm:$0xff]  ;;  %v13912_v5 = vld [vmem:[#allocation77_spill] sm:$0xff]  ;;  %v4173_v53 = vpop.f32.mrf.mxu1  ;;  %v12306_v14 = vld [vmem:[#allocation3 + $0xd8] sm:$0xff] }
 0x2d9   : > { %v3085_v12 = vadd.f32 %v13911_v62, %v2698_v57  ;;  %13913 = vst [vmem:[#allocation86_spill] sm:$0xff] %v12306_v14  ;;  %v12308_v54 = vld [vmem:[#allocation3 + $0xd9] sm:$0xff]  ;;  %v3860_v58 = vadd.f32 %v12200_v39, %v3473_v23  ;;  %v4277_v4 = vmax.f32 %v4245_v59, 0.0  ;;  %v4244_v52 = vadd.f32 %v4173_v53, %v3857_v35  ;;  %9763 = vmatprep.mubr.msk.f32.mxu0 %vm277_vm1, %v12306_v14  ;;  %v12319_v57 = vld [vmem:[#allocation3 + $0xe1] sm:$0xff]  ;;  %v13916_v32 = vld [vmem:[#allocation39_spill] sm:$0xff]  ;;  %v9676_v39 = vpop.f32.mrf.mxu0 }
 0x2da   : > { %v2700_v18 = vadd.f32 %v13912_v5, %v2313_v44  ;;  %v12310_v19 = vld [vmem:[#allocation3 + $0xe0] sm:$0xff]  ;;  %v13915_v21 = vld [vmem:[#allocation104_spill] sm:$0xff]  ;;  %4307 = vst.msk [vmem:[#allocation3 + $0x109] sm:$0xff] %vm277_vm1, %v4274_v60  ;;  %9815 = vmatprep.mubr.msk.f32.mxu1 %vm277_vm1, %v12308_v54  ;;  %v2315_v56 = vadd.f32 %v13916_v32, %v1927_v46  ;;  %v13918_v44 = vld [vmem:[#allocation75_spill] sm:$0xff]  ;;  %v9722_v23 = vpop.f32.mrf.mxu1 }
 0x2db   : > { %13914 = vst [vmem:[#allocation7_spill] sm:$0xff] %v12310_v19  ;;  %v3475_v37 = vadd.f32 %v13915_v21, %v3086_v20  ;;  %v13917_v40 = vld [vmem:[#allocation76_spill] sm:$0xff]  ;;  %9764 = vmatmul.mubr.msk.f32.gmra.mxu0 %vm277_vm1, %v12310_v19  ;;  %v3859_v20 = vadd.f32 %v12233_v41, %v3472_v51  ;;  %v3474_v7 = vadd.f32 %v11958_v16, %v3085_v12  ;;  %4310 = vst.msk [vmem:[#allocation3 + $0x129] sm:$0xff] %vm277_vm1, %v4277_v4  ;;  %v13919_v46 = vld [vmem:[#allocation78_spill] sm:$0xff] }
 0x2dc   : > { %v3088_v48 = vadd.f32 %v13918_v44, %v13917_v40  ;;  %9816 = vmatmul.mubr.msk.f32.gmra.mxu1 %vm277_vm1, %v12319_v57  ;;  %v4276_v35 = vmax.f32 %v4244_v52, 0.0  ;;  %v4247_v60 = vadd.f32 %v9722_v23, %v3860_v58  ;;  %v3087_v59 = vadd.f32 %v13919_v46, %v2700_v18  ;;  %v13920_v62 = vld [vmem:[#allocation81_spill] sm:$0xff]  ;;  %v4183_v53 = vpop.f32.mrf.mxu1  ;;  %v12333_v21 = vld [vmem:[#allocation3 + $0xf0] sm:$0xff]  ;;  %v12337_v40 = vld [vmem:[#allocation3 + $0xf8] sm:$0xff] }
 0x2dd   : > { %v2702_v5 = vadd.f32 %v13920_v62, %v2315_v56  ;;  %13921 = vst [vmem:[#allocation10_spill] sm:$0xff] %v12333_v21  ;;  %v12335_v32 = vld [vmem:[#allocation3 + $0xf1] sm:$0xff]  ;;  %13922 = vst [vmem:[#allocation46_spill] sm:$0xff] %v12337_v40  ;;  %v3862_v44 = vadd.f32 %v12266_v50, %v3475_v37  ;;  %v13923_v41 = vld [vmem:[#allocation105_spill] sm:$0xff]  ;;  %v4246_v12 = vadd.f32 %v4183_v53, %v3859_v20  ;;  %9766 = vmatprep.mubr.msk.f32.mxu0 %vm277_vm1, %v12333_v21  ;;  %v3816_v56 = vpop.f32.mrf.mxu0 }
 0x2de   : > { %v3477_v51 = vadd.f32 %v13923_v41, %v3088_v48  ;;  %4309 = vst.msk [vmem:[#allocation3 + $0x121] sm:$0xff] %vm277_vm1, %v4276_v35  ;;  %v4279_v16 = vmax.f32 %v4247_v60, 0.0  ;;  %9818 = vmatprep.mubr.msk.f32.mxu1 %vm277_vm1, %v12335_v32  ;;  %v12346_v18 = vld [vmem:[#allocation3 + $0xf9] sm:$0xff]  ;;  %v13926_v4 = vld [vmem:[#allocation79_spill] sm:$0xff]  ;;  %v9725_v23 = vpop.f32.mrf.mxu1  ;;  %v3861_v50 = vadd.f32 %v3806_v2, %v3474_v7  ;;  %v3476_v37 = vadd.f32 %v11969_v0, %v3087_v59  ;;  %v13927_v35 = vld [vmem:[#allocation82_spill] sm:$0xff] }
 0x2df   : > { %13924 = vst [vmem:[#allocation49_spill] sm:$0xff] %v12346_v18  ;;  %v13925_v58 = vld [vmem:[#allocation80_spill] sm:$0xff]  ;;  %9767 = vmatmul.mubr.msk.f32.gmra.mxu0 %vm277_vm1, %v12337_v40  ;;  %v4278_v48 = vmax.f32 %v4246_v12, 0.0  ;;  %v4249_v20 = vadd.f32 %v9725_v23, %v3862_v44  ;;  %v3089_v60 = vadd.f32 %v13927_v35, %v2702_v5  ;;  %v9679_v46 = vpop.f32.mrf.mxu0 }
 0x2e0   : > { %v3090_v52 = vadd.f32 %v13926_v4, %v13925_v58  ;;  %9819 = vmatmul.mubr.msk.f32.gmra.mxu1 %vm277_vm1, %v12346_v18  ;;  %4312 = vst.msk [vmem:[#allocation3 + $0x141] sm:$0xff] %vm277_vm1, %v4279_v16  ;;  %v4193_v62 = vpop.f32.mrf.mxu1  ;;  %v3864_v4 = vadd.f32 %v9676_v39, %v3477_v51  ;;  %v12369_v7 = vld [vmem:[#allocation3 + $0x111] sm:$0xff] }
 0x2e1   : > { %v12357_v53 = vld [vmem:[#allocation3 + $0x108] sm:$0xff]  ;;  %v12361_v58 = vld [vmem:[#allocation3 + $0x110] sm:$0xff]  ;;  %4311 = vst.msk [vmem:[#allocation3 + $0x139] sm:$0xff] %vm277_vm1, %v4278_v48  ;;  %v4281_v0 = vmax.f32 %v4249_v20, 0.0  ;;  %v4248_v2 = vadd.f32 %v4193_v62, %v3861_v50  ;;  %v3478_v39 = vadd.f32 %v11984_v11, %v3089_v60  ;;  %v3826_v51 = vpop.f32.mrf.mxu0 }
 0x2e2   : > { %13928 = vst [vmem:[#allocation98_spill] sm:$0xff] %v12357_v53  ;;  %v12359_v41 = vld [vmem:[#allocation3 + $0x109] sm:$0xff]  ;;  %13929 = vst [vmem:[#allocation87_spill] sm:$0xff] %v12361_v58  ;;  %v3479_v18 = vadd.f32 %v11978_v8, %v3090_v52  ;;  %9769 = vmatprep.mubr.msk.f32.mxu0 %vm277_vm1, %v12357_v53  ;;  %v9728_v59 = vpop.f32.mrf.mxu1  ;;  %v3863_v8 = vadd.f32 %v3816_v56, %v3476_v37 }
 0x2e3   : > { %9821 = vmatprep.mubr.msk.f32.mxu1 %vm277_vm1, %v12359_v41  ;;  %9770 = vmatmul.mubr.msk.f32.gmra.mxu0 %vm277_vm1, %v12361_v58  ;;  %4314 = vst.msk [vmem:[#allocation3 + $0x159] sm:$0xff] %vm277_vm1, %v4281_v0  ;;  %v4280_v5 = vmax.f32 %v4248_v2, 0.0  ;;  %v4251_v44 = vadd.f32 %v9728_v59, %v3864_v4  ;;  %v12388_v11 = vld [vmem:[#allocation3 + $0x129] sm:$0xff] }
 0x2e4   : > { %9822 = vmatmul.mubr.msk.f32.gmra.mxu1 %vm277_vm1, %v12369_v7  ;;  %v4203_v16 = vpop.f32.mrf.mxu1  ;;  %v3866_v50 = vadd.f32 %v9679_v46, %v3479_v18  ;;  %v3865_v18 = vadd.f32 %v3826_v51, %v3478_v39 }
 0x2e5   : > { %v12377_v12 = vld [vmem:[#allocation3 + $0x120] sm:$0xff]  ;;  %v12381_v23 = vld [vmem:[#allocation3 + $0x128] sm:$0xff]  ;;  %4313 = vst.msk [vmem:[#allocation3 + $0x151] sm:$0xff] %vm277_vm1, %v4280_v5  ;;  %v4283_v48 = vmax.f32 %v4251_v44, 0.0  ;;  %v4250_v20 = vadd.f32 %v4203_v16, %v3863_v8 }
 0x2e6   : > { %13930 = vst [vmem:[#allocation25_spill] sm:$0xff] %v12377_v12  ;;  %v12379_v52 = vld [vmem:[#allocation3 + $0x121] sm:$0xff]  ;;  %13931 = vst [vmem:[#allocation24_spill] sm:$0xff] %v12381_v23  ;;  %9772 = vmatprep.mubr.msk.f32.mxu0 %vm277_vm1, %v12377_v12  ;;  %v9731_v56 = vpop.f32.mrf.mxu1 }
 0x2e7   : > { %9824 = vmatprep.mubr.msk.f32.mxu1 %vm277_vm1, %v12379_v52  ;;  %9773 = vmatmul.mubr.msk.f32.gmra.mxu0 %vm277_vm1, %v12381_v23  ;;  %4316 = vst.msk [vmem:[#allocation3 + $0x171] sm:$0xff] %vm277_vm1, %v4283_v48  ;;  %v4282_v37 = vmax.f32 %v4250_v20, 0.0  ;;  %v4253_v35 = vadd.f32 %v9731_v56, %v3866_v50  ;;  %v12406_v59 = vld [vmem:[#allocation3 + $0x141] sm:$0xff] }
 0x2e8   : > { %9825 = vmatmul.mubr.msk.f32.gmra.mxu1 %vm277_vm1, %v12388_v11  ;;  %v4213_v60 = vpop.f32.mrf.mxu1  ;;  %v12395_v46 = vld [vmem:[#allocation3 + $0x138] sm:$0xff]  ;;  %v12399_v4 = vld [vmem:[#allocation3 + $0x140] sm:$0xff] }
 0x2e9   : > { %13932 = vst [vmem:[#allocation26_spill] sm:$0xff] %v12395_v46  ;;  %v12397_v62 = vld [vmem:[#allocation3 + $0x139] sm:$0xff]  ;;  %13933 = vst [vmem:[#allocation48_spill] sm:$0xff] %v12399_v4  ;;  %v4285_v0 = vmax.f32 %v4253_v35, 0.0  ;;  %v4252_v2 = vadd.f32 %v4213_v60, %v3865_v18  ;;  %9775 = vmatprep.mubr.msk.f32.mxu0 %vm277_vm1, %v12395_v46  ;;  %v5068_v16 = vld [vmem:[#allocation3 + $0x2] sm:$0xff] }
 0x2ea   : > { %4315 = vst.msk [vmem:[#allocation3 + $0x169] sm:$0xff] %vm277_vm1, %v4282_v37  ;;  %9827 = vmatprep.mubr.msk.f32.mxu1 %vm277_vm1, %v12397_v62  ;;  %v12424_v51 = vld [vmem:[#allocation3 + $0x159] sm:$0xff]  ;;  %v5069_v18 = vld [vmem:[#allocation3 + $0xa] sm:$0xff] }
 0x2eb   : > { %9776 = vmatmul.mubr.msk.f32.gmra.mxu0 %vm277_vm1, %v12399_v4  ;;  %4318 = vst.msk [vmem:[#allocation3 + $0x189] sm:$0xff] %vm277_vm1, %v4285_v0  ;;  %v4284_v8 = vmax.f32 %v4252_v2, 0.0  ;;  %v8392_v37 = vld [vmem:[%s13656_s5 + $0x40] sm:$0xff]  ;;  %v12455_v35 = vld [vmem:[#allocation3 + $0x1a] sm:$0xff]  ;;  %v12467_v0 = vld [vmem:[#allocation3 + $0x22] sm:$0xff] }
 0x2ec   : > { %9828 = vmatmul.mubr.msk.f32.gmra.mxu1 %vm277_vm1, %v12406_v59  ;;  %v12413_v39 = vld [vmem:[#allocation3 + $0x150] sm:$0xff]  ;;  %v12417_v44 = vld [vmem:[#allocation3 + $0x158] sm:$0xff] }
 0x2ed   : > { %13934 = vst [vmem:[#allocation47_spill] sm:$0xff] %v12413_v39  ;;  %v12415_v5 = vld [vmem:[#allocation3 + $0x151] sm:$0xff]  ;;  %13935 = vst [vmem:[#allocation101_spill] sm:$0xff] %v12417_v44  ;;  %9778 = vmatprep.mubr.msk.f32.mxu0 %vm277_vm1, %v12413_v39 }
 0x2ee   : > { %4317 = vst.msk [vmem:[#allocation3 + $0x181] sm:$0xff] %vm277_vm1, %v4284_v8  ;;  %9830 = vmatprep.mubr.msk.f32.mxu1 %vm277_vm1, %v12415_v5  ;;  %v12440_v56 = vld [vmem:[#allocation3 + $0x171] sm:$0xff] }
 0x2ef   : > { %9779 = vmatmul.mubr.msk.f32.gmra.mxu0 %vm277_vm1, %v12417_v44  ;;  %v13937_v60 = vld [vmem:[#allocation83_spill] sm:$0xff]  ;;  %v12476_v2 = vld [vmem:[%s13656_s5 + $0x68] sm:$0xff] }
 0x2f0   : > { %9831 = vmatmul.mubr.msk.f32.gmra.mxu1 %vm277_vm1, %v12424_v51  ;;  %v12482_v8 = vld [vmem:[#allocation3 + $0x32] sm:$0xff] }
 0x2f1   : > { %v12430_v50 = vld [vmem:[#allocation3 + $0x168] sm:$0xff]  ;;  %v12434_v20 = vld [vmem:[#allocation3 + $0x170] sm:$0xff] }
 0x2f2   : > { %13936 = vst [vmem:[#allocation88_spill] sm:$0xff] %v12430_v50  ;;  %v12432_v48 = vld [vmem:[#allocation3 + $0x169] sm:$0xff]  ;;  %9781 = vmatprep.mubr.msk.f32.mxu0 %vm277_vm1, %v12430_v50 }
 0x2f3   : > { %9833 = vmatprep.mubr.msk.f32.mxu1 %vm277_vm1, %v12432_v48  ;;  %9782 = vmatmul.mubr.msk.f32.gmra.mxu0 %vm277_vm1, %v12434_v20 }
 0x2f4   : > { %9834 = vmatmul.mubr.msk.f32.gmra.mxu1 %vm277_vm1, %v12440_v56  ;;  %9840 = vmatprep.mubr.msk.f32.mxu0 %vm277_vm1, %v5068_v16  ;;  %v9738_v16 = vpop.f32.mrf.mxu0 }
 0x2f5   : > { %9892 = vmatprep.mubr.msk.f32.mxu1 %vm277_vm1, %v12048_v9  ;;  %v12465_v9 = vld [vmem:[%s13657_s6] ss:$0 sm:$0xff] }
 0x2f7   : > { %9841 = vmatmul.mubr.msk.f32.vlgmr.msra.gmra.mxu0 %vm277_vm1, %v5069_v18  ;;  %v9790_v18 = vpop.f32.mrf.mxu1 }
 0x2f8   : > { %9893 = vmatmul.mubr.msk.f32.vlgmr.msra.gmra.mxu1 %vm277_vm1, %v12052_v43  ;;  %9941 = vmatpush3.msra.mxu0 %v13937_v60  ;;  %v8426_v43 = vld [vmem:[%s13656_s5 + $0x50] sm:$0xff]  ;;  %v12495_v60 = vld [vmem:[%s13656_s5 + $0x78] sm:$0xff] }
 0x2f9   : > { %9843 = vmatprep.mubr.msk.f32.mxu0 %vm277_vm1, %v12455_v35  ;;  %9895 = vmatprep.mubr.msk.f32.mxu1 %vm277_vm1, %v12081_v33 }
 0x2fa   : > { %9942 = vmatprep.subr.mxu0 %v8392_v37  ;;  %9993 = vmatpush3.msra.mxu1 %v12024_v26  ;;  %v4528_v26 = vadd.f32 %v9738_v16, %v12465_v9  ;;  %v12503_v16 = vld [vmem:[#allocation3 + $0x4a] sm:$0xff] }
 0x2fb   : > { %9943 = vmatpush3.msra.mxu0 %v8392_v37  ;;  %9994 = vmatprep.subr.mxu1 %v8426_v43  ;;  %v12490_v37 = vld [vmem:[#allocation3 + $0x3a] sm:$0xff] }
 0x2fc   : > { %9844 = vmatmul.mubr.msk.f32.gmra.mxu0 %vm277_vm1, %v12467_v0  ;;  %9896 = vmatmul.mubr.msk.f32.gmra.mxu1 %vm277_vm1, %v12085_v25  ;;  %v12497_v25 = vadd.f32 %v9790_v18, %v4528_v26  ;;  %v12516_v26 = vld [vmem:[#allocation3 + $0x62] sm:$0xff]  ;;  %v12522_v18 = vld [vmem:[#allocation3 + $0x6a] sm:$0xff] }
 0x2fd   : > { %9846 = vmatprep.mubr.msk.f32.mxu0 %vm277_vm1, %v12482_v8  ;;  %9898 = vmatprep.mubr.msk.f32.mxu1 %vm277_vm1, %v12115_v28 }
 0x2fe   : > { %10044 = vmatprep.subr.mxu0 %v12476_v2  ;;  %9995 = vmatpush3.msra.mxu1 %v8426_v43  ;;  %13938 = vst [vmem:[#allocation9_spill] sm:$0xff] %v12497_v25  ;;  %v12510_v43 = vld [vmem:[#allocation3 + $0x52] sm:$0xff]  ;;  %v12528_v25 = vld [vmem:[#allocation3 + $0x7a] sm:$0xff] }
 0x2ff   : > { %10096 = vmatprep.subr.mxu1 %v12495_v60 }
 0x300   : > { %9847 = vmatmul.mubr.msk.f32.gmra.mxu0 %vm277_vm1, %v12490_v37  ;;  %9899 = vmatmul.mubr.msk.f32.gmra.mxu1 %vm277_vm1, %v12119_v27 }
 0x301   : > { %9849 = vmatprep.mubr.msk.f32.mxu0 %vm277_vm1, %v12503_v16  ;;  %9901 = vmatprep.mubr.msk.f32.mxu1 %vm277_vm1, %v12148_v55  ;;  %v12650_v55 = vld [vmem:[#allocation3 + $0x180] sm:$0xff] }
 0x304   : > { %9850 = vmatmul.mubr.msk.f32.gmra.mxu0 %vm277_vm1, %v12510_v43  ;;  %9902 = vmatmul.mubr.msk.f32.gmra.mxu1 %vm277_vm1, %v12152_v17  ;;  %v12534_v17 = vld [vmem:[#allocation3 + $0x82] sm:$0xff] }
 0x305   : > { %9852 = vmatprep.mubr.msk.f32.mxu0 %vm277_vm1, %v12516_v26  ;;  %9904 = vmatprep.mubr.msk.f32.mxu1 %vm277_vm1, %v12181_v49  ;;  %v12540_v49 = vld [vmem:[#allocation3 + $0x92] sm:$0xff] }
 0x308   : > { %9853 = vmatmul.mubr.msk.f32.gmra.mxu0 %vm277_vm1, %v12522_v18  ;;  %9905 = vmatmul.mubr.msk.f32.gmra.mxu1 %vm277_vm1, %v12185_v13  ;;  %v12546_v13 = vld [vmem:[#allocation3 + $0x9a] sm:$0xff] }
 0x309   : > { %9855 = vmatprep.mubr.msk.f32.mxu0 %vm277_vm1, %v12528_v25  ;;  %9907 = vmatprep.mubr.msk.f32.mxu1 %vm277_vm1, %v12214_v34  ;;  %v12552_v34 = vld [vmem:[#allocation3 + $0xaa] sm:$0xff] }
 0x30c   : > { %9856 = vmatmul.mubr.msk.f32.gmra.mxu0 %vm277_vm1, %v12534_v17  ;;  %9908 = vmatmul.mubr.msk.f32.gmra.mxu1 %vm277_vm1, %v12218_v15  ;;  %v12558_v15 = vld [vmem:[#allocation3 + $0xb2] sm:$0xff] }
 0x30d   : > { %9858 = vmatprep.mubr.msk.f32.mxu0 %vm277_vm1, %v12540_v49  ;;  %9910 = vmatprep.mubr.msk.f32.mxu1 %vm277_vm1, %v12247_v30  ;;  %v12564_v30 = vld [vmem:[#allocation3 + $0xc2] sm:$0xff] }
 0x310   : > { %9859 = vmatmul.mubr.msk.f32.gmra.mxu0 %vm277_vm1, %v12546_v13  ;;  %9911 = vmatmul.mubr.msk.f32.gmra.mxu1 %vm277_vm1, %v12251_v1  ;;  %v12570_v1 = vld [vmem:[#allocation3 + $0xca] sm:$0xff] }
 0x311   : > { %9861 = vmatprep.mubr.msk.f32.mxu0 %vm277_vm1, %v12552_v34  ;;  %9913 = vmatprep.mubr.msk.f32.mxu1 %vm277_vm1, %v12278_v24  ;;  %v12576_v24 = vld [vmem:[#allocation3 + $0xda] sm:$0xff] }
 0x314   : > { %9862 = vmatmul.mubr.msk.f32.gmra.mxu0 %vm277_vm1, %v12558_v15  ;;  %9914 = vmatmul.mubr.msk.f32.gmra.mxu1 %vm277_vm1, %v12282_v29  ;;  %v12582_v29 = vld [vmem:[#allocation3 + $0xe2] sm:$0xff] }
 0x315   : > { %9864 = vmatprep.mubr.msk.f32.mxu0 %vm277_vm1, %v12564_v30  ;;  %9916 = vmatprep.mubr.msk.f32.mxu1 %vm277_vm1, %v12306_v14  ;;  %v12588_v14 = vld [vmem:[#allocation3 + $0xf2] sm:$0xff] }
 0x318   : > { %9865 = vmatmul.mubr.msk.f32.gmra.mxu0 %vm277_vm1, %v12570_v1  ;;  %9917 = vmatmul.mubr.msk.f32.gmra.mxu1 %vm277_vm1, %v12310_v19  ;;  %v12594_v19 = vld [vmem:[#allocation3 + $0xfa] sm:$0xff] }
 0x319   : > { %9867 = vmatprep.mubr.msk.f32.mxu0 %vm277_vm1, %v12576_v24  ;;  %9919 = vmatprep.mubr.msk.f32.mxu1 %vm277_vm1, %v12333_v21  ;;  %v12600_v21 = vld [vmem:[#allocation3 + $0x10a] sm:$0xff] }
 0x31c   : > { %9868 = vmatmul.mubr.msk.f32.gmra.mxu0 %vm277_vm1, %v12582_v29  ;;  %9920 = vmatmul.mubr.msk.f32.gmra.mxu1 %vm277_vm1, %v12337_v40  ;;  %v12606_v40 = vld [vmem:[#allocation3 + $0x112] sm:$0xff] }
 0x31d   : > { %9870 = vmatprep.mubr.msk.f32.mxu0 %vm277_vm1, %v12588_v14  ;;  %9922 = vmatprep.mubr.msk.f32.mxu1 %vm277_vm1, %v12357_v53  ;;  %v12612_v53 = vld [vmem:[#allocation3 + $0x122] sm:$0xff] }
 0x320   : > { %9871 = vmatmul.mubr.msk.f32.gmra.mxu0 %vm277_vm1, %v12594_v19  ;;  %9923 = vmatmul.mubr.msk.f32.gmra.mxu1 %vm277_vm1, %v12361_v58  ;;  %v12618_v58 = vld [vmem:[#allocation3 + $0x12a] sm:$0xff] }
 0x321   : > { %9873 = vmatprep.mubr.msk.f32.mxu0 %vm277_vm1, %v12600_v21  ;;  %9925 = vmatprep.mubr.msk.f32.mxu1 %vm277_vm1, %v12377_v12  ;;  %v12624_v12 = vld [vmem:[#allocation3 + $0x13a] sm:$0xff] }
 0x324   : > { %9874 = vmatmul.mubr.msk.f32.gmra.mxu0 %vm277_vm1, %v12606_v40  ;;  %9926 = vmatmul.mubr.msk.f32.gmra.mxu1 %vm277_vm1, %v12381_v23  ;;  %v12630_v23 = vld [vmem:[#allocation3 + $0x142] sm:$0xff] }
 0x325   : > { %9876 = vmatprep.mubr.msk.f32.mxu0 %vm277_vm1, %v12612_v53  ;;  %9928 = vmatprep.mubr.msk.f32.mxu1 %vm277_vm1, %v12395_v46  ;;  %v12636_v46 = vld [vmem:[#allocation3 + $0x152] sm:$0xff] }
 0x328   : > { %9877 = vmatmul.mubr.msk.f32.gmra.mxu0 %vm277_vm1, %v12618_v58  ;;  %9929 = vmatmul.mubr.msk.f32.gmra.mxu1 %vm277_vm1, %v12399_v4  ;;  %v12642_v4 = vld [vmem:[#allocation3 + $0x15a] sm:$0xff] }
 0x329   : > { %9879 = vmatprep.mubr.msk.f32.mxu0 %vm277_vm1, %v12624_v12  ;;  %9931 = vmatprep.mubr.msk.f32.mxu1 %vm277_vm1, %v12413_v39  ;;  %v12648_v39 = vld [vmem:[#allocation3 + $0x16a] sm:$0xff] }
 0x32c   : > { %9880 = vmatmul.mubr.msk.f32.gmra.mxu0 %vm277_vm1, %v12630_v23  ;;  %9932 = vmatmul.mubr.msk.f32.gmra.mxu1 %vm277_vm1, %v12417_v44  ;;  %v12656_v44 = vld [vmem:[#allocation3 + $0x172] sm:$0xff] }
 0x32d   : > { %9882 = vmatprep.mubr.msk.f32.mxu0 %vm277_vm1, %v12636_v46  ;;  %9934 = vmatprep.mubr.msk.f32.mxu1 %vm277_vm1, %v12430_v50  ;;  %v12658_v50 = vld [vmem:[#allocation3 + $0x188] sm:$0xff] }
 0x330   : > { %9883 = vmatmul.mubr.msk.f32.gmra.mxu0 %vm277_vm1, %v12642_v4  ;;  %9935 = vmatmul.mubr.msk.f32.gmra.mxu1 %vm277_vm1, %v12434_v20  ;;  %v8460_v20 = vld [vmem:[%s13656_s5 + $0x60] sm:$0xff] }
 0x331   : > { %9885 = vmatprep.mubr.msk.f32.mxu0 %vm277_vm1, %v12648_v39  ;;  %9937 = vmatprep.mubr.msk.f32.mxu1 %vm277_vm1, %v12650_v55 }
 0x334   : > { %9886 = vmatmul.mubr.msk.f32.gmra.mxu0 %vm277_vm1, %v12656_v44  ;;  %9938 = vmatmul.mubr.msk.f32.gmra.mxu1 %vm277_vm1, %v12658_v50 }
 0x335   : > { %9944 = vmatprep.mubr.msk.f32.mxu0 %vm277_vm1, %v12050_v38  ;;  %9996 = vmatprep.mubr.msk.f32.mxu1 %vm277_vm1, %v12455_v35  ;;  %v8494_v38 = vld [vmem:[%s13656_s5 + $0x70] sm:$0xff]  ;;  %v13939_v35 = vld [vmem:[#allocation8_spill] sm:$0xff] }
 0x338   : > { %9945 = vmatmul.mubr.msk.f32.vlgmr.msra.gmra.mxu0 %vm277_vm1, %v12061_v3  ;;  %9997 = vmatmul.mubr.msk.f32.vlgmr.msra.gmra.mxu1 %vm277_vm1, %v12467_v0  ;;  %v12687_v3 = vld [vmem:[%s13656_s5 + $0x88] sm:$0xff]  ;;  %v13940_v0 = vld [vmem:[#allocation45_spill] sm:$0xff] }
 0x339   : > { %10045 = vmatpush3.msra.mxu0 %v12476_v2  ;;  %9947 = vmatprep.mubr.msk.f32.mxu0 %vm277_vm1, %v12083_v6  ;;  %v13941_v2 = vld [vmem:[#allocation85_spill] sm:$0xff] }
 0x33a   : > { %9999 = vmatprep.mubr.msk.f32.mxu1 %vm277_vm1, %v12482_v8  ;;  %10046 = vmatprep.subr.mxu0 %v8460_v20 }
 0x33b   : > { %10047 = vmatpush3.msra.mxu0 %v8460_v20  ;;  %10097 = vmatpush3.msra.mxu1 %v12495_v60  ;;  %v13950_v20 = vld [vmem:[#allocation92_spill] sm:$0xff] }
 0x33c   : > { %9948 = vmatmul.mubr.msk.f32.gmra.mxu0 %vm277_vm1, %v12094_v42  ;;  %10000 = vmatmul.mubr.msk.f32.gmra.mxu1 %vm277_vm1, %v12490_v37  ;;  %v13949_v37 = vld [vmem:[#allocation42_spill] sm:$0xff] }
 0x33d   : > { %9950 = vmatprep.mubr.msk.f32.mxu0 %vm277_vm1, %v12117_v31  ;;  %10002 = vmatprep.mubr.msk.f32.mxu1 %vm277_vm1, %v12503_v16 }
 0x33e   : > { %10098 = vmatprep.subr.mxu1 %v8494_v38  ;;  %10148 = vmatprep.subr.mxu0 %v12687_v3 }
 0x33f   : > { %10099 = vmatpush3.msra.mxu1 %v8494_v38 }
 0x340   : > { %9951 = vmatmul.mubr.msk.f32.gmra.mxu0 %vm277_vm1, %v12128_v22  ;;  %10003 = vmatmul.mubr.msk.f32.gmra.mxu1 %vm277_vm1, %v12510_v43 }
 0x341   : > { %9953 = vmatprep.mubr.msk.f32.mxu0 %vm277_vm1, %v12150_v36  ;;  %10005 = vmatprep.mubr.msk.f32.mxu1 %vm277_vm1, %v12516_v26 }
 0x344   : > { %9954 = vmatmul.mubr.msk.f32.gmra.mxu0 %vm277_vm1, %v12161_v47  ;;  %10006 = vmatmul.mubr.msk.f32.gmra.mxu1 %vm277_vm1, %v12522_v18 }
 0x345   : > { %9956 = vmatprep.mubr.msk.f32.mxu0 %vm277_vm1, %v12183_v61  ;;  %10008 = vmatprep.mubr.msk.f32.mxu1 %vm277_vm1, %v12528_v25  ;;  %v13942_v25 = vld [vmem:[#allocation44_spill] sm:$0xff] }
 0x348   : > { %9957 = vmatmul.mubr.msk.f32.gmra.mxu0 %vm277_vm1, %v13939_v35  ;;  %10009 = vmatmul.mubr.msk.f32.gmra.mxu1 %vm277_vm1, %v12534_v17  ;;  %v13943_v17 = vld [vmem:[#allocation49_spill] sm:$0xff] }
 0x349   : > { %9959 = vmatprep.mubr.msk.f32.mxu0 %vm277_vm1, %v13940_v0  ;;  %10011 = vmatprep.mubr.msk.f32.mxu1 %vm277_vm1, %v12540_v49  ;;  %v12798_v49 = vld [vmem:[#allocation3 + $0x181] sm:$0xff] }
 0x34c   : > { %9960 = vmatmul.mubr.msk.f32.gmra.mxu0 %vm277_vm1, %v13941_v2  ;;  %10012 = vmatmul.mubr.msk.f32.gmra.mxu1 %vm277_vm1, %v12546_v13  ;;  %v12800_v13 = vld [vmem:[#allocation3 + $0x182] sm:$0xff] }
 0x34d   : > { %9962 = vmatprep.mubr.msk.f32.mxu0 %vm277_vm1, %v12249_v63  ;;  %10014 = vmatprep.mubr.msk.f32.mxu1 %vm277_vm1, %v12552_v34  ;;  %v12808_v34 = vld [vmem:[#allocation3 + $0x18a] sm:$0xff] }
 0x350   : > { %9963 = vmatmul.mubr.msk.f32.gmra.mxu0 %vm277_vm1, %v13942_v25  ;;  %10015 = vmatmul.mubr.msk.f32.gmra.mxu1 %vm277_vm1, %v12558_v15  ;;  %v8528_v15 = vld [vmem:[%s13656_s5 + $0x80] sm:$0xff] }
 0x351   : > { %9965 = vmatprep.mubr.msk.f32.mxu0 %vm277_vm1, %v12280_v45  ;;  %10017 = vmatprep.mubr.msk.f32.mxu1 %vm277_vm1, %v12564_v30  ;;  %v12806_v30 = vld [vmem:[#allocation3 + $0x189] sm:$0xff] }
 0x354   : > { %9966 = vmatmul.mubr.msk.f32.gmra.mxu0 %vm277_vm1, %v12291_v10  ;;  %10018 = vmatmul.mubr.msk.f32.gmra.mxu1 %vm277_vm1, %v12570_v1  ;;  %v13944_v1 = vld [vmem:[#allocation21_spill] sm:$0xff] }
 0x355   : > { %9968 = vmatprep.mubr.msk.f32.mxu0 %vm277_vm1, %v12308_v54  ;;  %10020 = vmatprep.mubr.msk.f32.mxu1 %vm277_vm1, %v12576_v24 }
 0x358   : > { %9969 = vmatmul.mubr.msk.f32.gmra.mxu0 %vm277_vm1, %v12319_v57  ;;  %10021 = vmatmul.mubr.msk.f32.gmra.mxu1 %vm277_vm1, %v12582_v29  ;;  %v12825_v29 = vpop.f32.mrf.mxu1 }
 0x359   : > { %9971 = vmatprep.mubr.msk.f32.mxu0 %vm277_vm1, %v12335_v32  ;;  %10023 = vmatprep.mubr.msk.f32.mxu1 %vm277_vm1, %v12588_v14  ;;  %v13945_v14 = vld [vmem:[#allocation41_spill] sm:$0xff] }
 0x35c   : > { %9972 = vmatmul.mubr.msk.f32.gmra.mxu0 %vm277_vm1, %v13943_v17  ;;  %10024 = vmatmul.mubr.msk.f32.gmra.mxu1 %vm277_vm1, %v12594_v19 }
 0x35d   : > { %9974 = vmatprep.mubr.msk.f32.mxu0 %vm277_vm1, %v12359_v41  ;;  %10026 = vmatprep.mubr.msk.f32.mxu1 %vm277_vm1, %v12600_v21 }
 0x360   : > { %9975 = vmatmul.mubr.msk.f32.gmra.mxu0 %vm277_vm1, %v12369_v7  ;;  %10027 = vmatmul.mubr.msk.f32.gmra.mxu1 %vm277_vm1, %v12606_v40 }
 0x361   : > { %9977 = vmatprep.mubr.msk.f32.mxu0 %vm277_vm1, %v12379_v52  ;;  %10029 = vmatprep.mubr.msk.f32.mxu1 %vm277_vm1, %v12612_v53 }
 0x364   : > { %9978 = vmatmul.mubr.msk.f32.gmra.mxu0 %vm277_vm1, %v12388_v11  ;;  %10030 = vmatmul.mubr.msk.f32.gmra.mxu1 %vm277_vm1, %v12618_v58 }
 0x365   : > { %9980 = vmatprep.mubr.msk.f32.mxu0 %vm277_vm1, %v12397_v62  ;;  %10032 = vmatprep.mubr.msk.f32.mxu1 %vm277_vm1, %v12624_v12  ;;  %v13947_v12 = vld [vmem:[#allocation89_spill] sm:$0xff] }
 0x368   : > { %9981 = vmatmul.mubr.msk.f32.gmra.mxu0 %vm277_vm1, %v12406_v59  ;;  %10033 = vmatmul.mubr.msk.f32.gmra.mxu1 %vm277_vm1, %v12630_v23 }
 0x369   : > { %9983 = vmatprep.mubr.msk.f32.mxu0 %vm277_vm1, %v12415_v5  ;;  %10035 = vmatprep.mubr.msk.f32.mxu1 %vm277_vm1, %v12636_v46 }
 0x36c   : > { %9984 = vmatmul.mubr.msk.f32.gmra.mxu0 %vm277_vm1, %v12424_v51  ;;  %10036 = vmatmul.mubr.msk.f32.gmra.mxu1 %vm277_vm1, %v12642_v4 }
 0x36d   : > { %9986 = vmatprep.mubr.msk.f32.mxu0 %vm277_vm1, %v12432_v48  ;;  %10038 = vmatprep.mubr.msk.f32.mxu1 %vm277_vm1, %v12648_v39 }
 0x370   : > { %9987 = vmatmul.mubr.msk.f32.gmra.mxu0 %vm277_vm1, %v12440_v56  ;;  %10039 = vmatmul.mubr.msk.f32.gmra.mxu1 %vm277_vm1, %v12656_v44  ;;  %v13948_v56 = vld [vmem:[#allocation84_spill] sm:$0xff] }
 0x371   : > { %9989 = vmatprep.mubr.msk.f32.mxu0 %vm277_vm1, %v12798_v49  ;;  %10041 = vmatprep.mubr.msk.f32.mxu1 %vm277_vm1, %v12800_v13 }
 0x374   : > { %9990 = vmatmul.mubr.msk.f32.gmra.mxu0 %vm277_vm1, %v12806_v30  ;;  %10042 = vmatmul.mubr.msk.f32.gmra.mxu1 %vm277_vm1, %v12808_v34 }
 0x375   : > { %10048 = vmatprep.mubr.msk.f32.mxu0 %vm277_vm1, %v12081_v33  ;;  %10100 = vmatprep.mubr.msk.f32.mxu1 %vm277_vm1, %v12083_v6  ;;  %v12830_v33 = vpop.f32.mrf.mxu0 }
 0x378   : > { %10049 = vmatmul.mubr.msk.f32.vlgmr.msra.gmra.mxu0 %vm277_vm1, %v13944_v1  ;;  %10101 = vmatmul.mubr.msk.f32.vlgmr.msra.gmra.mxu1 %vm277_vm1, %v12094_v42  ;;  %v9741_v6 = vpop.f32.mrf.mxu0 }
 0x379   : > { %10149 = vmatpush3.msra.mxu0 %v12687_v3  ;;  %10051 = vmatprep.mubr.msk.f32.mxu0 %vm277_vm1, %v12115_v28  ;;  %v9793_v24 = vpop.f32.mrf.mxu1  ;;  %v4538_v42 = vadd.f32 %v9741_v6, %v12465_v9 }
 0x37a   : > { %10103 = vmatprep.mubr.msk.f32.mxu1 %vm277_vm1, %v12117_v31  ;;  %10150 = vmatprep.subr.mxu0 %v8528_v15  ;;  %v4532_v28 = vpop.f32.mrf.mxu0 }
 0x37b   : > { %10151 = vmatpush3.msra.mxu0 %v8528_v15  ;;  %v4887_v31 = vpop.f32.mrf.mxu1  ;;  %v12843_v19 = vadd.f32 %v9793_v24, %v4538_v42  ;;  %v4533_v21 = vadd.f32 %v12465_v9, %v4532_v28 }
 0x37c   : > { %10052 = vmatmul.mubr.msk.f32.gmra.mxu0 %vm277_vm1, %v12119_v27  ;;  %10104 = vmatmul.mubr.msk.f32.gmra.mxu1 %vm277_vm1, %v12128_v22  ;;  %v9744_v40 = vpop.f32.mrf.mxu0  ;;  %v13946_v27 = vld [vmem:[#allocation40_spill] sm:$0xff] }
 0x37d   : > { %10054 = vmatprep.mubr.msk.f32.mxu0 %vm277_vm1, %v13945_v14  ;;  %10106 = vmatprep.mubr.msk.f32.mxu1 %vm277_vm1, %v12150_v36  ;;  %v9796_v53 = vpop.f32.mrf.mxu1  ;;  %v12850_v22 = vadd.f32 %v4887_v31, %v4533_v21  ;;  %v4548_v58 = vadd.f32 %v9744_v40, %v12465_v9  ;;  %v13952_v14 = vld [vmem:[#allocation22_spill] sm:$0xff]  ;;  %v13953_v31 = vld [vmem:[#allocation43_spill] sm:$0xff] }
 0x37e   : > { %v4542_v36 = vpop.f32.mrf.mxu0 }
 0x37f   : > { %v4897_v23 = vpop.f32.mrf.mxu1  ;;  %v12857_v46 = vadd.f32 %v9796_v53, %v4548_v58  ;;  %v4543_v4 = vadd.f32 %v12465_v9, %v4542_v36 }
 0x380   : > { %10055 = vmatmul.mubr.msk.f32.gmra.mxu0 %vm277_vm1, %v13946_v27  ;;  %10107 = vmatmul.mubr.msk.f32.gmra.mxu1 %vm277_vm1, %v12161_v47  ;;  %v9747_v39 = vpop.f32.mrf.mxu0 }
 0x381   : > { %10057 = vmatprep.mubr.msk.f32.mxu0 %vm277_vm1, %v13947_v12  ;;  %10109 = vmatprep.mubr.msk.f32.mxu1 %vm277_vm1, %v12183_v61  ;;  %v9799_v44 = vpop.f32.mrf.mxu1  ;;  %v12864_v47 = vadd.f32 %v4897_v23, %v4543_v4  ;;  %v4558_v8 = vadd.f32 %v9747_v39, %v12465_v9  ;;  %v13954_v12 = vld [vmem:[#allocation95_spill] sm:$0xff]  ;;  %v13955_v23 = vld [vmem:[#allocation86_spill] sm:$0xff] }
 0x382   : > { %v4552_v61 = vpop.f32.mrf.mxu0 }
 0x383   : > { %v4907_v60 = vpop.f32.mrf.mxu1  ;;  %v12871_v16 = vadd.f32 %v9799_v44, %v4558_v8  ;;  %v4553_v43 = vadd.f32 %v12465_v9, %v4552_v61 }
 0x384   : > { %10058 = vmatmul.mubr.msk.f32.gmra.mxu0 %vm277_vm1, %v13948_v56  ;;  %10110 = vmatmul.mubr.msk.f32.gmra.mxu1 %vm277_vm1, %v13939_v35  ;;  %v9750_v26 = vpop.f32.mrf.mxu0  ;;  %v13951_v35 = vld [vmem:[#allocation23_spill] sm:$0xff] }
 0x385   : > { %10060 = vmatprep.mubr.msk.f32.mxu0 %vm277_vm1, %v13949_v37  ;;  %10112 = vmatprep.mubr.msk.f32.mxu1 %vm277_vm1, %v13940_v0  ;;  %v9802_v18 = vpop.f32.mrf.mxu1  ;;  %v12878_v38 = vadd.f32 %v4907_v60, %v4553_v43  ;;  %v4568_v3 = vadd.f32 %v9750_v26, %v12465_v9  ;;  %v13956_v37 = vld [vmem:[#allocation7_spill] sm:$0xff]  ;;  %v13957_v60 = vld [vmem:[#allocation10_spill] sm:$0xff] }
 0x386   : > { %v4562_v0 = vpop.f32.mrf.mxu0 }
 0x387   : > { %v4917_v15 = vpop.f32.mrf.mxu1  ;;  %v12885_v1 = vadd.f32 %v9802_v18, %v4568_v3  ;;  %v4563_v6 = vadd.f32 %v12465_v9, %v4562_v0 }
 0x388   : > { %10061 = vmatmul.mubr.msk.f32.gmra.mxu0 %vm277_vm1, %v13950_v20  ;;  %10113 = vmatmul.mubr.msk.f32.gmra.mxu1 %vm277_vm1, %v13941_v2 }
 0x389   : > { %10063 = vmatprep.mubr.msk.f32.mxu0 %vm277_vm1, %v13951_v35  ;;  %10115 = vmatprep.mubr.msk.f32.mxu1 %vm277_vm1, %v12249_v63  ;;  %v9753_v24 = vpop.f32.mrf.mxu0  ;;  %v9805_v42 = vpop.f32.mrf.mxu1  ;;  %v12892_v2 = vadd.f32 %v4917_v15, %v4563_v6  ;;  %v13958_v35 = vld [vmem:[#allocation46_spill] sm:$0xff] }
 0x38a   : > { %v4578_v28 = vadd.f32 %v9753_v24, %v12465_v9  ;;  %v13959_v15 = vld [vmem:[#allocation98_spill] sm:$0xff] }
 0x38b   : > { %v4572_v63 = vpop.f32.mrf.mxu0  ;;  %v4927_v21 = vpop.f32.mrf.mxu1 }
 0x38c   : > { %10064 = vmatmul.mubr.msk.f32.gmra.mxu0 %vm277_vm1, %v13952_v14  ;;  %10116 = vmatmul.mubr.msk.f32.gmra.mxu1 %vm277_vm1, %v13942_v25  ;;  %v12899_v40 = vadd.f32 %v9805_v42, %v4578_v28  ;;  %v4573_v53 = vadd.f32 %v12465_v9, %v4572_v63 }
 0x38d   : > { %10066 = vmatprep.mubr.msk.f32.mxu0 %vm277_vm1, %v13953_v31  ;;  %10118 = vmatprep.mubr.msk.f32.mxu1 %vm277_vm1, %v12280_v45  ;;  %v9756_v27 = vpop.f32.mrf.mxu0  ;;  %v13960_v31 = vld [vmem:[#allocation87_spill] sm:$0xff] }
 0x38e   : > { %v9808_v58 = vpop.f32.mrf.mxu1  ;;  %v12906_v25 = vadd.f32 %v4927_v21, %v4573_v53  ;;  %v4588_v36 = vadd.f32 %v9756_v27, %v12465_v9  ;;  %v13961_v21 = vld [vmem:[#allocation25_spill] sm:$0xff] }
 0x38f   : > { %v4582_v45 = vpop.f32.mrf.mxu0 }
 0x390   : > { %10067 = vmatmul.mubr.msk.f32.gmra.mxu0 %vm277_vm1, %v13954_v12  ;;  %10119 = vmatmul.mubr.msk.f32.gmra.mxu1 %vm277_vm1, %v12291_v10  ;;  %v4937_v4 = vpop.f32.mrf.mxu1  ;;  %v12913_v39 = vadd.f32 %v9808_v58, %v4588_v36  ;;  %v4583_v44 = vadd.f32 %v12465_v9, %v4582_v45 }
 0x391   : > { %10069 = vmatprep.mubr.msk.f32.mxu0 %vm277_vm1, %v13955_v23  ;;  %10121 = vmatprep.mubr.msk.f32.mxu1 %vm277_vm1, %v12308_v54  ;;  %v13962_v23 = vld [vmem:[#allocation24_spill] sm:$0xff] }
 0x392   : > { %v9759_v56 = vpop.f32.mrf.mxu0  ;;  %v12920_v10 = vadd.f32 %v4937_v4, %v4583_v44  ;;  %v13963_v4 = vld [vmem:[#allocation26_spill] sm:$0xff] }
 0x393   : > { %v9811_v8 = vpop.f32.mrf.mxu1  ;;  %v4598_v61 = vadd.f32 %v9759_v56, %v12465_v9 }
 0x394   : > { %10070 = vmatmul.mubr.msk.f32.gmra.mxu0 %vm277_vm1, %v13956_v37  ;;  %10122 = vmatmul.mubr.msk.f32.gmra.mxu1 %vm277_vm1, %v12319_v57  ;;  %v4592_v54 = vpop.f32.mrf.mxu0 }
 0x395   : > { %10072 = vmatprep.mubr.msk.f32.mxu0 %vm277_vm1, %v13957_v60  ;;  %10124 = vmatprep.mubr.msk.f32.mxu1 %vm277_vm1, %v12335_v32  ;;  %v4947_v43 = vpop.f32.mrf.mxu1  ;;  %v12927_v26 = vadd.f32 %v9811_v8, %v4598_v61  ;;  %v4593_v18 = vadd.f32 %v12465_v9, %v4592_v54  ;;  %v13964_v60 = vld [vmem:[#allocation48_spill] sm:$0xff] }
 0x397   : > { %v9762_v20 = vpop.f32.mrf.mxu0  ;;  %v12934_v57 = vadd.f32 %v4947_v43, %v4593_v18  ;;  %v13965_v43 = vld [vmem:[#allocation47_spill] sm:$0xff] }
 0x398   : > { %v9814_v3 = vpop.f32.mrf.mxu1  ;;  %10073 = vmatmul.mubr.msk.f32.gmra.mxu0 %vm277_vm1, %v13958_v35  ;;  %10125 = vmatmul.mubr.msk.f32.gmra.mxu1 %vm277_vm1, %v13943_v17  ;;  %v4608_v0 = vadd.f32 %v9762_v20, %v12465_v9 }
 0x399   : > { %10075 = vmatprep.mubr.msk.f32.mxu0 %vm277_vm1, %v13959_v15  ;;  %10127 = vmatprep.mubr.msk.f32.mxu1 %vm277_vm1, %v12359_v41  ;;  %v4602_v32 = vpop.f32.mrf.mxu0  ;;  %v13966_v15 = vld [vmem:[#allocation101_spill] sm:$0xff] }
 0x39a   : > { %v4957_v6 = vpop.f32.mrf.mxu1  ;;  %v12941_v24 = vadd.f32 %v9814_v3, %v4608_v0  ;;  %v4603_v42 = vadd.f32 %v12465_v9, %v4602_v32 }
 0x39b   : > { %v9765_v14 = vpop.f32.mrf.mxu0 }
 0x39c   : > { %v9817_v28 = vpop.f32.mrf.mxu1  ;;  %10076 = vmatmul.mubr.msk.f32.gmra.mxu0 %vm277_vm1, %v13960_v31  ;;  %10128 = vmatmul.mubr.msk.f32.gmra.mxu1 %vm277_vm1, %v12369_v7  ;;  %v12948_v17 = vadd.f32 %v4957_v6, %v4603_v42  ;;  %v4618_v63 = vadd.f32 %v9765_v14, %v12465_v9  ;;  %v13967_v6 = vld [vmem:[#allocation88_spill] sm:$0xff]  ;;  %v6645_v31 = vld [vmem:[#allocation3 + $0x170] sm:$0xff] }
 0x39d   : > { %10078 = vmatprep.mubr.msk.f32.mxu0 %vm277_vm1, %v13961_v21  ;;  %10130 = vmatprep.mubr.msk.f32.mxu1 %vm277_vm1, %v12379_v52  ;;  %v4612_v41 = vpop.f32.mrf.mxu0 }
 0x39e   : > { %v4967_v53 = vpop.f32.mrf.mxu1  ;;  %v12955_v27 = vadd.f32 %v9817_v28, %v4618_v63  ;;  %v4613_v58 = vadd.f32 %v12465_v9, %v4612_v41  ;;  %v7033_v63 = vld [vmem:[#allocation3 + $0x171] sm:$0xff] }
 0x39f   : > { %v9768_v12 = vpop.f32.mrf.mxu0 }
 0x3a0   : > { %v9820_v36 = vpop.f32.mrf.mxu1  ;;  %10079 = vmatmul.mubr.msk.f32.gmra.mxu0 %vm277_vm1, %v13962_v23  ;;  %10131 = vmatmul.mubr.msk.f32.gmra.mxu1 %vm277_vm1, %v12388_v11  ;;  %v12962_v7 = vadd.f32 %v4967_v53, %v4613_v58  ;;  %v4628_v45 = vadd.f32 %v9768_v12, %v12465_v9  ;;  %v6648_v12 = vld [vmem:[#allocation3 + $0x198] sm:$0xff] }
 0x3a1   : > { %10081 = vmatprep.mubr.msk.f32.mxu0 %vm277_vm1, %v13963_v4  ;;  %10133 = vmatprep.mubr.msk.f32.mxu1 %vm277_vm1, %v12397_v62  ;;  %v4622_v52 = vpop.f32.mrf.mxu0 }
 0x3a2   : > { %v4977_v44 = vpop.f32.mrf.mxu1  ;;  %v12969_v56 = vadd.f32 %v9820_v36, %v4628_v45  ;;  %v4623_v8 = vadd.f32 %v12465_v9, %v4622_v52  ;;  %v7036_v36 = vld [vmem:[#allocation3 + $0x199] sm:$0xff] }
 0x3a3   : > { %v9771_v37 = vpop.f32.mrf.mxu0 }
 0x3a4   : > { %v9823_v61 = vpop.f32.mrf.mxu1  ;;  %10082 = vmatmul.mubr.msk.f32.gmra.mxu0 %vm277_vm1, %v13964_v60  ;;  %10134 = vmatmul.mubr.msk.f32.gmra.mxu1 %vm277_vm1, %v12406_v59  ;;  %v12976_v11 = vadd.f32 %v4977_v44, %v4623_v8  ;;  %v4638_v54 = vadd.f32 %v9771_v37, %v12465_v9  ;;  %v6649_v44 = vld [vmem:[#allocation3 + $0x1a0] sm:$0xff] }
 0x3a5   : > { %10084 = vmatprep.mubr.msk.f32.mxu0 %vm277_vm1, %v13965_v43  ;;  %10136 = vmatprep.mubr.msk.f32.mxu1 %vm277_vm1, %v12415_v5  ;;  %v4632_v62 = vpop.f32.mrf.mxu0  ;;  %v7037_v8 = vld [vmem:[#allocation3 + $0x1a1] sm:$0xff] }
 0x3a6   : > { %v4987_v18 = vpop.f32.mrf.mxu1  ;;  %v12983_v20 = vadd.f32 %v9823_v61, %v4638_v54  ;;  %v4633_v3 = vadd.f32 %v12465_v9, %v4632_v62  ;;  %v4523_v62 = vadd.f32 %v12465_v9, %v12830_v33 }
 0x3a7   : > { %v9774_v35 = vpop.f32.mrf.mxu0 }
 0x3a8   : > { %v9826_v0 = vpop.f32.mrf.mxu1  ;;  %10085 = vmatmul.mubr.msk.f32.gmra.mxu0 %vm277_vm1, %v13966_v15  ;;  %10137 = vmatmul.mubr.msk.f32.gmra.mxu1 %vm277_vm1, %v12424_v51  ;;  %v12990_v59 = vadd.f32 %v4987_v18, %v4633_v3  ;;  %v4648_v32 = vadd.f32 %v9774_v35, %v12465_v9  ;;  %v5036_v33 = vadd.f32 %v12825_v29, %v4523_v62 }
 0x3a9   : > { %10087 = vmatprep.mubr.msk.f32.mxu0 %vm277_vm1, %v13967_v6  ;;  %10139 = vmatprep.mubr.msk.f32.mxu1 %vm277_vm1, %v12432_v48  ;;  %v4642_v5 = vpop.f32.mrf.mxu0  ;;  %v7394_v6 = vld [vmem:[#allocation3 + $0x3a] sm:$0xff] }
 0x3aa   : > { %v4997_v42 = vpop.f32.mrf.mxu1  ;;  %v12997_v14 = vadd.f32 %v9826_v0, %v4648_v32  ;;  %v4643_v28 = vadd.f32 %v12465_v9, %v4642_v5 }
 0x3ab   : > { %v9777_v21 = vpop.f32.mrf.mxu0 }
 0x3ac   : > { %v9829_v51 = vpop.f32.mrf.mxu1  ;;  %10088 = vmatmul.mubr.msk.f32.gmra.mxu0 %vm277_vm1, %v6645_v31  ;;  %10140 = vmatmul.mubr.msk.f32.gmra.mxu1 %vm277_vm1, %v7033_v63  ;;  %v13002_v41 = vadd.f32 %v4997_v42, %v4643_v28  ;;  %v4658_v53 = vadd.f32 %v9777_v21, %v12465_v9  ;;  %v7395_v28 = vld [vmem:[#allocation3 + $0x4a] sm:$0xff]  ;;  %v13968_v63 = vld [vmem:[#allocation9_spill] sm:$0xff] }
 0x3ad   : > { %10090 = vmatprep.mubr.msk.f32.mxu0 %vm277_vm1, %v12650_v55  ;;  %10142 = vmatprep.mubr.msk.f32.mxu1 %vm277_vm1, %v12798_v49  ;;  %v4652_v48 = vpop.f32.mrf.mxu0 }
 0x3ae   : > { %v5007_v58 = vpop.f32.mrf.mxu1  ;;  %v13009_v23 = vadd.f32 %v9829_v51, %v4658_v53  ;;  %v4653_v45 = vadd.f32 %v12465_v9, %v4652_v48 }
 0x3af   : > { %v9780_v4 = vpop.f32.mrf.mxu0 }
 0x3b0   : > { %v9832_v52 = vpop.f32.mrf.mxu1  ;;  %10091 = vmatmul.mubr.msk.f32.gmra.mxu0 %vm277_vm1, %v12658_v50  ;;  %10143 = vmatmul.mubr.msk.f32.gmra.mxu1 %vm277_vm1, %v12806_v30  ;;  %v13016_v55 = vadd.f32 %v5007_v58, %v4653_v45  ;;  %v4668_v49 = vadd.f32 %v9780_v4, %v12465_v9  ;;  %v7393_v30 = vld [vmem:[#allocation3 + $0x32] sm:$0xff]  ;;  %v7397_v45 = vld [vmem:[#allocation3 + $0x62] sm:$0xff] }
 0x3b1   : > { %10093 = vmatprep.mubr.msk.f32.mxu0 %vm277_vm1, %v6648_v12  ;;  %10145 = vmatprep.mubr.msk.f32.mxu1 %vm277_vm1, %v7036_v36  ;;  %v4662_v37 = vpop.f32.mrf.mxu0 }
 0x3b2   : > { %v5017_v61 = vpop.f32.mrf.mxu1  ;;  %v13021_v60 = vadd.f32 %v9832_v52, %v4668_v49  ;;  %v4663_v54 = vadd.f32 %v12465_v9, %v4662_v37  ;;  %v7398_v37 = vld [vmem:[#allocation3 + $0x6a] sm:$0xff] }
 0x3b3   : > { %v9783_v50 = vpop.f32.mrf.mxu0 }
 0x3b4   : > { %v9835_v43 = vpop.f32.mrf.mxu1  ;;  %10094 = vmatmul.mubr.msk.f32.gmra.mxu0 %vm277_vm1, %v6649_v44  ;;  %10146 = vmatmul.mubr.msk.f32.gmra.mxu1 %vm277_vm1, %v7037_v8  ;;  %v13028_v18 = vadd.f32 %v5017_v61, %v4663_v54  ;;  %v4678_v3 = vadd.f32 %v9783_v50, %v12465_v9  ;;  %v7399_v50 = vld [vmem:[#allocation3 + $0x7a] sm:$0xff] }
 0x3b5   : > { %10152 = vmatprep.mubr.msk.f32.mxu0 %vm277_vm1, %v7393_v30  ;;  %v4672_v35 = vpop.f32.mrf.mxu0 }
 0x3b6   : > { %v5027_v0 = vpop.f32.mrf.mxu1  ;;  %v13032_v15 = vadd.f32 %v9835_v43, %v4678_v3  ;;  %v4673_v32 = vadd.f32 %v12465_v9, %v4672_v35  ;;  %v7396_v9 = vld [vmem:[#allocation3 + $0x52] sm:$0xff] }
 0x3b7   : > { %v9842_v5 = vpop.f32.mrf.mxu0 }
 0x3b8   : > { %v9894_v42 = vpop.f32.mrf.mxu1  ;;  %10153 = vmatmul.mubr.msk.f32.vlgmr.msra.gmra.mxu0 %vm277_vm1, %v7394_v6  ;;  %v13037_v31 = vadd.f32 %v5027_v0, %v4673_v32  ;;  %v5424_v21 = vadd.f32 %v9842_v5, %v13968_v63  ;;  %v7400_v0 = vld [vmem:[#allocation3 + $0x82] sm:$0xff]  ;;  %v7401_v6 = vld [vmem:[#allocation3 + $0x92] sm:$0xff] }
 0x3b9   : > { %10155 = vmatprep.mubr.msk.f32.mxu0 %vm277_vm1, %v7395_v28  ;;  %v5264_v51 = vpop.f32.mrf.mxu0 }
 0x3ba   : > { %v5652_v53 = vpop.f32.mrf.mxu1  ;;  %v13041_v48 = vadd.f32 %v9894_v42, %v5424_v21  ;;  %v5423_v58 = vadd.f32 %v5264_v51, %v5036_v33  ;;  %v7402_v21 = vld [vmem:[#allocation3 + $0x9a] sm:$0xff] }
 0x3bc   : > { %v9845_v12 = vpop.f32.mrf.mxu0  ;;  %v9897_v36 = vpop.f32.mrf.mxu1  ;;  %10156 = vmatmul.mubr.msk.f32.gmra.mxu0 %vm277_vm1, %v7396_v9  ;;  %v13044_v4 = vadd.f32 %v5652_v53, %v5423_v58  ;;  %v7403_v53 = vld [vmem:[#allocation3 + $0xaa] sm:$0xff] }
 0x3bd   : > { %v5426_v29 = vadd.f32 %v9845_v12, %v12843_v19  ;;  %10158 = vmatprep.mubr.msk.f32.mxu0 %vm277_vm1, %v7397_v45 }
 0x3be   : > { %v5274_v52 = vpop.f32.mrf.mxu0  ;;  %v5662_v49 = vpop.f32.mrf.mxu1 }
 0x3bf   : > { %v13048_v44 = vadd.f32 %v9897_v36, %v5426_v29  ;;  %v5425_v8 = vadd.f32 %v5274_v52, %v12850_v22  ;;  %v7404_v29 = vld [vmem:[#allocation3 + $0xb2] sm:$0xff] }
 0x3c0   : > { %v9848_v61 = vpop.f32.mrf.mxu0  ;;  %v9900_v54 = vpop.f32.mrf.mxu1  ;;  %10159 = vmatmul.mubr.msk.f32.gmra.mxu0 %vm277_vm1, %v7398_v37 }
 0x3c1   : > { %v13052_v43 = vadd.f32 %v5662_v49, %v5425_v8  ;;  %v5428_v30 = vadd.f32 %v9848_v61, %v12857_v46  ;;  %10161 = vmatprep.mubr.msk.f32.mxu0 %vm277_vm1, %v7399_v50  ;;  %v7405_v49 = vld [vmem:[#allocation3 + $0xc2] sm:$0xff] }
 0x3c2   : > { %v5284_v19 = vpop.f32.mrf.mxu0  ;;  %v5672_v62 = vpop.f32.mrf.mxu1 }
 0x3c3   : > { %v13056_v3 = vadd.f32 %v9900_v54, %v5428_v30  ;;  %v5427_v35 = vadd.f32 %v5284_v19, %v12864_v47  ;;  %v7406_v30 = vld [vmem:[#allocation3 + $0xca] sm:$0xff] }
 0x3c4   : > { %v9851_v22 = vpop.f32.mrf.mxu0  ;;  %v9903_v32 = vpop.f32.mrf.mxu1  ;;  %10162 = vmatmul.mubr.msk.f32.gmra.mxu0 %vm277_vm1, %v7400_v0 }
 0x3c5   : > { %v13060_v5 = vadd.f32 %v5672_v62, %v5427_v35  ;;  %v5430_v42 = vadd.f32 %v9851_v22, %v12871_v16  ;;  %10164 = vmatprep.mubr.msk.f32.mxu0 %vm277_vm1, %v7401_v6  ;;  %v7407_v62 = vld [vmem:[#allocation3 + $0xda] sm:$0xff] }
 0x3c6   : > { %v5294_v46 = vpop.f32.mrf.mxu0  ;;  %v5682_v28 = vpop.f32.mrf.mxu1 }
 0x3c7   : > { %v13064_v33 = vadd.f32 %v9903_v32, %v5430_v42  ;;  %v5429_v63 = vadd.f32 %v5294_v46, %v12878_v38  ;;  %v7408_v42 = vld [vmem:[#allocation3 + $0xe2] sm:$0xff] }
 0x3c8   : > { %v9854_v47 = vpop.f32.mrf.mxu0  ;;  %v9906_v51 = vpop.f32.mrf.mxu1  ;;  %10165 = vmatmul.mubr.msk.f32.gmra.mxu0 %vm277_vm1, %v7402_v21 }
 0x3c9   : > { %v13068_v58 = vadd.f32 %v5682_v28, %v5429_v63  ;;  %v5432_v9 = vadd.f32 %v9854_v47, %v12885_v1  ;;  %10167 = vmatprep.mubr.msk.f32.mxu0 %vm277_vm1, %v7403_v53  ;;  %v7409_v28 = vld [vmem:[#allocation3 + $0xf2] sm:$0xff] }
 0x3ca   : > { %v5304_v16 = vpop.f32.mrf.mxu0  ;;  %v5692_v12 = vpop.f32.mrf.mxu1 }
 0x3cb   : > { %v13072_v36 = vadd.f32 %v9906_v51, %v5432_v9  ;;  %v5431_v45 = vadd.f32 %v5304_v16, %v12892_v2  ;;  %v7410_v9 = vld [vmem:[#allocation3 + $0xfa] sm:$0xff] }
 0x3cc   : > { %v9857_v38 = vpop.f32.mrf.mxu0  ;;  %v9909_v52 = vpop.f32.mrf.mxu1  ;;  %10168 = vmatmul.mubr.msk.f32.gmra.mxu0 %vm277_vm1, %v7404_v29 }
 0x3cd   : > { %v13076_v8 = vadd.f32 %v5692_v12, %v5431_v45  ;;  %v5434_v37 = vadd.f32 %v9857_v38, %v12899_v40  ;;  %10170 = vmatprep.mubr.msk.f32.mxu0 %vm277_vm1, %v7405_v49  ;;  %v7411_v12 = vld [vmem:[#allocation3 + $0x10a] sm:$0xff] }
 0x3ce   : > { %v5314_v1 = vpop.f32.mrf.mxu0  ;;  %v5702_v61 = vpop.f32.mrf.mxu1 }
 0x3cf   : > { %v13080_v54 = vadd.f32 %v9909_v52, %v5434_v37  ;;  %v5433_v50 = vadd.f32 %v5314_v1, %v12906_v25  ;;  %v7412_v37 = vld [vmem:[#allocation3 + $0x112] sm:$0xff] }
 0x3d0   : > { %v9860_v2 = vpop.f32.mrf.mxu0  ;;  %v9912_v19 = vpop.f32.mrf.mxu1  ;;  %10171 = vmatmul.mubr.msk.f32.gmra.mxu0 %vm277_vm1, %v7406_v30 }
 0x3d1   : > { %v13084_v35 = vadd.f32 %v5702_v61, %v5433_v50  ;;  %v5436_v0 = vadd.f32 %v9860_v2, %v12913_v39  ;;  %10173 = vmatprep.mubr.msk.f32.mxu0 %vm277_vm1, %v7407_v62  ;;  %v7413_v61 = vld [vmem:[#allocation3 + $0x122] sm:$0xff] }
 0x3d2   : > { %v5324_v40 = vpop.f32.mrf.mxu0  ;;  %v5712_v22 = vpop.f32.mrf.mxu1 }
 0x3d3   : > { %v13088_v32 = vadd.f32 %v9912_v19, %v5436_v0  ;;  %v5435_v6 = vadd.f32 %v5324_v40, %v12920_v10  ;;  %v7414_v0 = vld [vmem:[#allocation3 + $0x12a] sm:$0xff] }
 0x3d4   : > { %v9863_v25 = vpop.f32.mrf.mxu0  ;;  %v9915_v46 = vpop.f32.mrf.mxu1  ;;  %10174 = vmatmul.mubr.msk.f32.gmra.mxu0 %vm277_vm1, %v7408_v42 }
 0x3d5   : > { %v13092_v63 = vadd.f32 %v5712_v22, %v5435_v6  ;;  %v5438_v21 = vadd.f32 %v9863_v25, %v12927_v26  ;;  %10176 = vmatprep.mubr.msk.f32.mxu0 %vm277_vm1, %v7409_v28  ;;  %v7415_v22 = vld [vmem:[#allocation3 + $0x13a] sm:$0xff] }
 0x3d6   : > { %v5334_v39 = vpop.f32.mrf.mxu0  ;;  %v5722_v47 = vpop.f32.mrf.mxu1 }
 0x3d7   : > { %v13096_v51 = vadd.f32 %v9915_v46, %v5438_v21  ;;  %v5437_v53 = vadd.f32 %v5334_v39, %v12934_v57  ;;  %v7416_v21 = vld [vmem:[#allocation3 + $0x142] sm:$0xff] }
 0x3d8   : > { %v9866_v10 = vpop.f32.mrf.mxu0  ;;  %v9918_v16 = vpop.f32.mrf.mxu1  ;;  %10177 = vmatmul.mubr.msk.f32.gmra.mxu0 %vm277_vm1, %v7410_v9 }
 0x3d9   : > { %v13100_v45 = vadd.f32 %v5722_v47, %v5437_v53  ;;  %v5440_v29 = vadd.f32 %v9866_v10, %v12941_v24  ;;  %10179 = vmatprep.mubr.msk.f32.mxu0 %vm277_vm1, %v7411_v12  ;;  %v7417_v47 = vld [vmem:[#allocation3 + $0x152] sm:$0xff] }
 0x3da   : > { %v5344_v26 = vpop.f32.mrf.mxu0  ;;  %v5732_v38 = vpop.f32.mrf.mxu1 }
 0x3db   : > { %v13104_v52 = vadd.f32 %v9918_v16, %v5440_v29  ;;  %v5439_v49 = vadd.f32 %v5344_v26, %v12948_v17  ;;  %v7418_v29 = vld [vmem:[#allocation3 + $0x15a] sm:$0xff] }
 0x3dc   : > { %v9869_v57 = vpop.f32.mrf.mxu0  ;;  %v9921_v1 = vpop.f32.mrf.mxu1  ;;  %10180 = vmatmul.mubr.msk.f32.gmra.mxu0 %vm277_vm1, %v7412_v37 }
 0x3dd   : > { %v13108_v50 = vadd.f32 %v5732_v38, %v5439_v49  ;;  %v5442_v30 = vadd.f32 %v9869_v57, %v12955_v27  ;;  %10182 = vmatprep.mubr.msk.f32.mxu0 %vm277_vm1, %v7413_v61  ;;  %v7419_v38 = vld [vmem:[#allocation3 + $0x16a] sm:$0xff] }
 0x3de   : > { %v5354_v24 = vpop.f32.mrf.mxu0  ;;  %v5742_v2 = vpop.f32.mrf.mxu1 }
 0x3df   : > { %v13112_v19 = vadd.f32 %v9921_v1, %v5442_v30  ;;  %v5441_v62 = vadd.f32 %v5354_v24, %v12962_v7  ;;  %v7420_v30 = vld [vmem:[#allocation3 + $0x172] sm:$0xff] }
 0x3e0   : > { %v9872_v17 = vpop.f32.mrf.mxu0  ;;  %v9924_v40 = vpop.f32.mrf.mxu1  ;;  %10183 = vmatmul.mubr.msk.f32.gmra.mxu0 %vm277_vm1, %v7414_v0 }
 0x3e1   : > { %v13116_v6 = vadd.f32 %v5742_v2, %v5441_v62  ;;  %v5444_v42 = vadd.f32 %v9872_v17, %v12969_v56  ;;  %10185 = vmatprep.mubr.msk.f32.mxu0 %vm277_vm1, %v7415_v22  ;;  %v7423_v17 = vld [vmem:[#allocation3 + $0x19a] sm:$0xff] }
 0x3e2   : > { %v5364_v27 = vpop.f32.mrf.mxu0  ;;  %v5752_v25 = vpop.f32.mrf.mxu1 }
 0x3e3   : > { %v13120_v46 = vadd.f32 %v9924_v40, %v5444_v42  ;;  %v5443_v28 = vadd.f32 %v5364_v27, %v12976_v11 }
 0x3e4   : > { %v9875_v7 = vpop.f32.mrf.mxu0  ;;  %v9927_v39 = vpop.f32.mrf.mxu1  ;;  %10186 = vmatmul.mubr.msk.f32.gmra.mxu0 %vm277_vm1, %v7416_v21 }
 0x3e5   : > { %v13124_v53 = vadd.f32 %v5752_v25, %v5443_v28  ;;  %v5446_v9 = vadd.f32 %v9875_v7, %v12983_v20  ;;  %10188 = vmatprep.mubr.msk.f32.mxu0 %vm277_vm1, %v7417_v47 }
 0x3e6   : > { %v5374_v56 = vpop.f32.mrf.mxu0  ;;  %v5762_v10 = vpop.f32.mrf.mxu1 }
 0x3e7   : > { %v13128_v16 = vadd.f32 %v9927_v39, %v5446_v9  ;;  %v5445_v12 = vadd.f32 %v5374_v56, %v12990_v59 }
 0x3e8   : > { %v9878_v11 = vpop.f32.mrf.mxu0  ;;  %v9930_v26 = vpop.f32.mrf.mxu1  ;;  %10189 = vmatmul.mubr.msk.f32.gmra.mxu0 %vm277_vm1, %v7418_v29 }
 0x3e9   : > { %v13132_v49 = vadd.f32 %v5762_v10, %v5445_v12  ;;  %v5448_v37 = vadd.f32 %v9878_v11, %v12997_v14  ;;  %10191 = vmatprep.mubr.msk.f32.mxu0 %vm277_vm1, %v7419_v38 }
 0x3ea   : > { %v5384_v20 = vpop.f32.mrf.mxu0  ;;  %v5772_v57 = vpop.f32.mrf.mxu1 }
 0x3eb   : > { %v13136_v1 = vadd.f32 %v9930_v26, %v5448_v37  ;;  %v5447_v61 = vadd.f32 %v5384_v20, %v13002_v41 }
 0x3ec   : > { %v9881_v59 = vpop.f32.mrf.mxu0  ;;  %v9933_v24 = vpop.f32.mrf.mxu1  ;;  %10192 = vmatmul.mubr.msk.f32.gmra.mxu0 %vm277_vm1, %v7420_v30 }
 0x3ed   : > { %v13140_v2 = vadd.f32 %v5772_v57, %v5447_v61  ;;  %v5450_v62 = vadd.f32 %v9881_v59, %v13009_v23  ;;  %10194 = vmatprep.mubr.msk.f32.mxu0 %vm277_vm1, %v12800_v13  ;;  %v7424_v23 = vld [vmem:[#allocation3 + $0x1a2] sm:$0xff] }
 0x3ee   : > { %v5394_v14 = vpop.f32.mrf.mxu0  ;;  %v5782_v0 = vpop.f32.mrf.mxu1 }
 0x3ef   : > { %v13145_v40 = vadd.f32 %v9933_v24, %v5450_v62  ;;  %v5449_v22 = vadd.f32 %v5394_v14, %v13016_v55 }
 0x3f0   : > { %v9884_v41 = vpop.f32.mrf.mxu0  ;;  %v9936_v42 = vpop.f32.mrf.mxu1  ;;  %10195 = vmatmul.mubr.msk.f32.gmra.mxu0 %vm277_vm1, %v12808_v34 }
 0x3f1   : > { %v13150_v27 = vadd.f32 %v5782_v0, %v5449_v22  ;;  %v5452_v25 = vadd.f32 %v9884_v41, %v13021_v60  ;;  %10197 = vmatprep.mubr.msk.f32.mxu0 %vm277_vm1, %v7423_v17 }
 0x3f2   : > { %v5404_v13 = vpop.f32.mrf.mxu0  ;;  %v5792_v28 = vpop.f32.mrf.mxu1 }
 0x3f3   : > { %v13154_v21 = vadd.f32 %v9936_v42, %v5452_v25  ;;  %v5451_v7 = vadd.f32 %v5404_v13, %v13028_v18 }
 0x3f4   : > { %v9887_v39 = vpop.f32.mrf.mxu0  ;;  %v9939_v55 = vpop.f32.mrf.mxu1  ;;  %10198 = vmatmul.mubr.msk.f32.gmra.mxu0 %vm277_vm1, %v7424_v23 }
 0x3f5   : > { %v13158_v47 = vadd.f32 %v5792_v28, %v5451_v7  ;;  %v5454_v34 = vadd.f32 %v9887_v39, %v13032_v15 }
 0x3f6   : > { %v5414_v9 = vpop.f32.mrf.mxu0  ;;  %v5802_v56 = vpop.f32.mrf.mxu1 }
 0x3f7   : > { %v13161_v60 = vadd.f32 %v9939_v55, %v5454_v34  ;;  %v5453_v10 = vadd.f32 %v5414_v9, %v13037_v31 }
 0x3f8   : > { %v9946_v12 = vpop.f32.mrf.mxu0  ;;  %v13164_v29 = vpop.f32.mrf.mxu1 }
 0x3f9   : > { %v13166_v11 = vadd.f32 %v5802_v56, %v5453_v10  ;;  %v13169_v18 = vadd.f32 %v9946_v12, %v13041_v48 }
 0x3fa   : > { %v6039_v26 = vpop.f32.mrf.mxu0  ;;  %v13171_v38 = vpop.f32.mrf.mxu1 }
 0x3fb   : > { %v13174_v37 = vadd.f32 %v6039_v26, %v13044_v4 }
 0x3fc   : > { %v9949_v15 = vpop.f32.mrf.mxu0  ;;  %v13176_v20 = vpop.f32.mrf.mxu1 }
 0x3fd   : > { %v13179_v57 = vadd.f32 %v9949_v15, %v13048_v44 }
 0x3fe   : > { %v6049_v31 = vpop.f32.mrf.mxu0  ;;  %v13181_v61 = vpop.f32.mrf.mxu1 }
 0x3ff   : > { %v13184_v30 = vadd.f32 %v6049_v31, %v13052_v43 }
 0x400   : > { %v9952_v48 = vpop.f32.mrf.mxu0  ;;  %v13186_v59 = vpop.f32.mrf.mxu1 }
 0x401   : > { %v13189_v24 = vadd.f32 %v9952_v48, %v13056_v3 }
 0x402   : > { %v6059_v4 = vpop.f32.mrf.mxu0  ;;  %v13191_v62 = vpop.f32.mrf.mxu1 }
 0x403   : > { %v13194_v14 = vadd.f32 %v6059_v4, %v13060_v5 }
 0x404   : > { %v9955_v44 = vpop.f32.mrf.mxu0  ;;  %v13196_v0 = vpop.f32.mrf.mxu1 }
 0x405   : > { %v13199_v17 = vadd.f32 %v9955_v44, %v13064_v33 }
 0x406   : > { %v6069_v43 = vpop.f32.mrf.mxu0  ;;  %v13201_v22 = vpop.f32.mrf.mxu1 }
 0x407   : > { %v13204_v41 = vadd.f32 %v6069_v43, %v13068_v58 }
 0x408   : > { %v9958_v3 = vpop.f32.mrf.mxu0  ;;  %v13206_v42 = vpop.f32.mrf.mxu1 }
 0x409   : > { %v13209_v25 = vadd.f32 %v9958_v3, %v13072_v36 }
 0x40a   : > { %v6079_v5 = vpop.f32.mrf.mxu0  ;;  %v13211_v23 = vpop.f32.mrf.mxu1 }
 0x40b   : > { %v13214_v13 = vadd.f32 %v6079_v5, %v13076_v8 }
 0x40c   : > { %v9961_v33 = vpop.f32.mrf.mxu0  ;;  %v13216_v28 = vpop.f32.mrf.mxu1 }
 0x40d   : > { %v13219_v7 = vadd.f32 %v9961_v33, %v13080_v54 }
 0x40e   : > { %v6089_v58 = vpop.f32.mrf.mxu0  ;;  %v13221_v39 = vpop.f32.mrf.mxu1 }
 0x40f   : > { %v13224_v55 = vadd.f32 %v6089_v58, %v13084_v35 }
 0x410   : > { %v9964_v36 = vpop.f32.mrf.mxu0  ;;  %v13226_v34 = vpop.f32.mrf.mxu1 }
 0x411   : > { %v13229_v9 = vadd.f32 %v9964_v36, %v13088_v32 }
 0x412   : > { %v6099_v8 = vpop.f32.mrf.mxu0  ;;  %v13231_v56 = vpop.f32.mrf.mxu1 }
 0x413   : > { %v13234_v10 = vadd.f32 %v6099_v8, %v13092_v63 }
 0x414   : > { %v9967_v54 = vpop.f32.mrf.mxu0  ;;  %v13236_v12 = vpop.f32.mrf.mxu1 }
 0x415   : > { %v13239_v26 = vadd.f32 %v9967_v54, %v13096_v51 }
 0x416   : > { %v6109_v35 = vpop.f32.mrf.mxu0  ;;  %v13241_v15 = vpop.f32.mrf.mxu1 }
 0x417   : > { %13969 = vst [vmem:[#allocation11_spill] sm:$0xff] %v13241_v15  ;;  %v13244_v31 = vadd.f32 %v6109_v35, %v13100_v45 }
 0x418   : > { %v9970_v32 = vpop.f32.mrf.mxu0  ;;  %v13246_v48 = vpop.f32.mrf.mxu1 }
 0x419   : > { %13970 = vst [vmem:[#allocation50_spill] sm:$0xff] %v13244_v31  ;;  %13971 = vst [vmem:[#allocation53_spill] sm:$0xff] %v13246_v48  ;;  %v13249_v4 = vadd.f32 %v9970_v32, %v13104_v52 }
 0x41a   : > { %v6119_v63 = vpop.f32.mrf.mxu0  ;;  %v13251_v44 = vpop.f32.mrf.mxu1 }
 0x41b   : > { %13972 = vst [vmem:[#allocation90_spill] sm:$0xff] %v13249_v4  ;;  %13973 = vst [vmem:[#allocation27_spill] sm:$0xff] %v13251_v44  ;;  %v13254_v43 = vadd.f32 %v6119_v63, %v13108_v50 }
 0x41c   : > { %v9973_v51 = vpop.f32.mrf.mxu0  ;;  %v13256_v3 = vpop.f32.mrf.mxu1 }
 0x41d   : > { %13974 = vst [vmem:[#allocation28_spill] sm:$0xff] %v13254_v43  ;;  %13975 = vst [vmem:[#allocation52_spill] sm:$0xff] %v13256_v3  ;;  %v13259_v5 = vadd.f32 %v9973_v51, %v13112_v19 }
 0x41e   : > { %v6129_v45 = vpop.f32.mrf.mxu0  ;;  %v13261_v33 = vpop.f32.mrf.mxu1 }
 0x41f   : > { %13976 = vst [vmem:[#allocation51_spill] sm:$0xff] %v13259_v5  ;;  %13977 = vst [vmem:[#allocation91_spill] sm:$0xff] %v13261_v33  ;;  %v13264_v58 = vadd.f32 %v6129_v45, %v13116_v6 }
 0x420   : > { %v9976_v52 = vpop.f32.mrf.mxu0  ;;  %v13266_v36 = vpop.f32.mrf.mxu1 }
 0x421   : > { %13978 = vst [vmem:[#allocation12_spill] sm:$0xff] %v13264_v58  ;;  %13979 = vst [vmem:[#allocation13_spill] sm:$0xff] %v13266_v36  ;;  %v13269_v8 = vadd.f32 %v9976_v52, %v13120_v46 }
 0x422   : > { %v6139_v50 = vpop.f32.mrf.mxu0  ;;  %v13271_v54 = vpop.f32.mrf.mxu1 }
 0x423   : > { %13980 = vst [vmem:[#allocation54_spill] sm:$0xff] %v13269_v8  ;;  %13981 = vst [vmem:[#allocation57_spill] sm:$0xff] %v13271_v54  ;;  %v13274_v35 = vadd.f32 %v6139_v50, %v13124_v53 }
 0x424   : > { %v9979_v19 = vpop.f32.mrf.mxu0  ;;  %v13276_v32 = vpop.f32.mrf.mxu1 }
 0x425   : > { %13982 = vst [vmem:[#allocation93_spill] sm:$0xff] %v13274_v35  ;;  %13983 = vst [vmem:[#allocation29_spill] sm:$0xff] %v13276_v32  ;;  %v13279_v63 = vadd.f32 %v9979_v19, %v13128_v16 }
 0x426   : > { %v6149_v6 = vpop.f32.mrf.mxu0  ;;  %v13281_v51 = vpop.f32.mrf.mxu1 }
 0x427   : > { %13984 = vst [vmem:[#allocation30_spill] sm:$0xff] %v13279_v63  ;;  %13985 = vst [vmem:[#allocation56_spill] sm:$0xff] %v13281_v51  ;;  %v13284_v45 = vadd.f32 %v6149_v6, %v13132_v49 }
 0x428   : > { %v9982_v46 = vpop.f32.mrf.mxu0  ;;  %v13286_v52 = vpop.f32.mrf.mxu1 }
 0x429   : > { %13986 = vst [vmem:[#allocation55_spill] sm:$0xff] %v13284_v45  ;;  %13987 = vst [vmem:[#allocation94_spill] sm:$0xff] %v13286_v52  ;;  %v13289_v54 = vadd.f32 %v9982_v46, %v13136_v1 }
 0x42a   : > { %v6159_v53 = vpop.f32.mrf.mxu0  ;;  %v13291_v50 = vpop.f32.mrf.mxu1 }
 0x42b   : > { %13988 = vst [vmem:[#allocation14_spill] sm:$0xff] %v13289_v54  ;;  %13989 = vst [vmem:[#allocation15_spill] sm:$0xff] %v13291_v50  ;;  %v13294_v32 = vadd.f32 %v6159_v53, %v13140_v2 }
 0x42c   : > { %v9985_v16 = vpop.f32.mrf.mxu0  ;;  %v13296_v19 = vpop.f32.mrf.mxu1 }
 0x42d   : > { %13990 = vst [vmem:[#allocation58_spill] sm:$0xff] %v13294_v32  ;;  %13991 = vst [vmem:[#allocation61_spill] sm:$0xff] %v13296_v19  ;;  %v13299_v51 = vadd.f32 %v9985_v16, %v13145_v40 }
 0x42e   : > { %v6169_v49 = vpop.f32.mrf.mxu0  ;;  %v13301_v6 = vpop.f32.mrf.mxu1 }
 0x42f   : > { %13992 = vst [vmem:[#allocation96_spill] sm:$0xff] %v13299_v51  ;;  %13993 = vst [vmem:[#allocation31_spill] sm:$0xff] %v13301_v6  ;;  %v13304_v52 = vadd.f32 %v6169_v49, %v13150_v27 }
 0x430   : > { %v9988_v1 = vpop.f32.mrf.mxu0  ;;  %v13306_v46 = vpop.f32.mrf.mxu1 }
 0x431   : > { %13994 = vst [vmem:[#allocation32_spill] sm:$0xff] %v13304_v52  ;;  %13995 = vst [vmem:[#allocation60_spill] sm:$0xff] %v13306_v46  ;;  %v13309_v50 = vadd.f32 %v9988_v1, %v13154_v21 }
 0x432   : > { %v6179_v2 = vpop.f32.mrf.mxu0  ;;  %v13311_v53 = vpop.f32.mrf.mxu1 }
 0x433   : > { %13996 = vst [vmem:[#allocation59_spill] sm:$0xff] %v13309_v50  ;;  %13997 = vst [vmem:[#allocation97_spill] sm:$0xff] %v13311_v53  ;;  %v13314_v19 = vadd.f32 %v6179_v2, %v13158_v47 }
 0x434   : > { %v9991_v40 = vpop.f32.mrf.mxu0  ;;  %v13316_v16 = vpop.f32.mrf.mxu1 }
 0x435   : > { %13998 = vst [vmem:[#allocation16_spill] sm:$0xff] %v13314_v19  ;;  %13999 = vst [vmem:[#allocation17_spill] sm:$0xff] %v13316_v16  ;;  %v13319_v6 = vadd.f32 %v9991_v40, %v13161_v60 }
 0x436   : > { %v6189_v27 = vpop.f32.mrf.mxu0  ;;  %v13321_v49 = vpop.f32.mrf.mxu1 }
 0x437   : > { %14000 = vst [vmem:[#allocation62_spill] sm:$0xff] %v13319_v6  ;;  %14001 = vst [vmem:[#allocation65_spill] sm:$0xff] %v13321_v49  ;;  %v13324_v46 = vadd.f32 %v6189_v27, %v13166_v11 }
 0x438   : > { %v10050_v21 = vpop.f32.mrf.mxu0  ;;  %v10102_v1 = vpop.f32.mrf.mxu1 }
 0x439   : > { %14002 = vst [vmem:[#allocation99_spill] sm:$0xff] %v13324_v46 }
 0x43a   : > { %v6815_v50 = vpop.f32.mrf.mxu0  ;;  %v7202_v52 = vpop.f32.mrf.mxu1 }
 0x43c   : > { %v10053_v53 = vpop.f32.mrf.mxu0  ;;  %v10105_v47 = vpop.f32.mrf.mxu1 }
 0x43e   : > { %v6825_v51 = vpop.f32.mrf.mxu0  ;;  %v13328_v16 = vpop.f32.mrf.mxu1 }
 0x440   : > { %v10056_v2 = vpop.f32.mrf.mxu0  ;;  %v13334_v49 = vpop.f32.mrf.mxu1 }
 0x442   : > { %v13326_v19 = vpop.f32.mrf.mxu0  ;;  %v13340_v46 = vpop.f32.mrf.mxu1 }
 0x444   : > { %v13330_v60 = vpop.f32.mrf.mxu0  ;;  %v13346_v54 = vpop.f32.mrf.mxu1 }
 0x446   : > { %v13332_v40 = vpop.f32.mrf.mxu0  ;;  %v13352_v35 = vpop.f32.mrf.mxu1 }
 0x448   : > { %v13336_v11 = vpop.f32.mrf.mxu0  ;;  %v13358_v33 = vpop.f32.mrf.mxu1 }
 0x44a   : > { %v13338_v27 = vpop.f32.mrf.mxu0  ;;  %v13364_v5 = vpop.f32.mrf.mxu1 }
 0x44c   : > { %v13342_v6 = vpop.f32.mrf.mxu0  ;;  %v13370_v48 = vpop.f32.mrf.mxu1 }
 0x44e   : > { %v13344_v32 = vpop.f32.mrf.mxu0 }
 0x450   : > { %v13348_v45 = vpop.f32.mrf.mxu0 }
 0x452   : > { %v13350_v63 = vpop.f32.mrf.mxu0 }
 0x453   : > { %14003 = vst [vmem:[#allocation33_spill] sm:$0xff] %v13350_v63 }
 0x454   : > { %v13354_v36 = vpop.f32.mrf.mxu0 }
 0x455   : > { %14004 = vst [vmem:[#allocation34_spill] sm:$0xff] %v13354_v36  ;;  %v13376_v36 = vpop.f32.mrf.mxu1 }
 0x456   : > { %v13356_v8 = vpop.f32.mrf.mxu0  ;;  %14012 = vst [vmem:[#allocation102_spill] sm:$0xff] %v13376_v36 }
 0x457   : > { %14005 = vst [vmem:[#allocation64_spill] sm:$0xff] %v13356_v8 }
 0x458   : > { %v13360_v58 = vpop.f32.mrf.mxu0 }
 0x459   : > { %14006 = vst [vmem:[#allocation63_spill] sm:$0xff] %v13360_v58 }
 0x45a   : > { %v13362_v3 = vpop.f32.mrf.mxu0 }
 0x45b   : > { %14007 = vst [vmem:[#allocation100_spill] sm:$0xff] %v13362_v3  ;;  %v13382_v3 = vpop.f32.mrf.mxu1 }
 0x45c   : > { %v13366_v44 = vpop.f32.mrf.mxu0  ;;  %14015 = vst [vmem:[#allocation68_spill] sm:$0xff] %v13382_v3 }
 0x45d   : > { %14008 = vst [vmem:[#allocation18_spill] sm:$0xff] %v13366_v44 }
 0x45e   : > { %v13368_v43 = vpop.f32.mrf.mxu0 }
 0x45f   : > { %14009 = vst [vmem:[#allocation19_spill] sm:$0xff] %v13368_v43  ;;  %v13388_v43 = vpop.f32.mrf.mxu1 }
 0x460   : > { %v13372_v4 = vpop.f32.mrf.mxu0  ;;  %14018 = vst [vmem:[#allocation20_spill] sm:$0xff] %v13388_v43 }
 0x461   : > { %14010 = vst [vmem:[#allocation66_spill] sm:$0xff] %v13372_v4 }
 0x462   : > { %v13374_v15 = vpop.f32.mrf.mxu0 }
 0x463   : > { %14011 = vst [vmem:[#allocation69_spill] sm:$0xff] %v13374_v15  ;;  %v13394_v15 = vpop.f32.mrf.mxu1 }
 0x464   : > { %v13378_v8 = vpop.f32.mrf.mxu0  ;;  %14021 = vst [vmem:[#allocation37_spill] sm:$0xff] %v13394_v15 }
 0x465   : > { %14013 = vst [vmem:[#allocation35_spill] sm:$0xff] %v13378_v8  ;;  %v13404_v3 = vpop.f32.mrf.mxu1 }
 0x466   : > { %v13380_v58 = vpop.f32.mrf.mxu0 }
 0x467   : > { %14014 = vst [vmem:[#allocation36_spill] sm:$0xff] %v13380_v58  ;;  %v6586_v58 = vadd.f32 %v13164_v29, %v13169_v18  ;;  %v6587_v29 = vadd.f32 %v13181_v61, %v13184_v30 }
 0x468   : > { %v13384_v31 = vpop.f32.mrf.mxu0 }
 0x469   : > { %14016 = vst [vmem:[#allocation67_spill] sm:$0xff] %v13384_v31  ;;  %v6585_v31 = vadd.f32 %v13171_v38, %v13174_v37  ;;  %v13417_v38 = vpop.f32.mrf.mxu1 }
 0x46a   : > { %v13386_v44 = vpop.f32.mrf.mxu0 }
 0x46b   : > { %14017 = vst [vmem:[#allocation103_spill] sm:$0xff] %v13386_v44  ;;  %v6975_v44 = vadd.f32 %v10050_v21, %v6586_v58  ;;  %v6590_v58 = vadd.f32 %v13186_v59, %v13189_v24 }
 0x46c   : > { %v13390_v63 = vpop.f32.mrf.mxu0 }
 0x46d   : > { %14019 = vst [vmem:[#allocation70_spill] sm:$0xff] %v13390_v63  ;;  %v6974_v63 = vadd.f32 %v6815_v50, %v6585_v31  ;;  %v7362_v18 = vadd.f32 %v10102_v1, %v6975_v44  ;;  %v6979_v50 = vadd.f32 %v10056_v2, %v6590_v58  ;;  %v13425_v44 = vpop.f32.mrf.mxu1 }
 0x46e   : > { %v13392_v4 = vpop.f32.mrf.mxu0 }
 0x46f   : > { %14020 = vst [vmem:[#allocation73_spill] sm:$0xff] %v13392_v4  ;;  %v6588_v4 = vadd.f32 %v13176_v20, %v13179_v57  ;;  %v7361_v21 = vadd.f32 %v7202_v52, %v6974_v63  ;;  %v6589_v20 = vadd.f32 %v13191_v62, %v13194_v14  ;;  %v6591_v14 = vadd.f32 %v13201_v22, %v13204_v41 }
 0x470   : > { %v13396_v36 = vpop.f32.mrf.mxu0  ;;  %v6594_v63 = vadd.f32 %v13206_v42, %v13209_v25 }
 0x471   : > { %14022 = vst [vmem:[#allocation38_spill] sm:$0xff] %v13396_v36  ;;  %v6978_v59 = vadd.f32 %v13326_v19, %v6589_v20  ;;  %v6980_v22 = vadd.f32 %v13332_v40, %v6591_v14  ;;  %v14029_v14 = vld [vmem:[#allocation68_spill] sm:$0xff] }
 0x472   : > { %v13400_v8 = vpop.f32.mrf.mxu0  ;;  %v6983_v42 = vadd.f32 %v13336_v11, %v6594_v63  ;;  %v6595_v11 = vadd.f32 %v13221_v39, %v13224_v55 }
 0x473   : > { %14023 = vst [vmem:[#allocation72_spill] sm:$0xff] %v13400_v8  ;;  %v6977_v8 = vadd.f32 %v10053_v53, %v6588_v4  ;;  %v6592_v4 = vadd.f32 %v13196_v0, %v13199_v17  ;;  %v7366_v17 = vadd.f32 %v13334_v49, %v6979_v50  ;;  %v7365_v19 = vadd.f32 %v13340_v46, %v6978_v59  ;;  %v14028_v59 = vld [vmem:[#allocation11_spill] sm:$0xff] }
 0x474   : > { %v13406_v43 = vpop.f32.mrf.mxu0  ;;  %v6593_v49 = vadd.f32 %v13211_v23, %v13214_v13  ;;  %v7370_v58 = vadd.f32 %v13358_v33, %v6983_v42  ;;  %v6984_v39 = vadd.f32 %v13344_v32, %v6595_v11  ;;  %v6600_v32 = vadd.f32 %v13236_v12, %v13239_v26  ;;  %v14035_v42 = vld [vmem:[#allocation28_spill] sm:$0xff] }
 0x475   : > { %14024 = vst [vmem:[#allocation71_spill] sm:$0xff] %v13406_v43  ;;  %v6976_v43 = vadd.f32 %v6825_v51, %v6587_v29  ;;  %v7364_v31 = vadd.f32 %v10105_v47, %v6977_v8  ;;  %v13441_v51 = vpop.f32.mrf.mxu1 }
 0x476   : > { %v13411_v15 = vpop.f32.mrf.mxu0  ;;  %v6982_v23 = vadd.f32 %v13338_v27, %v6593_v49  ;;  %v6598_v27 = vadd.f32 %v13226_v34, %v13229_v9 }
 0x477   : > { %v7363_v1 = vadd.f32 %v13328_v16, %v6976_v43  ;;  %v13455_v40 = vpop.f32.mrf.mxu1 }
 0x478   : > { %v10154_v37 = vpop.f32.mrf.mxu0  ;;  %v6987_v34 = vadd.f32 %v13348_v45, %v6598_v27  ;;  %v14027_v45 = vld [vmem:[#allocation50_spill] sm:$0xff] }
 0x479   : > { %v7749_v36 = vadd.f32 %v10154_v37, %v7362_v18  ;;  %v7367_v18 = vadd.f32 %v13352_v35, %v6980_v22  ;;  %v14033_v22 = vld [vmem:[#allocation20_spill] sm:$0xff] }
 0x47a   : > { %v7589_v57 = vpop.f32.mrf.mxu0 }
 0x47b   : > { %v7781_v61 = vmax.f32 %v7749_v36, 0.0  ;;  %v7748_v30 = vadd.f32 %v7589_v57, %v7361_v21  ;;  %v6981_v36 = vadd.f32 %v13330_v60, %v6592_v4  ;;  %v6596_v60 = vadd.f32 %v13216_v28, %v13219_v7  ;;  %v13469_v21 = vpop.f32.mrf.mxu1  ;;  %v14025_v4 = vld [vmem:[#allocation102_spill] sm:$0xff] }
 0x47c   : > { %v10157_v53 = vpop.f32.mrf.mxu0  ;;  %v7369_v57 = vadd.f32 %v13364_v5, %v6982_v23  ;;  %v14038_v23 = vld [vmem:[#allocation63_spill] sm:$0xff] }
 0x47d   : > { %7813 = vst.msk [vmem:[%s13429_s18 + $0x8] sm:$0xff] %vm277_vm1, %v7781_v61  ;;  %v7780_v24 = vmax.f32 %v7748_v30, 0.0  ;;  %v7751_v62 = vadd.f32 %v10157_v53, %v7364_v31  ;;  %v7368_v2 = vadd.f32 %v13346_v54, %v6981_v36  ;;  %v6985_v28 = vadd.f32 %v13342_v6, %v6596_v60  ;;  %v13483_v61 = vpop.f32.mrf.mxu1 }
 0x47e   : > { %v7599_v0 = vpop.f32.mrf.mxu0  ;;  %v6597_v6 = vadd.f32 %v13231_v56, %v13234_v10  ;;  %v7371_v53 = vadd.f32 %v14025_v4, %v6984_v39  ;;  %v14046_v4 = vld [vmem:[#allocation13_spill] sm:$0xff] }
 0x47f   : > { %7812 = vst.msk [vmem:[%s13429_s18] sm:$0xff] %vm277_vm1, %v7780_v24  ;;  %v7783_v43 = vmax.f32 %v7751_v62, 0.0  ;;  %v7750_v8 = vadd.f32 %v7599_v0, %v7363_v1  ;;  %v7372_v50 = vadd.f32 %v13370_v48, %v6985_v28  ;;  %v14026_v1 = vld [vmem:[#allocation33_spill] sm:$0xff]  ;;  %v6599_v24 = vadd.f32 %v14028_v59, %v14027_v45 }
 0x480   : > { %v10160_v52 = vpop.f32.mrf.mxu0  ;;  %v6986_v56 = vadd.f32 %v14026_v1, %v6597_v6  ;;  %v7374_v0 = vadd.f32 %v14029_v14, %v6987_v34  ;;  %v14043_v6 = vld [vmem:[#allocation91_spill] sm:$0xff] }
 0x481   : > { %7815 = vst.msk [vmem:[%s13429_s18 + $0x18] sm:$0xff] %vm277_vm1, %v7783_v43  ;;  %v7782_v41 = vmax.f32 %v7750_v8, 0.0  ;;  %v7753_v16 = vadd.f32 %v10160_v52, %v7366_v17  ;;  %v14030_v17 = vld [vmem:[#allocation34_spill] sm:$0xff]  ;;  %v14032_v8 = vld [vmem:[#allocation53_spill] sm:$0xff]  ;;  %v13497_v52 = vpop.f32.mrf.mxu1 }
 0x482   : > { %v7609_v47 = vpop.f32.mrf.mxu0  ;;  %v6989_v12 = vadd.f32 %v14030_v17, %v6600_v32  ;;  %v14031_v43 = vld [vmem:[#allocation90_spill] sm:$0xff] }
 0x483   : > { %7814 = vst.msk [vmem:[%s13429_s18 + $0x10] sm:$0xff] %vm277_vm1, %v7782_v41  ;;  %v7785_v25 = vmax.f32 %v7753_v16, 0.0  ;;  %v7752_v46 = vadd.f32 %v7609_v47, %v7365_v19  ;;  %v6602_v63 = vadd.f32 %v14032_v8, %v14031_v43  ;;  %v7373_v41 = vadd.f32 %v14033_v22, %v6986_v56  ;;  %v14034_v16 = vld [vmem:[#allocation64_spill] sm:$0xff]  ;;  %v14051_v43 = vld [vmem:[#allocation30_spill] sm:$0xff]  ;;  %v14052_v8 = vld [vmem:[#allocation29_spill] sm:$0xff] }
 0x484   : > { %v10163_v29 = vpop.f32.mrf.mxu0  ;;  %v6988_v49 = vadd.f32 %v14034_v16, %v6599_v24  ;;  %v14048_v24 = vld [vmem:[#allocation93_spill] sm:$0xff] }
 0x485   : > { %7817 = vst.msk [vmem:[%s13429_s18 + $0x28] sm:$0xff] %vm277_vm1, %v7785_v25  ;;  %v7784_v13 = vmax.f32 %v7752_v46, 0.0  ;;  %v7755_v54 = vadd.f32 %v10163_v29, %v7368_v2  ;;  %v14036_v25 = vld [vmem:[#allocation27_spill] sm:$0xff]  ;;  %v14037_v29 = vld [vmem:[#allocation37_spill] sm:$0xff] }
 0x486   : > { %v7619_v37 = vpop.f32.mrf.mxu0  ;;  %v6601_v46 = vadd.f32 %v14036_v25, %v14035_v42  ;;  %v7375_v27 = vadd.f32 %v13404_v3, %v6988_v49  ;;  %v14053_v16 = vld [vmem:[#allocation69_spill] sm:$0xff]  ;;  %v14055_v42 = vld [vmem:[#allocation56_spill] sm:$0xff] }
 0x487   : > { %7816 = vst.msk [vmem:[%s13429_s18 + $0x20] sm:$0xff] %vm277_vm1, %v7784_v13  ;;  %v7787_v7 = vmax.f32 %v7755_v54, 0.0  ;;  %v7754_v35 = vadd.f32 %v7619_v37, %v7367_v18  ;;  %v7376_v18 = vadd.f32 %v14037_v29, %v6989_v12  ;;  %v6991_v13 = vadd.f32 %v14038_v23, %v6602_v63  ;;  %v14039_v37 = vld [vmem:[#allocation51_spill] sm:$0xff]  ;;  %v14050_v12 = vld [vmem:[#allocation66_spill] sm:$0xff] }
 0x488   : > { %v10166_v20 = vpop.f32.mrf.mxu0  ;;  %v6608_v63 = vadd.f32 %v14052_v8, %v14051_v43  ;;  %v14056_v29 = vld [vmem:[#allocation35_spill] sm:$0xff]  ;;  %v14071_v8 = vld [vmem:[#allocation73_spill] sm:$0xff] }
 0x489   : > { %7819 = vst.msk [vmem:[%s13429_s18 + $0x38] sm:$0xff] %vm277_vm1, %v7787_v7  ;;  %v7786_v55 = vmax.f32 %v7754_v35, 0.0  ;;  %v7757_v33 = vadd.f32 %v10166_v20, %v7370_v58  ;;  %v14040_v58 = vld [vmem:[#allocation52_spill] sm:$0xff]  ;;  %v7312_v7 = vpop.f32.mrf.mxu1  ;;  %v7378_v34 = vadd.f32 %v13417_v38, %v6991_v13  ;;  %v14057_v13 = vld [vmem:[#allocation14_spill] sm:$0xff] }
 0x48a   : > { %v7629_v31 = vpop.f32.mrf.mxu0  ;;  %v6604_v28 = vadd.f32 %v14040_v58, %v14039_v37  ;;  %v14041_v20 = vld [vmem:[#allocation100_spill] sm:$0xff] }
 0x48b   : > { %7818 = vst.msk [vmem:[%s13429_s18 + $0x30] sm:$0xff] %vm277_vm1, %v7786_v55  ;;  %v7789_v9 = vmax.f32 %v7757_v33, 0.0  ;;  %v7756_v5 = vadd.f32 %v7629_v31, %v7369_v57  ;;  %v6990_v57 = vadd.f32 %v14041_v20, %v6601_v46  ;;  %v14042_v33 = vld [vmem:[#allocation12_spill] sm:$0xff]  ;;  %v10138_v1 = vpop.f32.mrf.mxu1 }
 0x48c   : > { %v10169_v30 = vpop.f32.mrf.mxu0  ;;  %v6603_v31 = vadd.f32 %v14043_v6, %v14042_v33 }
 0x48d   : > { %7821 = vst.msk [vmem:[%s13429_s18 + $0x48] sm:$0xff] %vm277_vm1, %v7789_v9  ;;  %v7788_v10 = vmax.f32 %v7756_v5, 0.0  ;;  %v7759_v48 = vadd.f32 %v10169_v30, %v7372_v50  ;;  %v14044_v9 = vld [vmem:[#allocation18_spill] sm:$0xff] }
 0x48e   : > { %v7639_v62 = vpop.f32.mrf.mxu0  ;;  %v6993_v5 = vadd.f32 %v14044_v9, %v6604_v28  ;;  %v14045_v30 = vld [vmem:[#allocation54_spill] sm:$0xff]  ;;  %v14063_v9 = vld [vmem:[#allocation96_spill] sm:$0xff] }
 0x48f   : > { %7820 = vst.msk [vmem:[%s13429_s18 + $0x40] sm:$0xff] %vm277_vm1, %v7788_v10  ;;  %v7791_v26 = vmax.f32 %v7759_v48, 0.0  ;;  %v7758_v36 = vadd.f32 %v7639_v62, %v7371_v53  ;;  %v6606_v53 = vadd.f32 %v14046_v4, %v14045_v30  ;;  %v7377_v10 = vadd.f32 %v13425_v44, %v6990_v57  ;;  %v14047_v48 = vld [vmem:[#allocation19_spill] sm:$0xff]  ;;  %v14049_v62 = vld [vmem:[#allocation57_spill] sm:$0xff]  ;;  %v14060_v57 = vld [vmem:[#allocation58_spill] sm:$0xff] }
 0x490   : > { %v10172_v19 = vpop.f32.mrf.mxu0  ;;  %v6992_v45 = vadd.f32 %v14047_v48, %v6603_v31  ;;  %v6605_v14 = vadd.f32 %v14049_v62, %v14048_v24  ;;  %v7380_v17 = vadd.f32 %v13441_v51, %v6993_v5  ;;  %v14062_v31 = vld [vmem:[#allocation67_spill] sm:$0xff]  ;;  %v14064_v5 = vld [vmem:[#allocation61_spill] sm:$0xff]  ;;  %v14066_v48 = vld [vmem:[#allocation32_spill] sm:$0xff] }
 0x491   : > { %7823 = vst.msk [vmem:[%s13429_s18 + $0x58] sm:$0xff] %vm277_vm1, %v7791_v26  ;;  %v7790_v47 = vmax.f32 %v7758_v36, 0.0  ;;  %v7761_v2 = vadd.f32 %v10172_v19, %v7374_v0  ;;  %v6995_v26 = vadd.f32 %v14050_v12, %v6606_v53  ;;  %v7322_v19 = vpop.f32.mrf.mxu1  ;;  %v14065_v53 = vld [vmem:[#allocation103_spill] sm:$0xff]  ;;  %v14068_v62 = vld [vmem:[#allocation70_spill] sm:$0xff]  ;;  %v14070_v12 = vld [vmem:[#allocation60_spill] sm:$0xff] }
 0x492   : > { %v7649_v60 = vpop.f32.mrf.mxu0  ;;  %v6994_v49 = vadd.f32 %v14053_v16, %v6605_v14  ;;  %v14073_v16 = vld [vmem:[#allocation97_spill] sm:$0xff] }
 0x493   : > { %7822 = vst.msk [vmem:[%s13429_s18 + $0x50] sm:$0xff] %vm277_vm1, %v7790_v47  ;;  %v7793_v54 = vmax.f32 %v7761_v2, 0.0  ;;  %v7760_v11 = vadd.f32 %v7649_v60, %v7373_v41  ;;  %v7379_v41 = vadd.f32 %v13455_v40, %v6992_v45  ;;  %v14054_v2 = vld [vmem:[#allocation55_spill] sm:$0xff]  ;;  %v7382_v60 = vadd.f32 %v13469_v21, %v6995_v26  ;;  %v10141_v37 = vpop.f32.mrf.mxu1 }
 0x494   : > { %v10175_v35 = vpop.f32.mrf.mxu0  ;;  %v6607_v25 = vadd.f32 %v14055_v42, %v14054_v2  ;;  %v7381_v28 = vadd.f32 %v13483_v61, %v6994_v49  ;;  %v14067_v45 = vld [vmem:[#allocation31_spill] sm:$0xff]  ;;  %v14074_v2 = vld [vmem:[#allocation38_spill] sm:$0xff] }
 0x495   : > { %7825 = vst.msk [vmem:[%s13429_s18 + $0x68] sm:$0xff] %vm277_vm1, %v7793_v54  ;;  %v7792_v39 = vmax.f32 %v7760_v11, 0.0  ;;  %v7763_v55 = vadd.f32 %v10175_v35, %v7376_v18  ;;  %v6997_v18 = vadd.f32 %v14056_v29, %v6608_v63  ;;  %v14058_v54 = vld [vmem:[#allocation94_spill] sm:$0xff]  ;;  %v14059_v35 = vld [vmem:[#allocation36_spill] sm:$0xff] }
 0x496   : > { %v7659_v50 = vpop.f32.mrf.mxu0  ;;  %v6610_v11 = vadd.f32 %v14058_v54, %v14057_v13  ;;  %v14077_v13 = vld [vmem:[#allocation72_spill] sm:$0xff] }
 0x497   : > { %7824 = vst.msk [vmem:[%s13429_s18 + $0x60] sm:$0xff] %vm277_vm1, %v7792_v39  ;;  %v7795_v32 = vmax.f32 %v7763_v55, 0.0  ;;  %v7762_v3 = vadd.f32 %v7659_v50, %v7375_v27  ;;  %v6996_v27 = vadd.f32 %v14059_v35, %v6607_v25  ;;  %v14061_v39 = vld [vmem:[#allocation15_spill] sm:$0xff]  ;;  %v7384_v6 = vadd.f32 %v13497_v52, %v6997_v18 }
 0x498   : > { %v10178_v56 = vpop.f32.mrf.mxu0  ;;  %v6609_v55 = vadd.f32 %v14061_v39, %v14060_v57  ;;  %v6999_v50 = vadd.f32 %v14062_v31, %v6610_v11  ;;  %v14080_v57 = vld [vmem:[#allocation71_spill] sm:$0xff] }
 0x499   : > { %7827 = vst.msk [vmem:[%s13429_s18 + $0x78] sm:$0xff] %vm277_vm1, %v7795_v32  ;;  %v7794_v38 = vmax.f32 %v7762_v3, 0.0  ;;  %v7765_v59 = vadd.f32 %v10178_v56, %v7378_v34  ;;  %v6612_v32 = vadd.f32 %v14064_v5, %v14063_v9  ;;  %v7332_v3 = vpop.f32.mrf.mxu1  ;;  %v7383_v4 = vadd.f32 %v7312_v7, %v6996_v27  ;;  %v14069_v7 = vld [vmem:[#allocation59_spill] sm:$0xff] }
 0x49a   : > { %v7669_v0 = vpop.f32.mrf.mxu0  ;;  %v6998_v56 = vadd.f32 %v14065_v53, %v6609_v55  ;;  %v7386_v24 = vadd.f32 %v10138_v1, %v6999_v50  ;;  %v6614_v26 = vadd.f32 %v14070_v12, %v14069_v7 }
 0x49b   : > { %7826 = vst.msk [vmem:[%s13429_s18 + $0x70] sm:$0xff] %vm277_vm1, %v7794_v38  ;;  %v7797_v36 = vmax.f32 %v7765_v59, 0.0  ;;  %v7764_v44 = vadd.f32 %v7669_v0, %v7377_v10  ;;  %v6611_v38 = vadd.f32 %v14067_v45, %v14066_v48  ;;  %v7001_v14 = vadd.f32 %v14068_v62, %v6612_v32 }
 0x49c   : > { %v10181_v22 = vpop.f32.mrf.mxu0  ;;  %v7385_v43 = vadd.f32 %v7322_v19, %v6998_v56  ;;  %v7003_v42 = vadd.f32 %v14074_v2, %v6614_v26  ;;  %v14075_v19 = vld [vmem:[#allocation62_spill] sm:$0xff] }
 0x49d   : > { %7829 = vst.msk [vmem:[%s13429_s18 + $0x88] sm:$0xff] %vm277_vm1, %v7797_v36  ;;  %v7796_v51 = vmax.f32 %v7764_v44, 0.0  ;;  %v7767_v47 = vadd.f32 %v10181_v22, %v7380_v17  ;;  %v10144_v36 = vpop.f32.mrf.mxu1  ;;  %v7000_v63 = vadd.f32 %v14071_v8, %v6611_v38 }
 0x49e   : > { %v7679_v46 = vpop.f32.mrf.mxu0 }
 0x49f   : > { %7828 = vst.msk [vmem:[%s13429_s18 + $0x80] sm:$0xff] %vm277_vm1, %v7796_v51  ;;  %v7799_v23 = vmax.f32 %v7767_v47, 0.0  ;;  %v7766_v40 = vadd.f32 %v7679_v46, %v7379_v41  ;;  %v14072_v41 = vld [vmem:[#allocation16_spill] sm:$0xff]  ;;  %v7388_v47 = vadd.f32 %v10141_v37, %v7001_v14  ;;  %v7342_v18 = vpop.f32.mrf.mxu1 }
 0x4a0   : > { %v10184_v58 = vpop.f32.mrf.mxu0  ;;  %v6613_v49 = vadd.f32 %v14073_v16, %v14072_v41 }
 0x4a1   : > { %7831 = vst.msk [vmem:[%s13429_s18 + $0x98] sm:$0xff] %vm277_vm1, %v7799_v23  ;;  %v7798_v21 = vmax.f32 %v7766_v40, 0.0  ;;  %v7769_v20 = vadd.f32 %v10184_v58, %v7382_v60  ;;  %v14076_v60 = vld [vmem:[#allocation17_spill] sm:$0xff]  ;;  %v7387_v40 = vadd.f32 %v7332_v3, %v7000_v63  ;;  %v14078_v58 = vld [vmem:[#allocation99_spill] sm:$0xff]  ;;  %v10147_v27 = vpop.f32.mrf.mxu1 }
 0x4a2   : > { %v7689_v33 = vpop.f32.mrf.mxu0  ;;  %v6616_v29 = vadd.f32 %v14076_v60, %v14075_v19  ;;  %v7002_v54 = vadd.f32 %v14077_v13, %v6613_v49 }
 0x4a3   : > { %7830 = vst.msk [vmem:[%s13429_s18 + $0x90] sm:$0xff] %vm277_vm1, %v7798_v21  ;;  %v7801_v34 = vmax.f32 %v7769_v20, 0.0  ;;  %v7768_v61 = vadd.f32 %v7689_v33, %v7381_v28  ;;  %v14079_v28 = vld [vmem:[#allocation65_spill] sm:$0xff]  ;;  %v7390_v20 = vadd.f32 %v10144_v36, %v7003_v42  ;;  %v7352_v9 = vpop.f32.mrf.mxu1 }
 0x4a4   : > { %v10187_v30 = vpop.f32.mrf.mxu0  ;;  %v6615_v35 = vadd.f32 %v14079_v28, %v14078_v58  ;;  %v7005_v39 = vadd.f32 %v14080_v57, %v6616_v29  ;;  %v7389_v31 = vadd.f32 %v7342_v18, %v7002_v54 }
 0x4a5   : > { %7833 = vst.msk [vmem:[%s13429_s18 + $0xa8] sm:$0xff] %vm277_vm1, %v7801_v34  ;;  %v7800_v10 = vmax.f32 %v7768_v61, 0.0  ;;  %v7771_v52 = vadd.f32 %v10187_v30, %v7384_v6 }
 0x4a6   : > { %v7699_v59 = vpop.f32.mrf.mxu0  ;;  %v7004_v50 = vadd.f32 %v13411_v15, %v6615_v35  ;;  %v7392_v32 = vadd.f32 %v10147_v27, %v7005_v39 }
 0x4a7   : > { %7832 = vst.msk [vmem:[%s13429_s18 + $0xa0] sm:$0xff] %vm277_vm1, %v7800_v10  ;;  %v7803_v0 = vmax.f32 %v7771_v52, 0.0  ;;  %v7770_v17 = vadd.f32 %v7699_v59, %v7383_v4 }
 0x4a8   : > { %v10190_v44 = vpop.f32.mrf.mxu0  ;;  %v7391_v53 = vadd.f32 %v7352_v9, %v7004_v50 }
 0x4a9   : > { %7835 = vst.msk [vmem:[%s13429_s18 + $0xb8] sm:$0xff] %vm277_vm1, %v7803_v0  ;;  %v7802_v22 = vmax.f32 %v7770_v17, 0.0  ;;  %v7773_v1 = vadd.f32 %v10190_v44, %v7386_v24 }
 0x4aa   : > { %v7709_v51 = vpop.f32.mrf.mxu0 }
 0x4ab   : > { %7834 = vst.msk [vmem:[%s13429_s18 + $0xb0] sm:$0xff] %vm277_vm1, %v7802_v22  ;;  %v7805_v25 = vmax.f32 %v7773_v1, 0.0  ;;  %v7772_v46 = vadd.f32 %v7709_v51, %v7385_v43 }
 0x4ac   : > { %v10193_v23 = vpop.f32.mrf.mxu0 }
 0x4ad   : > { %7837 = vst.msk [vmem:[%s13429_s18 + $0xc8] sm:$0xff] %vm277_vm1, %v7805_v25  ;;  %v7804_v11 = vmax.f32 %v7772_v46, 0.0  ;;  %v7775_v37 = vadd.f32 %v10193_v23, %v7388_v47 }
 0x4ae   : > { %v7719_v21 = vpop.f32.mrf.mxu0 }
 0x4af   : > { %7836 = vst.msk [vmem:[%s13429_s18 + $0xc0] sm:$0xff] %vm277_vm1, %v7804_v11  ;;  %v7807_v55 = vmax.f32 %v7775_v37, 0.0  ;;  %v7774_v33 = vadd.f32 %v7719_v21, %v7387_v40 }
 0x4b0   : > { %v10196_v6 = vpop.f32.mrf.mxu0 }
 0x4b1   : > { %7839 = vst.msk [vmem:[%s13429_s18 + $0xd8] sm:$0xff] %vm277_vm1, %v7807_v55  ;;  %v7806_v34 = vmax.f32 %v7774_v33, 0.0  ;;  %v7777_v61 = vadd.f32 %v10196_v6, %v7390_v20 }
 0x4b2   : > { %v7729_v5 = vpop.f32.mrf.mxu0 }
 0x4b3   : > { %7838 = vst.msk [vmem:[%s13429_s18 + $0xd0] sm:$0xff] %vm277_vm1, %v7806_v34  ;;  %v7809_v3 = vmax.f32 %v7777_v61, 0.0  ;;  %v7776_v30 = vadd.f32 %v7729_v5, %v7389_v31 }
 0x4b4   : > { %v10199_v4 = vpop.f32.mrf.mxu0 }
 0x4b5   : > { %7841 = vst.msk [vmem:[%s13429_s18 + $0xe8] sm:$0xff] %vm277_vm1, %v7809_v3  ;;  %v7808_v15 = vmax.f32 %v7776_v30, 0.0  ;;  %v7779_v56 = vadd.f32 %v10199_v4, %v7392_v32 }
 0x4b6   : > { %v7739_v10 = vpop.f32.mrf.mxu0 }
 0x4b7   : > { %7840 = vst.msk [vmem:[%s13429_s18 + $0xe0] sm:$0xff] %vm277_vm1, %v7808_v15  ;;  %v7811_v52 = vmax.f32 %v7779_v56, 0.0  ;;  %v7778_v48 = vadd.f32 %v7739_v10, %v7391_v53 }
 0x4b9   : > { %7843 = vst.msk [vmem:[%s13429_s18 + $0xf8] sm:$0xff] %vm277_vm1, %v7811_v52  ;;  %v7810_v45 = vmax.f32 %v7778_v48, 0.0 }
 0x4bb   : > { %7842 = vst.msk [vmem:[%s13429_s18 + $0xf0] sm:$0xff] %vm277_vm1, %v7810_v45 }
 0x4bc   : > { %10258 = shalt.err (!%p10255_p3)
}
 0x4bd   : > { %s10259_s14 = scalar_lea.hbm %s13601_s23, 4096  ;;  %s10263_s17 = scalar_lea.hbm %s13658_s7, 8192 }
 0x4be   : > { %p10260_p4 = scmp.ne.s32.totalorder %s13601_s23, %s10259_s14  ;;  %p10264_p9 = scmp.lt.s32.totalorder %s13601_s23, %s13658_s7 }
 0x4bf   : > { %p10265_p10 = scmp.lt.s32.totalorder %s10263_s17, %s10259_s14 }
 0x4c0   : > { %p10261_p7 = pnand %p10260_p4, %p10389_p5 }
 0x4c1   : > { %p10266_p11 = por %p10265_p10, %p10264_p9 }
 0x4c2   : > { %p10262_p8 = pneg %p10261_p7 }
 0x4c4   : > { %p10267_p12 = pnand %p10266_p11, %p10262_p8 }
 0x4c6   : > { %10270 = shalt.err (!%p10267_p12)
}
 0x4c7   : > { %s10309_s21 = smov 128   ;;  %s10310_s22 = smov 8  }
 0x4c8   : > { %10202 = dma.vmem_to_hbm [thread:$0]  (%p10389_p5), %s13603_s20, 4096, %s13601_s23, %s13611_s28, %s10309_s21, %s10309_s21, %s10310_s22  }
 0x4c9 PF: > { %p10208_p13 = scmp.ge.s32.totalorder %s10305_s27, 2  ;;  %s7873_s29 = sand.u32 1, %s10293_s24  }
 0x4ca   : > { %s7874_s8 = scalar_lea.sflag [#allocation5], %s7873_s29 }
 0x4cb   : > { %p10205_p0 = pnand %p10208_p13, %p10393_p6 }
 0x4cd   : > { %p10206_p1 = pneg %p10205_p0 }
 0x4cf   : > { %10288 = dma.done.wait (%p10206_p1), %s7874_s8, 4096  }
 0x4d0   : > { %10290 = vsyncadd (%p10206_p1), %s7874_s8, 4294963200  ;;  %p17_p2 = scmp.ge.s32.totalorder %s10376_s30, 4   ;;  %s14081_s24 = smov %s10297_s25 }
 0x4d1   : > { %s14082_s25 = smov %s10301_s26  ;;  %s14083_s26 = smov %s10387_s10 }
 0x4d2   : > { %s14084_s27 = smov %s10376_s30  ;;  %19 = sbr.rel (!%p17_p2) target bundleno = 3 (0x3), region = 93 }
 0x4d7   :  { %7879 = vsyncpa [#allocation5], 1 }
 0x4d8   :  { %7881 = vsyncpa [#allocation5 + $0x1], 1 }

</bundles_post_ra>
